<compile_context>
chip_gen: v7x
topology: tpu7x:2x2x1
jax: 0.10.0
libtpu: 0.0.40
codegen_flags: <defaults>
</compile_context>

<pallas_src>
import functools

import jax
import jax.numpy as jnp
import numpy as np
from jax.experimental import pallas as pl
from jax.experimental.pallas import tpu as pltpu

_LANE = 128
_SUBLANE = 8


def _round_up(n, m):
    return ((n + m - 1) // m) * m


def _lstm_kernel(g0_ref,
                 whh0_ref,
                 wih1_ref, whh1_ref, b1_ref,
                 wih2_ref, whh2_ref, b2_ref,
                 wlin_ref, blin_ref,
                 out_ref,
                 h1_ref, c1_ref, h2_ref, c2_ref, h3_ref, c3_ref,
                 *, seq_len, time_chunk, unroll):
    """One time-chunk per grid step; h/c carried in VMEM scratch across steps."""
    t_chunk = pl.program_id(0)
    Hp = h1_ref.shape[-1]

    @pl.when(t_chunk == 0)
    def _init():
        for r in (h1_ref, c1_ref, h2_ref, c2_ref, h3_ref, c3_ref):
            r[...] = jnp.zeros_like(r)

    # Weights are VMEM-resident across the grid (constant index_map); these are
    # VMEM->vreg reads, not HBM DMAs.
    whh0 = whh0_ref[...]
    wih1 = wih1_ref[...]
    whh1 = whh1_ref[...]
    wih2 = wih2_ref[...]
    whh2 = whh2_ref[...]
    b1 = b1_ref[...]          # (1, Gp): sublane-broadcast in the add, not materialized
    b2 = b2_ref[...]

    def to_hc(gates, c):
        # Per-gate slabs are Hp wide (lane-aligned).  Gate/elementwise math in f32.
        i = jax.nn.sigmoid(gates[:, 0 * Hp:1 * Hp])
        f = jax.nn.sigmoid(gates[:, 1 * Hp:2 * Hp])
        g = jnp.tanh(gates[:, 2 * Hp:3 * Hp])
        o = jax.nn.sigmoid(gates[:, 3 * Hp:4 * Hp])
        c_new = f * c + i * g
        return o * jnp.tanh(c_new), c_new

    def mm(a_bf16, w_bf16):
        # bf16 operands (MXU-native), f32 accumulation.
        return jnp.dot(a_bf16, w_bf16, preferred_element_type=jnp.float32)

    def step(s, carry):
        h1, c1, h2, c2, h3, c3 = carry
        u = t_chunk * time_chunk + s          # wavefront iteration index

        # Wavefront: layer L processes global time (u - L + 1), all from the
        # *carried* states -> the five matmuls below are mutually independent.
        v1 = u < seq_len                                   # layer-1 @ time u
        v2 = jnp.logical_and(u >= 1, u <= seq_len)         # layer-2 @ time u-1
        v3 = jnp.logical_and(u >= 2, u <= seq_len + 1)     # layer-3 @ time u-2

        h1b = h1.astype(jnp.bfloat16)
        h2b = h2.astype(jnp.bfloat16)
        h3b = h3.astype(jnp.bfloat16)

        gates1 = g0_ref[s] + mm(h1b, whh0)                     # input proj + bias pre-folded
        gates2 = mm(h1b, wih1) + mm(h2b, whh1) + b1
        gates3 = mm(h2b, wih2) + mm(h3b, whh2) + b2

        h1n, c1n = to_hc(gates1, c1)
        h2n, c2n = to_hc(gates2, c2)
        h3n, c3n = to_hc(gates3, c3)

        # Masks cover pipeline fill/drain of the wavefront and padded tail steps.
        h1 = jnp.where(v1, h1n, h1); c1 = jnp.where(v1, c1n, c1)
        h2 = jnp.where(v2, h2n, h2); c2 = jnp.where(v2, c2n, c2)
        h3 = jnp.where(v3, h3n, h3); c3 = jnp.where(v3, c3n, c3)
        return h1, c1, h2, c2, h3, c3

    carry0 = (h1_ref[...], c1_ref[...], h2_ref[...],
              c2_ref[...], h3_ref[...], c3_ref[...])
    h1, c1, h2, c2, h3, c3 = jax.lax.fori_loop(0, time_chunk, step, carry0,
                                               unroll=unroll)
    h1_ref[...] = h1; c1_ref[...] = c1
    h2_ref[...] = h2; c2_ref[...] = c2
    h3_ref[...] = h3; c3_ref[...] = c3

    @pl.when(t_chunk == pl.num_programs(0) - 1)
    def _head():
        logits = jnp.dot(h3.astype(jnp.bfloat16), wlin_ref[...],
                         preferred_element_type=jnp.float32) + blin_ref[...]
        out_ref[...] = jax.nn.sigmoid(logits)


@functools.partial(jax.jit, static_argnames=("n_hidden", "horizon", "time_chunk"))
def lstm_forward(x, params, *, n_hidden, horizon, time_chunk=4):
    """x: (B, T, F) float32, batch_first like the PyTorch module."""
    B, T, F = x.shape
    H = n_hidden
    Hp = _round_up(H, _LANE)
    Gp = 4 * Hp
    HORp = _round_up(horizon, _LANE)
    Bp = _round_up(max(B, _SUBLANE), _SUBLANE)

    # Layer-0 input projection over all time steps in one matmul (bias folded in).
    # Removes F (and its lane padding) from the recurrence; f32 for accuracy.
    g0 = jnp.einsum("btf,fg->btg", x, params["w_in0"]) + params["b0"]   # (B, T, Gp)

    # Wavefront needs T + 2 iterations (2 drain steps for layers 2/3).
    n_chunks = pl.cdiv(T + 2, time_chunk)
    t_pad = n_chunks * time_chunk
    g0_p = jnp.zeros((t_pad, Bp, Gp), jnp.float32)
    g0_p = g0_p.at[:T, :B, :].set(jnp.transpose(g0, (1, 0, 2)))

    def resident(a):
        nd = a.ndim
        return pl.BlockSpec(a.shape, lambda t, _nd=nd: (0,) * _nd)

    kern = functools.partial(_lstm_kernel, seq_len=T, time_chunk=time_chunk,
                             unroll=min(time_chunk, 8))

    out = pl.pallas_call(
        kern,
        out_shape=jax.ShapeDtypeStruct((Bp, HORp), jnp.float32),
        grid_spec=pltpu.PrefetchScalarGridSpec(
            num_scalar_prefetch=0,
            grid=(n_chunks,),
            in_specs=[
                pl.BlockSpec((time_chunk, Bp, Gp), lambda t: (t, 0, 0)),
                resident(params["whh0"]),
                resident(params["wih1"]), resident(params["whh1"]), resident(params["b1"]),
                resident(params["wih2"]), resident(params["whh2"]), resident(params["b2"]),
                resident(params["wlin"]), resident(params["blin"]),
            ],
            out_specs=pl.BlockSpec((Bp, HORp), lambda t: (0, 0)),
            scratch_shapes=[pltpu.VMEM((Bp, Hp), jnp.float32)] * 6,
        ),
        compiler_params=pltpu.CompilerParams(
            dimension_semantics=("arbitrary",),
            vmem_limit_bytes=32 * 1024 * 1024,
        ),
    )(g0_p, params["whh0"],
      params["wih1"], params["whh1"], params["b1"],
      params["wih2"], params["whh2"], params["b2"],
      params["wlin"], params["blin"])

    return out[:B, :horizon]


def init_params(key, features, n_hidden, horizon):
    """Deterministic PyTorch-shaped parameters (LSTM gate order [i, f, g, o])."""
    H = n_hidden
    stdv = 1.0 / np.sqrt(H)
    keys = jax.random.split(key, 14)
    k = iter(keys)
    u = lambda shape: jax.random.uniform(next(k), shape, jnp.float32, -stdv, stdv)
    p = {}
    in_sizes = [features, H, H]
    for l in range(3):
        p[f"w_ih_{l}"] = u((4 * H, in_sizes[l]))   # weight_ih_l{l}
        p[f"w_hh_{l}"] = u((4 * H, H))             # weight_hh_l{l}
        p[f"b_ih_{l}"] = u((4 * H,))
        p[f"b_hh_{l}"] = u((4 * H,))
    p["w_lin"] = u((horizon, H))                   # Linear.weight
    p["b_lin"] = u((horizon,))                     # Linear.bias
    return p


def pack_params(p, features, n_hidden, horizon):
    """Transpose/pad PyTorch params into the kernel layout.

    Gate columns are laid out in per-gate slabs of width Hp = round_up(H, 128);
    all padding is zeros (value-preserving: padded hidden lanes stay exactly 0).
    Recurrent / inter-layer / head weights are stored bf16 (matmul operands);
    biases and the layer-0 projection stay f32.
    """
    H, F, HOR = n_hidden, features, horizon
    Hp = _round_up(H, _LANE)
    Gp = 4 * Hp
    HORp = _round_up(HOR, _LANE)

    def slab_cols(w_t, rows_pad):                  # (In, 4H) -> (rows_pad, Gp)
        In = w_t.shape[0]
        out = np.zeros((rows_pad, Gp), np.float32)
        for g in range(4):
            out[:In, g * Hp:g * Hp + H] = w_t[:, g * H:(g + 1) * H]
        return out

    def slab_bias(b):                              # (4H,) -> (1, Gp)
        out = np.zeros((1, Gp), np.float32)
        for g in range(4):
            out[0, g * Hp:g * Hp + H] = b[g * H:(g + 1) * H]
        return out

    w_in0 = slab_cols(np.asarray(p["w_ih_0"]).T, F)                       # (F, Gp)
    b0 = slab_bias(np.asarray(p["b_ih_0"]) + np.asarray(p["b_hh_0"]))     # (1, Gp)
    whh0 = slab_cols(np.asarray(p["w_hh_0"]).T, Hp)                       # (Hp, Gp)

    wih1 = slab_cols(np.asarray(p["w_ih_1"]).T, Hp)
    whh1 = slab_cols(np.asarray(p["w_hh_1"]).T, Hp)
    b1 = slab_bias(np.asarray(p["b_ih_1"]) + np.asarray(p["b_hh_1"]))
    wih2 = slab_cols(np.asarray(p["w_ih_2"]).T, Hp)
    whh2 = slab_cols(np.asarray(p["w_hh_2"]).T, Hp)
    b2 = slab_bias(np.asarray(p["b_ih_2"]) + np.asarray(p["b_hh_2"]))

    wlin = np.zeros((Hp, HORp), np.float32)
    wlin[:H, :HOR] = np.asarray(p["w_lin"]).T
    blin = np.zeros((1, HORp), np.float32)
    blin[0, :HOR] = np.asarray(p["b_lin"])

    bf = lambda a: jnp.asarray(a, jnp.bfloat16)
    f32 = lambda a: jnp.asarray(a, jnp.float32)
    return dict(
        w_in0=f32(w_in0), b0=f32(b0),
        whh0=bf(whh0),
        wih1=bf(wih1), whh1=bf(whh1), b1=f32(b1),
        wih2=bf(wih2), whh2=bf(whh2), b2=f32(b2),
        wlin=bf(wlin), blin=f32(blin),
    )


def reference_forward(x, p, n_hidden):
    """Pure-JAX f32 eval-mode reference of the same forward pass."""
    H = n_hidden
    B, T, _ = x.shape

    def cell(x_t, h, c, w_ih, w_hh, b_ih, b_hh):
        g = x_t @ w_ih.T + h @ w_hh.T + b_ih + b_hh
        i = jax.nn.sigmoid(g[:, 0 * H:1 * H])
        f = jax.nn.sigmoid(g[:, 1 * H:2 * H])
        gg = jnp.tanh(g[:, 2 * H:3 * H])
        o = jax.nn.sigmoid(g[:, 3 * H:4 * H])
        c = f * c + i * gg
        h = o * jnp.tanh(c)
        return h, c

    zeros = jnp.zeros((B, H), jnp.float32)
    h1 = c1 = h2 = c2 = h3 = c3 = zeros
    for t in range(T):
        h1, c1 = cell(x[:, t], h1, c1, p["w_ih_0"], p["w_hh_0"], p["b_ih_0"], p["b_hh_0"])
        h2, c2 = cell(h1, h2, c2, p["w_ih_1"], p["w_hh_1"], p["b_ih_1"], p["b_hh_1"])
        h3, c3 = cell(h2, h3, c3, p["w_ih_2"], p["w_hh_2"], p["b_ih_2"], p["b_hh_2"])
    return jax.nn.sigmoid(h3 @ p["w_lin"].T + p["b_lin"])


if __name__ == "__main__":
    B, T, FEATURES, HIDDEN, HORIZON = 2, 8, 4, 32, 5

    key = jax.random.PRNGKey(0)
    kx, kp = jax.random.split(key)
    x = jax.random.normal(kx, (B, T, FEATURES), jnp.float32)

    torch_params = init_params(kp, FEATURES, HIDDEN, HORIZON)
    kernel_params = pack_params(torch_params, FEATURES, HIDDEN, HORIZON)

    out = lstm_forward(x, kernel_params, n_hidden=HIDDEN, horizon=HORIZON, time_chunk=4)
    out = jax.block_until_ready(out)

    ref = reference_forward(x, torch_params, HIDDEN)
    # Tolerance relaxed for bf16 matmul operands (f32 accumulation / f32 cell state).
    np.testing.assert_allclose(np.asarray(out), np.asarray(ref), rtol=3e-2, atol=3e-2)
    assert out.shape == (B, HORIZON)
    print("KERNEL_OK")
</pallas_src>

<mosaic_0001>
module attributes {stable_mosaic.version = 11 : i64} {
  func.func @_lstm_kernel(%arg0: i32, %arg1: memref<4x8x512xf32, #tpu.memory_space<vmem>>, %arg2: memref<128x512xbf16, #tpu.memory_space<vmem>>, %arg3: memref<128x512xbf16, #tpu.memory_space<vmem>>, %arg4: memref<128x512xbf16, #tpu.memory_space<vmem>>, %arg5: memref<1x512xf32, #tpu.memory_space<vmem>>, %arg6: memref<128x512xbf16, #tpu.memory_space<vmem>>, %arg7: memref<128x512xbf16, #tpu.memory_space<vmem>>, %arg8: memref<1x512xf32, #tpu.memory_space<vmem>>, %arg9: memref<128x128xbf16, #tpu.memory_space<vmem>>, %arg10: memref<1x128xf32, #tpu.memory_space<vmem>>, %arg11: memref<8x128xf32, #tpu.memory_space<vmem>>, %arg12: memref<8x128xf32, #tpu.memory_space<vmem>>, %arg13: memref<8x128xf32, #tpu.memory_space<vmem>>, %arg14: memref<8x128xf32, #tpu.memory_space<vmem>>, %arg15: memref<8x128xf32, #tpu.memory_space<vmem>>, %arg16: memref<8x128xf32, #tpu.memory_space<vmem>>, %arg17: memref<8x128xf32, #tpu.memory_space<vmem>>) attributes {dimension_semantics = [#tpu.dimension_semantics<arbitrary>], iteration_bounds = array<i64: 3>, scalar_prefetch = 0 : i64, scratch_operands = 6 : i64, tpu.core_type = #tpu.core_type<tc>, window_params = [{transform_indices = @transform_0, window_bounds = array<i64: 4, 8, 512>}, {pipeline_mode = #tpu.pipeline_mode<synchronous>, transform_indices = @transform_1, window_bounds = array<i64: 128, 512>}, {pipeline_mode = #tpu.pipeline_mode<synchronous>, transform_indices = @transform_2, window_bounds = array<i64: 128, 512>}, {pipeline_mode = #tpu.pipeline_mode<synchronous>, transform_indices = @transform_3, window_bounds = array<i64: 128, 512>}, {pipeline_mode = #tpu.pipeline_mode<synchronous>, transform_indices = @transform_4, window_bounds = array<i64: 1, 512>}, {pipeline_mode = #tpu.pipeline_mode<synchronous>, transform_indices = @transform_5, window_bounds = array<i64: 128, 512>}, {pipeline_mode = #tpu.pipeline_mode<synchronous>, transform_indices = @transform_6, window_bounds = array<i64: 128, 512>}, {pipeline_mode = #tpu.pipeline_mode<synchronous>, transform_indices = @transform_7, window_bounds = array<i64: 1, 512>}, {pipeline_mode = #tpu.pipeline_mode<synchronous>, transform_indices = @transform_8, window_bounds = array<i64: 128, 128>}, {pipeline_mode = #tpu.pipeline_mode<synchronous>, transform_indices = @transform_9, window_bounds = array<i64: 1, 128>}, {pipeline_mode = #tpu.pipeline_mode<synchronous>, transform_indices = @transform_10, window_bounds = array<i64: 8, 128>}]} {
    %c0_i32 = arith.constant 0 : i32
    %0 = arith.cmpi eq, %arg0, %c0_i32 : i32
    %1 = arith.extui %0 : i1 to i32
    %c0_i32_0 = arith.constant 0 : i32
    %2 = arith.cmpi ne, %1, %c0_i32_0 : i32
    scf.if %2 {
      %cst_126 = arith.constant 0.000000e+00 : f32
      %457 = vector.broadcast %cst_126 : f32 to vector<8x128xf32>
      %c0_127 = arith.constant 0 : index
      %c0_128 = arith.constant 0 : index
      %458 = vector.load %arg12[%c0_127, %c0_128] : memref<8x128xf32, #tpu.memory_space<vmem>>, vector<8x128xf32>
      tpu.vector_store %arg12[%c0_127, %c0_128], %457 {strides = array<i32>} : memref<8x128xf32, #tpu.memory_space<vmem>>, vector<8x128xf32>,
      %cst_129 = arith.constant 0.000000e+00 : f32
      %459 = vector.broadcast %cst_129 : f32 to vector<8x128xf32>
      %c0_130 = arith.constant 0 : index
      %c0_131 = arith.constant 0 : index
      %460 = vector.load %arg13[%c0_130, %c0_131] : memref<8x128xf32, #tpu.memory_space<vmem>>, vector<8x128xf32>
      tpu.vector_store %arg13[%c0_130, %c0_131], %459 {strides = array<i32>} : memref<8x128xf32, #tpu.memory_space<vmem>>, vector<8x128xf32>,
      %cst_132 = arith.constant 0.000000e+00 : f32
      %461 = vector.broadcast %cst_132 : f32 to vector<8x128xf32>
      %c0_133 = arith.constant 0 : index
      %c0_134 = arith.constant 0 : index
      %462 = vector.load %arg14[%c0_133, %c0_134] : memref<8x128xf32, #tpu.memory_space<vmem>>, vector<8x128xf32>
      tpu.vector_store %arg14[%c0_133, %c0_134], %461 {strides = array<i32>} : memref<8x128xf32, #tpu.memory_space<vmem>>, vector<8x128xf32>,
      %cst_135 = arith.constant 0.000000e+00 : f32
      %463 = vector.broadcast %cst_135 : f32 to vector<8x128xf32>
      %c0_136 = arith.constant 0 : index
      %c0_137 = arith.constant 0 : index
      %464 = vector.load %arg15[%c0_136, %c0_137] : memref<8x128xf32, #tpu.memory_space<vmem>>, vector<8x128xf32>
      tpu.vector_store %arg15[%c0_136, %c0_137], %463 {strides = array<i32>} : memref<8x128xf32, #tpu.memory_space<vmem>>, vector<8x128xf32>,
      %cst_138 = arith.constant 0.000000e+00 : f32
      %465 = vector.broadcast %cst_138 : f32 to vector<8x128xf32>
      %c0_139 = arith.constant 0 : index
      %c0_140 = arith.constant 0 : index
      %466 = vector.load %arg16[%c0_139, %c0_140] : memref<8x128xf32, #tpu.memory_space<vmem>>, vector<8x128xf32>
      tpu.vector_store %arg16[%c0_139, %c0_140], %465 {strides = array<i32>} : memref<8x128xf32, #tpu.memory_space<vmem>>, vector<8x128xf32>,
      %cst_141 = arith.constant 0.000000e+00 : f32
      %467 = vector.broadcast %cst_141 : f32 to vector<8x128xf32>
      %c0_142 = arith.constant 0 : index
      %c0_143 = arith.constant 0 : index
      %468 = vector.load %arg17[%c0_142, %c0_143] : memref<8x128xf32, #tpu.memory_space<vmem>>, vector<8x128xf32>
      tpu.vector_store %arg17[%c0_142, %c0_143], %467 {strides = array<i32>} : memref<8x128xf32, #tpu.memory_space<vmem>>, vector<8x128xf32>,
    } else {
    }
    %c0 = arith.constant 0 : index
    %c0_1 = arith.constant 0 : index
    %3 = vector.load %arg2[%c0, %c0_1] : memref<128x512xbf16, #tpu.memory_space<vmem>>, vector<128x512xbf16>
    %c0_2 = arith.constant 0 : index
    %c0_3 = arith.constant 0 : index
    %4 = vector.load %arg3[%c0_2, %c0_3] : memref<128x512xbf16, #tpu.memory_space<vmem>>, vector<128x512xbf16>
    %c0_4 = arith.constant 0 : index
    %c0_5 = arith.constant 0 : index
    %5 = vector.load %arg4[%c0_4, %c0_5] : memref<128x512xbf16, #tpu.memory_space<vmem>>, vector<128x512xbf16>
    %c0_6 = arith.constant 0 : index
    %c0_7 = arith.constant 0 : index
    %6 = vector.load %arg6[%c0_6, %c0_7] : memref<128x512xbf16, #tpu.memory_space<vmem>>, vector<128x512xbf16>
    %c0_8 = arith.constant 0 : index
    %c0_9 = arith.constant 0 : index
    %7 = vector.load %arg7[%c0_8, %c0_9] : memref<128x512xbf16, #tpu.memory_space<vmem>>, vector<128x512xbf16>
    %c0_10 = arith.constant 0 : index
    %c0_11 = arith.constant 0 : index
    %8 = vector.load %arg5[%c0_10, %c0_11] : memref<1x512xf32, #tpu.memory_space<vmem>>, vector<1x512xf32>
    %c0_12 = arith.constant 0 : index
    %c0_13 = arith.constant 0 : index
    %9 = vector.load %arg8[%c0_12, %c0_13] : memref<1x512xf32, #tpu.memory_space<vmem>>, vector<1x512xf32>
    %c0_14 = arith.constant 0 : index
    %c0_15 = arith.constant 0 : index
    %10 = vector.load %arg12[%c0_14, %c0_15] : memref<8x128xf32, #tpu.memory_space<vmem>>, vector<8x128xf32>
    %c0_16 = arith.constant 0 : index
    %c0_17 = arith.constant 0 : index
    %11 = vector.load %arg13[%c0_16, %c0_17] : memref<8x128xf32, #tpu.memory_space<vmem>>, vector<8x128xf32>
    %c0_18 = arith.constant 0 : index
    %c0_19 = arith.constant 0 : index
    %12 = vector.load %arg14[%c0_18, %c0_19] : memref<8x128xf32, #tpu.memory_space<vmem>>, vector<8x128xf32>
    %c0_20 = arith.constant 0 : index
    %c0_21 = arith.constant 0 : index
    %13 = vector.load %arg15[%c0_20, %c0_21] : memref<8x128xf32, #tpu.memory_space<vmem>>, vector<8x128xf32>
    %c0_22 = arith.constant 0 : index
    %c0_23 = arith.constant 0 : index
    %14 = vector.load %arg16[%c0_22, %c0_23] : memref<8x128xf32, #tpu.memory_space<vmem>>, vector<8x128xf32>
    %c0_24 = arith.constant 0 : index
    %c0_25 = arith.constant 0 : index
    %15 = vector.load %arg17[%c0_24, %c0_25] : memref<8x128xf32, #tpu.memory_space<vmem>>, vector<8x128xf32>
    %c0_i32_26 = arith.constant 0 : i32
    %c4_i32 = arith.constant 4 : i32
    %16 = arith.muli %arg0, %c4_i32 : i32
    %17 = arith.addi %16, %c0_i32_26 : i32
    %c8_i32 = arith.constant 8 : i32
    %18 = arith.cmpi slt, %17, %c8_i32 : i32
    %c1_i32 = arith.constant 1 : i32
    %19 = arith.cmpi sge, %17, %c1_i32 : i32
    %c8_i32_27 = arith.constant 8 : i32
    %20 = arith.cmpi sle, %17, %c8_i32_27 : i32
    %21 = arith.andi %19, %20 : i1
    %c2_i32 = arith.constant 2 : i32
    %22 = arith.cmpi sge, %17, %c2_i32 : i32
    %c9_i32 = arith.constant 9 : i32
    %23 = arith.cmpi sle, %17, %c9_i32 : i32
    %24 = arith.andi %22, %23 : i1
    %25 = arith.truncf %10 : vector<8x128xf32> to vector<8x128xbf16>
    %26 = arith.truncf %12 : vector<8x128xf32> to vector<8x128xbf16>
    %27 = arith.truncf %14 : vector<8x128xf32> to vector<8x128xbf16>
    %28 = arith.index_cast %c0_i32_26 : i32 to index
    %c0_28 = arith.constant 0 : index
    %c0_29 = arith.constant 0 : index
    %29 = vector.load %arg1[%28, %c0_28, %c0_29] : memref<4x8x512xf32, #tpu.memory_space<vmem>>, vector<1x8x512xf32>
    %30 = vector.shape_cast %29 : vector<1x8x512xf32> to vector<8x512xf32>
    %cst = arith.constant dense<0.000000e+00> : vector<8x512xf32>
    %31 = tpu.matmul %25, %3, %cst {dimension_numbers = #tpu.dot_dimension_numbers<[1], [0], [0], [1], [0, 0, 1, 1], [], []>} : vector<8x128xbf16>, vector<128x512xbf16>, vector<8x512xf32> -> vector<8x512xf32>
    %32 = arith.addf %30, %31 : vector<8x512xf32>
    %cst_30 = arith.constant dense<0.000000e+00> : vector<8x512xf32>
    %33 = tpu.matmul %25, %4, %cst_30 {dimension_numbers = #tpu.dot_dimension_numbers<[1], [0], [0], [1], [0, 0, 1, 1], [], []>} : vector<8x128xbf16>, vector<128x512xbf16>, vector<8x512xf32> -> vector<8x512xf32>
    %cst_31 = arith.constant dense<0.000000e+00> : vector<8x512xf32>
    %34 = tpu.matmul %26, %5, %cst_31 {dimension_numbers = #tpu.dot_dimension_numbers<[1], [0], [0], [1], [0, 0, 1, 1], [], []>} : vector<8x128xbf16>, vector<128x512xbf16>, vector<8x512xf32> -> vector<8x512xf32>
    %35 = arith.addf %33, %34 : vector<8x512xf32>
    %36 = vector.broadcast %8 : vector<1x512xf32> to vector<8x512xf32>
    %37 = arith.addf %35, %36 : vector<8x512xf32>
    %cst_32 = arith.constant dense<0.000000e+00> : vector<8x512xf32>
    %38 = tpu.matmul %26, %6, %cst_32 {dimension_numbers = #tpu.dot_dimension_numbers<[1], [0], [0], [1], [0, 0, 1, 1], [], []>} : vector<8x128xbf16>, vector<128x512xbf16>, vector<8x512xf32> -> vector<8x512xf32>
    %cst_33 = arith.constant dense<0.000000e+00> : vector<8x512xf32>
    %39 = tpu.matmul %27, %7, %cst_33 {dimension_numbers = #tpu.dot_dimension_numbers<[1], [0], [0], [1], [0, 0, 1, 1], [], []>} : vector<8x128xbf16>, vector<128x512xbf16>, vector<8x512xf32> -> vector<8x512xf32>
    %40 = arith.addf %38, %39 : vector<8x512xf32>
    %41 = vector.broadcast %9 : vector<1x512xf32> to vector<8x512xf32>
    %42 = arith.addf %40, %41 : vector<8x512xf32>
    %43 = vector.extract_strided_slice %32 {offsets = [0, 0], sizes = [8, 128], strides = [1, 1]} : vector<8x512xf32> to vector<8x128xf32>
    %44 = arith.negf %43 : vector<8x128xf32>
    %45 = math.exp %44 : vector<8x128xf32>
    %cst_34 = arith.constant 1.000000e+00 : f32
    %46 = vector.broadcast %cst_34 : f32 to vector<8x128xf32>
    %47 = arith.addf %46, %45 : vector<8x128xf32>
    %48 = arith.divf %46, %47 : vector<8x128xf32>
    %49 = vector.extract_strided_slice %32 {offsets = [0, 128], sizes = [8, 128], strides = [1, 1]} : vector<8x512xf32> to vector<8x128xf32>
    %50 = arith.negf %49 : vector<8x128xf32>
    %51 = math.exp %50 : vector<8x128xf32>
    %cst_35 = arith.constant 1.000000e+00 : f32
    %52 = vector.broadcast %cst_35 : f32 to vector<8x128xf32>
    %53 = arith.addf %52, %51 : vector<8x128xf32>
    %54 = arith.divf %52, %53 : vector<8x128xf32>
    %55 = vector.extract_strided_slice %32 {offsets = [0, 256], sizes = [8, 128], strides = [1, 1]} : vector<8x512xf32> to vector<8x128xf32>
    %56 = math.tanh %55 : vector<8x128xf32>
    %57 = vector.extract_strided_slice %32 {offsets = [0, 384], sizes = [8, 128], strides = [1, 1]} : vector<8x512xf32> to vector<8x128xf32>
    %58 = arith.negf %57 : vector<8x128xf32>
    %59 = math.exp %58 : vector<8x128xf32>
    %cst_36 = arith.constant 1.000000e+00 : f32
    %60 = vector.broadcast %cst_36 : f32 to vector<8x128xf32>
    %61 = arith.addf %60, %59 : vector<8x128xf32>
    %62 = arith.divf %60, %61 : vector<8x128xf32>
    %63 = arith.mulf %54, %11 : vector<8x128xf32>
    %64 = arith.mulf %48, %56 : vector<8x128xf32>
    %65 = arith.addf %63, %64 : vector<8x128xf32>
    %66 = math.tanh %65 : vector<8x128xf32>
    %67 = arith.mulf %62, %66 : vector<8x128xf32>
    %68 = vector.extract_strided_slice %37 {offsets = [0, 0], sizes = [8, 128], strides = [1, 1]} : vector<8x512xf32> to vector<8x128xf32>
    %69 = arith.negf %68 : vector<8x128xf32>
    %70 = math.exp %69 : vector<8x128xf32>
    %cst_37 = arith.constant 1.000000e+00 : f32
    %71 = vector.broadcast %cst_37 : f32 to vector<8x128xf32>
    %72 = arith.addf %71, %70 : vector<8x128xf32>
    %73 = arith.divf %71, %72 : vector<8x128xf32>
    %74 = vector.extract_strided_slice %37 {offsets = [0, 128], sizes = [8, 128], strides = [1, 1]} : vector<8x512xf32> to vector<8x128xf32>
    %75 = arith.negf %74 : vector<8x128xf32>
    %76 = math.exp %75 : vector<8x128xf32>
    %cst_38 = arith.constant 1.000000e+00 : f32
    %77 = vector.broadcast %cst_38 : f32 to vector<8x128xf32>
    %78 = arith.addf %77, %76 : vector<8x128xf32>
    %79 = arith.divf %77, %78 : vector<8x128xf32>
    %80 = vector.extract_strided_slice %37 {offsets = [0, 256], sizes = [8, 128], strides = [1, 1]} : vector<8x512xf32> to vector<8x128xf32>
    %81 = math.tanh %80 : vector<8x128xf32>
    %82 = vector.extract_strided_slice %37 {offsets = [0, 384], sizes = [8, 128], strides = [1, 1]} : vector<8x512xf32> to vector<8x128xf32>
    %83 = arith.negf %82 : vector<8x128xf32>
    %84 = math.exp %83 : vector<8x128xf32>
    %cst_39 = arith.constant 1.000000e+00 : f32
    %85 = vector.broadcast %cst_39 : f32 to vector<8x128xf32>
    %86 = arith.addf %85, %84 : vector<8x128xf32>
    %87 = arith.divf %85, %86 : vector<8x128xf32>
    %88 = arith.mulf %79, %13 : vector<8x128xf32>
    %89 = arith.mulf %73, %81 : vector<8x128xf32>
    %90 = arith.addf %88, %89 : vector<8x128xf32>
    %91 = math.tanh %90 : vector<8x128xf32>
    %92 = arith.mulf %87, %91 : vector<8x128xf32>
    %93 = vector.extract_strided_slice %42 {offsets = [0, 0], sizes = [8, 128], strides = [1, 1]} : vector<8x512xf32> to vector<8x128xf32>
    %94 = arith.negf %93 : vector<8x128xf32>
    %95 = math.exp %94 : vector<8x128xf32>
    %cst_40 = arith.constant 1.000000e+00 : f32
    %96 = vector.broadcast %cst_40 : f32 to vector<8x128xf32>
    %97 = arith.addf %96, %95 : vector<8x128xf32>
    %98 = arith.divf %96, %97 : vector<8x128xf32>
    %99 = vector.extract_strided_slice %42 {offsets = [0, 128], sizes = [8, 128], strides = [1, 1]} : vector<8x512xf32> to vector<8x128xf32>
    %100 = arith.negf %99 : vector<8x128xf32>
    %101 = math.exp %100 : vector<8x128xf32>
    %cst_41 = arith.constant 1.000000e+00 : f32
    %102 = vector.broadcast %cst_41 : f32 to vector<8x128xf32>
    %103 = arith.addf %102, %101 : vector<8x128xf32>
    %104 = arith.divf %102, %103 : vector<8x128xf32>
    %105 = vector.extract_strided_slice %42 {offsets = [0, 256], sizes = [8, 128], strides = [1, 1]} : vector<8x512xf32> to vector<8x128xf32>
    %106 = math.tanh %105 : vector<8x128xf32>
    %107 = vector.extract_strided_slice %42 {offsets = [0, 384], sizes = [8, 128], strides = [1, 1]} : vector<8x512xf32> to vector<8x128xf32>
    %108 = arith.negf %107 : vector<8x128xf32>
    %109 = math.exp %108 : vector<8x128xf32>
    %cst_42 = arith.constant 1.000000e+00 : f32
    %110 = vector.broadcast %cst_42 : f32 to vector<8x128xf32>
    %111 = arith.addf %110, %109 : vector<8x128xf32>
    %112 = arith.divf %110, %111 : vector<8x128xf32>
    %113 = arith.mulf %104, %15 : vector<8x128xf32>
    %114 = arith.mulf %98, %106 : vector<8x128xf32>
    %115 = arith.addf %113, %114 : vector<8x128xf32>
    %116 = math.tanh %115 : vector<8x128xf32>
    %117 = arith.mulf %112, %116 : vector<8x128xf32>
    %118 = arith.select %18, %67, %10 : vector<8x128xf32>
    %119 = arith.select %18, %65, %11 : vector<8x128xf32>
    %120 = arith.select %21, %92, %12 : vector<8x128xf32>
    %121 = arith.select %21, %90, %13 : vector<8x128xf32>
    %122 = arith.select %24, %117, %14 : vector<8x128xf32>
    %123 = arith.select %24, %115, %15 : vector<8x128xf32>
    %c1_i32_43 = arith.constant 1 : i32
    %c4_i32_44 = arith.constant 4 : i32
    %124 = arith.muli %arg0, %c4_i32_44 : i32
    %125 = arith.addi %124, %c1_i32_43 : i32
    %c8_i32_45 = arith.constant 8 : i32
    %126 = arith.cmpi slt, %125, %c8_i32_45 : i32
    %c1_i32_46 = arith.constant 1 : i32
    %127 = arith.cmpi sge, %125, %c1_i32_46 : i32
    %c8_i32_47 = arith.constant 8 : i32
    %128 = arith.cmpi sle, %125, %c8_i32_47 : i32
    %129 = arith.andi %127, %128 : i1
    %c2_i32_48 = arith.constant 2 : i32
    %130 = arith.cmpi sge, %125, %c2_i32_48 : i32
    %c9_i32_49 = arith.constant 9 : i32
    %131 = arith.cmpi sle, %125, %c9_i32_49 : i32
    %132 = arith.andi %130, %131 : i1
    %133 = arith.truncf %118 : vector<8x128xf32> to vector<8x128xbf16>
    %134 = arith.truncf %120 : vector<8x128xf32> to vector<8x128xbf16>
    %135 = arith.truncf %122 : vector<8x128xf32> to vector<8x128xbf16>
    %136 = arith.index_cast %c1_i32_43 : i32 to index
    %c0_50 = arith.constant 0 : index
    %c0_51 = arith.constant 0 : index
    %137 = vector.load %arg1[%136, %c0_50, %c0_51] : memref<4x8x512xf32, #tpu.memory_space<vmem>>, vector<1x8x512xf32>
    %138 = vector.shape_cast %137 : vector<1x8x512xf32> to vector<8x512xf32>
    %cst_52 = arith.constant dense<0.000000e+00> : vector<8x512xf32>
    %139 = tpu.matmul %133, %3, %cst_52 {dimension_numbers = #tpu.dot_dimension_numbers<[1], [0], [0], [1], [0, 0, 1, 1], [], []>} : vector<8x128xbf16>, vector<128x512xbf16>, vector<8x512xf32> -> vector<8x512xf32>
    %140 = arith.addf %138, %139 : vector<8x512xf32>
    %cst_53 = arith.constant dense<0.000000e+00> : vector<8x512xf32>
    %141 = tpu.matmul %133, %4, %cst_53 {dimension_numbers = #tpu.dot_dimension_numbers<[1], [0], [0], [1], [0, 0, 1, 1], [], []>} : vector<8x128xbf16>, vector<128x512xbf16>, vector<8x512xf32> -> vector<8x512xf32>
    %cst_54 = arith.constant dense<0.000000e+00> : vector<8x512xf32>
    %142 = tpu.matmul %134, %5, %cst_54 {dimension_numbers = #tpu.dot_dimension_numbers<[1], [0], [0], [1], [0, 0, 1, 1], [], []>} : vector<8x128xbf16>, vector<128x512xbf16>, vector<8x512xf32> -> vector<8x512xf32>
    %143 = arith.addf %141, %142 : vector<8x512xf32>
    %144 = vector.broadcast %8 : vector<1x512xf32> to vector<8x512xf32>
    %145 = arith.addf %143, %144 : vector<8x512xf32>
    %cst_55 = arith.constant dense<0.000000e+00> : vector<8x512xf32>
    %146 = tpu.matmul %134, %6, %cst_55 {dimension_numbers = #tpu.dot_dimension_numbers<[1], [0], [0], [1], [0, 0, 1, 1], [], []>} : vector<8x128xbf16>, vector<128x512xbf16>, vector<8x512xf32> -> vector<8x512xf32>
    %cst_56 = arith.constant dense<0.000000e+00> : vector<8x512xf32>
    %147 = tpu.matmul %135, %7, %cst_56 {dimension_numbers = #tpu.dot_dimension_numbers<[1], [0], [0], [1], [0, 0, 1, 1], [], []>} : vector<8x128xbf16>, vector<128x512xbf16>, vector<8x512xf32> -> vector<8x512xf32>
    %148 = arith.addf %146, %147 : vector<8x512xf32>
    %149 = vector.broadcast %9 : vector<1x512xf32> to vector<8x512xf32>
    %150 = arith.addf %148, %149 : vector<8x512xf32>
    %151 = vector.extract_strided_slice %140 {offsets = [0, 0], sizes = [8, 128], strides = [1, 1]} : vector<8x512xf32> to vector<8x128xf32>
    %152 = arith.negf %151 : vector<8x128xf32>
    %153 = math.exp %152 : vector<8x128xf32>
    %cst_57 = arith.constant 1.000000e+00 : f32
    %154 = vector.broadcast %cst_57 : f32 to vector<8x128xf32>
    %155 = arith.addf %154, %153 : vector<8x128xf32>
    %156 = arith.divf %154, %155 : vector<8x128xf32>
    %157 = vector.extract_strided_slice %140 {offsets = [0, 128], sizes = [8, 128], strides = [1, 1]} : vector<8x512xf32> to vector<8x128xf32>
    %158 = arith.negf %157 : vector<8x128xf32>
    %159 = math.exp %158 : vector<8x128xf32>
    %cst_58 = arith.constant 1.000000e+00 : f32
    %160 = vector.broadcast %cst_58 : f32 to vector<8x128xf32>
    %161 = arith.addf %160, %159 : vector<8x128xf32>
    %162 = arith.divf %160, %161 : vector<8x128xf32>
    %163 = vector.extract_strided_slice %140 {offsets = [0, 256], sizes = [8, 128], strides = [1, 1]} : vector<8x512xf32> to vector<8x128xf32>
    %164 = math.tanh %163 : vector<8x128xf32>
    %165 = vector.extract_strided_slice %140 {offsets = [0, 384], sizes = [8, 128], strides = [1, 1]} : vector<8x512xf32> to vector<8x128xf32>
    %166 = arith.negf %165 : vector<8x128xf32>
    %167 = math.exp %166 : vector<8x128xf32>
    %cst_59 = arith.constant 1.000000e+00 : f32
    %168 = vector.broadcast %cst_59 : f32 to vector<8x128xf32>
    %169 = arith.addf %168, %167 : vector<8x128xf32>
    %170 = arith.divf %168, %169 : vector<8x128xf32>
    %171 = arith.mulf %162, %119 : vector<8x128xf32>
    %172 = arith.mulf %156, %164 : vector<8x128xf32>
    %173 = arith.addf %171, %172 : vector<8x128xf32>
    %174 = math.tanh %173 : vector<8x128xf32>
    %175 = arith.mulf %170, %174 : vector<8x128xf32>
    %176 = vector.extract_strided_slice %145 {offsets = [0, 0], sizes = [8, 128], strides = [1, 1]} : vector<8x512xf32> to vector<8x128xf32>
    %177 = arith.negf %176 : vector<8x128xf32>
    %178 = math.exp %177 : vector<8x128xf32>
    %cst_60 = arith.constant 1.000000e+00 : f32
    %179 = vector.broadcast %cst_60 : f32 to vector<8x128xf32>
    %180 = arith.addf %179, %178 : vector<8x128xf32>
    %181 = arith.divf %179, %180 : vector<8x128xf32>
    %182 = vector.extract_strided_slice %145 {offsets = [0, 128], sizes = [8, 128], strides = [1, 1]} : vector<8x512xf32> to vector<8x128xf32>
    %183 = arith.negf %182 : vector<8x128xf32>
    %184 = math.exp %183 : vector<8x128xf32>
    %cst_61 = arith.constant 1.000000e+00 : f32
    %185 = vector.broadcast %cst_61 : f32 to vector<8x128xf32>
    %186 = arith.addf %185, %184 : vector<8x128xf32>
    %187 = arith.divf %185, %186 : vector<8x128xf32>
    %188 = vector.extract_strided_slice %145 {offsets = [0, 256], sizes = [8, 128], strides = [1, 1]} : vector<8x512xf32> to vector<8x128xf32>
    %189 = math.tanh %188 : vector<8x128xf32>
    %190 = vector.extract_strided_slice %145 {offsets = [0, 384], sizes = [8, 128], strides = [1, 1]} : vector<8x512xf32> to vector<8x128xf32>
    %191 = arith.negf %190 : vector<8x128xf32>
    %192 = math.exp %191 : vector<8x128xf32>
    %cst_62 = arith.constant 1.000000e+00 : f32
    %193 = vector.broadcast %cst_62 : f32 to vector<8x128xf32>
    %194 = arith.addf %193, %192 : vector<8x128xf32>
    %195 = arith.divf %193, %194 : vector<8x128xf32>
    %196 = arith.mulf %187, %121 : vector<8x128xf32>
    %197 = arith.mulf %181, %189 : vector<8x128xf32>
    %198 = arith.addf %196, %197 : vector<8x128xf32>
    %199 = math.tanh %198 : vector<8x128xf32>
    %200 = arith.mulf %195, %199 : vector<8x128xf32>
    %201 = vector.extract_strided_slice %150 {offsets = [0, 0], sizes = [8, 128], strides = [1, 1]} : vector<8x512xf32> to vector<8x128xf32>
    %202 = arith.negf %201 : vector<8x128xf32>
    %203 = math.exp %202 : vector<8x128xf32>
    %cst_63 = arith.constant 1.000000e+00 : f32
    %204 = vector.broadcast %cst_63 : f32 to vector<8x128xf32>
    %205 = arith.addf %204, %203 : vector<8x128xf32>
    %206 = arith.divf %204, %205 : vector<8x128xf32>
    %207 = vector.extract_strided_slice %150 {offsets = [0, 128], sizes = [8, 128], strides = [1, 1]} : vector<8x512xf32> to vector<8x128xf32>
    %208 = arith.negf %207 : vector<8x128xf32>
    %209 = math.exp %208 : vector<8x128xf32>
    %cst_64 = arith.constant 1.000000e+00 : f32
    %210 = vector.broadcast %cst_64 : f32 to vector<8x128xf32>
    %211 = arith.addf %210, %209 : vector<8x128xf32>
    %212 = arith.divf %210, %211 : vector<8x128xf32>
    %213 = vector.extract_strided_slice %150 {offsets = [0, 256], sizes = [8, 128], strides = [1, 1]} : vector<8x512xf32> to vector<8x128xf32>
    %214 = math.tanh %213 : vector<8x128xf32>
    %215 = vector.extract_strided_slice %150 {offsets = [0, 384], sizes = [8, 128], strides = [1, 1]} : vector<8x512xf32> to vector<8x128xf32>
    %216 = arith.negf %215 : vector<8x128xf32>
    %217 = math.exp %216 : vector<8x128xf32>
    %cst_65 = arith.constant 1.000000e+00 : f32
    %218 = vector.broadcast %cst_65 : f32 to vector<8x128xf32>
    %219 = arith.addf %218, %217 : vector<8x128xf32>
    %220 = arith.divf %218, %219 : vector<8x128xf32>
    %221 = arith.mulf %212, %123 : vector<8x128xf32>
    %222 = arith.mulf %206, %214 : vector<8x128xf32>
    %223 = arith.addf %221, %222 : vector<8x128xf32>
    %224 = math.tanh %223 : vector<8x128xf32>
    %225 = arith.mulf %220, %224 : vector<8x128xf32>
    %226 = arith.select %126, %175, %118 : vector<8x128xf32>
    %227 = arith.select %126, %173, %119 : vector<8x128xf32>
    %228 = arith.select %129, %200, %120 : vector<8x128xf32>
    %229 = arith.select %129, %198, %121 : vector<8x128xf32>
    %230 = arith.select %132, %225, %122 : vector<8x128xf32>
    %231 = arith.select %132, %223, %123 : vector<8x128xf32>
    %c2_i32_66 = arith.constant 2 : i32
    %c4_i32_67 = arith.constant 4 : i32
    %232 = arith.muli %arg0, %c4_i32_67 : i32
    %233 = arith.addi %232, %c2_i32_66 : i32
    %c8_i32_68 = arith.constant 8 : i32
    %234 = arith.cmpi slt, %233, %c8_i32_68 : i32
    %c1_i32_69 = arith.constant 1 : i32
    %235 = arith.cmpi sge, %233, %c1_i32_69 : i32
    %c8_i32_70 = arith.constant 8 : i32
    %236 = arith.cmpi sle, %233, %c8_i32_70 : i32
    %237 = arith.andi %235, %236 : i1
    %c2_i32_71 = arith.constant 2 : i32
    %238 = arith.cmpi sge, %233, %c2_i32_71 : i32
    %c9_i32_72 = arith.constant 9 : i32
    %239 = arith.cmpi sle, %233, %c9_i32_72 : i32
    %240 = arith.andi %238, %239 : i1
    %241 = arith.truncf %226 : vector<8x128xf32> to vector<8x128xbf16>
    %242 = arith.truncf %228 : vector<8x128xf32> to vector<8x128xbf16>
    %243 = arith.truncf %230 : vector<8x128xf32> to vector<8x128xbf16>
    %244 = arith.index_cast %c2_i32_66 : i32 to index
    %c0_73 = arith.constant 0 : index
    %c0_74 = arith.constant 0 : index
    %245 = vector.load %arg1[%244, %c0_73, %c0_74] : memref<4x8x512xf32, #tpu.memory_space<vmem>>, vector<1x8x512xf32>
    %246 = vector.shape_cast %245 : vector<1x8x512xf32> to vector<8x512xf32>
    %cst_75 = arith.constant dense<0.000000e+00> : vector<8x512xf32>
    %247 = tpu.matmul %241, %3, %cst_75 {dimension_numbers = #tpu.dot_dimension_numbers<[1], [0], [0], [1], [0, 0, 1, 1], [], []>} : vector<8x128xbf16>, vector<128x512xbf16>, vector<8x512xf32> -> vector<8x512xf32>
    %248 = arith.addf %246, %247 : vector<8x512xf32>
    %cst_76 = arith.constant dense<0.000000e+00> : vector<8x512xf32>
    %249 = tpu.matmul %241, %4, %cst_76 {dimension_numbers = #tpu.dot_dimension_numbers<[1], [0], [0], [1], [0, 0, 1, 1], [], []>} : vector<8x128xbf16>, vector<128x512xbf16>, vector<8x512xf32> -> vector<8x512xf32>
    %cst_77 = arith.constant dense<0.000000e+00> : vector<8x512xf32>
    %250 = tpu.matmul %242, %5, %cst_77 {dimension_numbers = #tpu.dot_dimension_numbers<[1], [0], [0], [1], [0, 0, 1, 1], [], []>} : vector<8x128xbf16>, vector<128x512xbf16>, vector<8x512xf32> -> vector<8x512xf32>
    %251 = arith.addf %249, %250 : vector<8x512xf32>
    %252 = vector.broadcast %8 : vector<1x512xf32> to vector<8x512xf32>
    %253 = arith.addf %251, %252 : vector<8x512xf32>
    %cst_78 = arith.constant dense<0.000000e+00> : vector<8x512xf32>
    %254 = tpu.matmul %242, %6, %cst_78 {dimension_numbers = #tpu.dot_dimension_numbers<[1], [0], [0], [1], [0, 0, 1, 1], [], []>} : vector<8x128xbf16>, vector<128x512xbf16>, vector<8x512xf32> -> vector<8x512xf32>
    %cst_79 = arith.constant dense<0.000000e+00> : vector<8x512xf32>
    %255 = tpu.matmul %243, %7, %cst_79 {dimension_numbers = #tpu.dot_dimension_numbers<[1], [0], [0], [1], [0, 0, 1, 1], [], []>} : vector<8x128xbf16>, vector<128x512xbf16>, vector<8x512xf32> -> vector<8x512xf32>
    %256 = arith.addf %254, %255 : vector<8x512xf32>
    %257 = vector.broadcast %9 : vector<1x512xf32> to vector<8x512xf32>
    %258 = arith.addf %256, %257 : vector<8x512xf32>
    %259 = vector.extract_strided_slice %248 {offsets = [0, 0], sizes = [8, 128], strides = [1, 1]} : vector<8x512xf32> to vector<8x128xf32>
    %260 = arith.negf %259 : vector<8x128xf32>
    %261 = math.exp %260 : vector<8x128xf32>
    %cst_80 = arith.constant 1.000000e+00 : f32
    %262 = vector.broadcast %cst_80 : f32 to vector<8x128xf32>
    %263 = arith.addf %262, %261 : vector<8x128xf32>
    %264 = arith.divf %262, %263 : vector<8x128xf32>
    %265 = vector.extract_strided_slice %248 {offsets = [0, 128], sizes = [8, 128], strides = [1, 1]} : vector<8x512xf32> to vector<8x128xf32>
    %266 = arith.negf %265 : vector<8x128xf32>
    %267 = math.exp %266 : vector<8x128xf32>
    %cst_81 = arith.constant 1.000000e+00 : f32
    %268 = vector.broadcast %cst_81 : f32 to vector<8x128xf32>
    %269 = arith.addf %268, %267 : vector<8x128xf32>
    %270 = arith.divf %268, %269 : vector<8x128xf32>
    %271 = vector.extract_strided_slice %248 {offsets = [0, 256], sizes = [8, 128], strides = [1, 1]} : vector<8x512xf32> to vector<8x128xf32>
    %272 = math.tanh %271 : vector<8x128xf32>
    %273 = vector.extract_strided_slice %248 {offsets = [0, 384], sizes = [8, 128], strides = [1, 1]} : vector<8x512xf32> to vector<8x128xf32>
    %274 = arith.negf %273 : vector<8x128xf32>
    %275 = math.exp %274 : vector<8x128xf32>
    %cst_82 = arith.constant 1.000000e+00 : f32
    %276 = vector.broadcast %cst_82 : f32 to vector<8x128xf32>
    %277 = arith.addf %276, %275 : vector<8x128xf32>
    %278 = arith.divf %276, %277 : vector<8x128xf32>
    %279 = arith.mulf %270, %227 : vector<8x128xf32>
    %280 = arith.mulf %264, %272 : vector<8x128xf32>
    %281 = arith.addf %279, %280 : vector<8x128xf32>
    %282 = math.tanh %281 : vector<8x128xf32>
    %283 = arith.mulf %278, %282 : vector<8x128xf32>
    %284 = vector.extract_strided_slice %253 {offsets = [0, 0], sizes = [8, 128], strides = [1, 1]} : vector<8x512xf32> to vector<8x128xf32>
    %285 = arith.negf %284 : vector<8x128xf32>
    %286 = math.exp %285 : vector<8x128xf32>
    %cst_83 = arith.constant 1.000000e+00 : f32
    %287 = vector.broadcast %cst_83 : f32 to vector<8x128xf32>
    %288 = arith.addf %287, %286 : vector<8x128xf32>
    %289 = arith.divf %287, %288 : vector<8x128xf32>
    %290 = vector.extract_strided_slice %253 {offsets = [0, 128], sizes = [8, 128], strides = [1, 1]} : vector<8x512xf32> to vector<8x128xf32>
    %291 = arith.negf %290 : vector<8x128xf32>
    %292 = math.exp %291 : vector<8x128xf32>
    %cst_84 = arith.constant 1.000000e+00 : f32
    %293 = vector.broadcast %cst_84 : f32 to vector<8x128xf32>
    %294 = arith.addf %293, %292 : vector<8x128xf32>
    %295 = arith.divf %293, %294 : vector<8x128xf32>
    %296 = vector.extract_strided_slice %253 {offsets = [0, 256], sizes = [8, 128], strides = [1, 1]} : vector<8x512xf32> to vector<8x128xf32>
    %297 = math.tanh %296 : vector<8x128xf32>
    %298 = vector.extract_strided_slice %253 {offsets = [0, 384], sizes = [8, 128], strides = [1, 1]} : vector<8x512xf32> to vector<8x128xf32>
    %299 = arith.negf %298 : vector<8x128xf32>
    %300 = math.exp %299 : vector<8x128xf32>
    %cst_85 = arith.constant 1.000000e+00 : f32
    %301 = vector.broadcast %cst_85 : f32 to vector<8x128xf32>
    %302 = arith.addf %301, %300 : vector<8x128xf32>
    %303 = arith.divf %301, %302 : vector<8x128xf32>
    %304 = arith.mulf %295, %229 : vector<8x128xf32>
    %305 = arith.mulf %289, %297 : vector<8x128xf32>
    %306 = arith.addf %304, %305 : vector<8x128xf32>
    %307 = math.tanh %306 : vector<8x128xf32>
    %308 = arith.mulf %303, %307 : vector<8x128xf32>
    %309 = vector.extract_strided_slice %258 {offsets = [0, 0], sizes = [8, 128], strides = [1, 1]} : vector<8x512xf32> to vector<8x128xf32>
    %310 = arith.negf %309 : vector<8x128xf32>
    %311 = math.exp %310 : vector<8x128xf32>
    %cst_86 = arith.constant 1.000000e+00 : f32
    %312 = vector.broadcast %cst_86 : f32 to vector<8x128xf32>
    %313 = arith.addf %312, %311 : vector<8x128xf32>
    %314 = arith.divf %312, %313 : vector<8x128xf32>
    %315 = vector.extract_strided_slice %258 {offsets = [0, 128], sizes = [8, 128], strides = [1, 1]} : vector<8x512xf32> to vector<8x128xf32>
    %316 = arith.negf %315 : vector<8x128xf32>
    %317 = math.exp %316 : vector<8x128xf32>
    %cst_87 = arith.constant 1.000000e+00 : f32
    %318 = vector.broadcast %cst_87 : f32 to vector<8x128xf32>
    %319 = arith.addf %318, %317 : vector<8x128xf32>
    %320 = arith.divf %318, %319 : vector<8x128xf32>
    %321 = vector.extract_strided_slice %258 {offsets = [0, 256], sizes = [8, 128], strides = [1, 1]} : vector<8x512xf32> to vector<8x128xf32>
    %322 = math.tanh %321 : vector<8x128xf32>
    %323 = vector.extract_strided_slice %258 {offsets = [0, 384], sizes = [8, 128], strides = [1, 1]} : vector<8x512xf32> to vector<8x128xf32>
    %324 = arith.negf %323 : vector<8x128xf32>
    %325 = math.exp %324 : vector<8x128xf32>
    %cst_88 = arith.constant 1.000000e+00 : f32
    %326 = vector.broadcast %cst_88 : f32 to vector<8x128xf32>
    %327 = arith.addf %326, %325 : vector<8x128xf32>
    %328 = arith.divf %326, %327 : vector<8x128xf32>
    %329 = arith.mulf %320, %231 : vector<8x128xf32>
    %330 = arith.mulf %314, %322 : vector<8x128xf32>
    %331 = arith.addf %329, %330 : vector<8x128xf32>
    %332 = math.tanh %331 : vector<8x128xf32>
    %333 = arith.mulf %328, %332 : vector<8x128xf32>
    %334 = arith.select %234, %283, %226 : vector<8x128xf32>
    %335 = arith.select %234, %281, %227 : vector<8x128xf32>
    %336 = arith.select %237, %308, %228 : vector<8x128xf32>
    %337 = arith.select %237, %306, %229 : vector<8x128xf32>
    %338 = arith.select %240, %333, %230 : vector<8x128xf32>
    %339 = arith.select %240, %331, %231 : vector<8x128xf32>
    %c3_i32 = arith.constant 3 : i32
    %c4_i32_89 = arith.constant 4 : i32
    %340 = arith.muli %arg0, %c4_i32_89 : i32
    %341 = arith.addi %340, %c3_i32 : i32
    %c8_i32_90 = arith.constant 8 : i32
    %342 = arith.cmpi slt, %341, %c8_i32_90 : i32
    %c1_i32_91 = arith.constant 1 : i32
    %343 = arith.cmpi sge, %341, %c1_i32_91 : i32
    %c8_i32_92 = arith.constant 8 : i32
    %344 = arith.cmpi sle, %341, %c8_i32_92 : i32
    %345 = arith.andi %343, %344 : i1
    %c2_i32_93 = arith.constant 2 : i32
    %346 = arith.cmpi sge, %341, %c2_i32_93 : i32
    %c9_i32_94 = arith.constant 9 : i32
    %347 = arith.cmpi sle, %341, %c9_i32_94 : i32
    %348 = arith.andi %346, %347 : i1
    %349 = arith.truncf %334 : vector<8x128xf32> to vector<8x128xbf16>
    %350 = arith.truncf %336 : vector<8x128xf32> to vector<8x128xbf16>
    %351 = arith.truncf %338 : vector<8x128xf32> to vector<8x128xbf16>
    %352 = arith.index_cast %c3_i32 : i32 to index
    %c0_95 = arith.constant 0 : index
    %c0_96 = arith.constant 0 : index
    %353 = vector.load %arg1[%352, %c0_95, %c0_96] : memref<4x8x512xf32, #tpu.memory_space<vmem>>, vector<1x8x512xf32>
    %354 = vector.shape_cast %353 : vector<1x8x512xf32> to vector<8x512xf32>
    %cst_97 = arith.constant dense<0.000000e+00> : vector<8x512xf32>
    %355 = tpu.matmul %349, %3, %cst_97 {dimension_numbers = #tpu.dot_dimension_numbers<[1], [0], [0], [1], [0, 0, 1, 1], [], []>} : vector<8x128xbf16>, vector<128x512xbf16>, vector<8x512xf32> -> vector<8x512xf32>
    %356 = arith.addf %354, %355 : vector<8x512xf32>
    %cst_98 = arith.constant dense<0.000000e+00> : vector<8x512xf32>
    %357 = tpu.matmul %349, %4, %cst_98 {dimension_numbers = #tpu.dot_dimension_numbers<[1], [0], [0], [1], [0, 0, 1, 1], [], []>} : vector<8x128xbf16>, vector<128x512xbf16>, vector<8x512xf32> -> vector<8x512xf32>
    %cst_99 = arith.constant dense<0.000000e+00> : vector<8x512xf32>
    %358 = tpu.matmul %350, %5, %cst_99 {dimension_numbers = #tpu.dot_dimension_numbers<[1], [0], [0], [1], [0, 0, 1, 1], [], []>} : vector<8x128xbf16>, vector<128x512xbf16>, vector<8x512xf32> -> vector<8x512xf32>
    %359 = arith.addf %357, %358 : vector<8x512xf32>
    %360 = vector.broadcast %8 : vector<1x512xf32> to vector<8x512xf32>
    %361 = arith.addf %359, %360 : vector<8x512xf32>
    %cst_100 = arith.constant dense<0.000000e+00> : vector<8x512xf32>
    %362 = tpu.matmul %350, %6, %cst_100 {dimension_numbers = #tpu.dot_dimension_numbers<[1], [0], [0], [1], [0, 0, 1, 1], [], []>} : vector<8x128xbf16>, vector<128x512xbf16>, vector<8x512xf32> -> vector<8x512xf32>
    %cst_101 = arith.constant dense<0.000000e+00> : vector<8x512xf32>
    %363 = tpu.matmul %351, %7, %cst_101 {dimension_numbers = #tpu.dot_dimension_numbers<[1], [0], [0], [1], [0, 0, 1, 1], [], []>} : vector<8x128xbf16>, vector<128x512xbf16>, vector<8x512xf32> -> vector<8x512xf32>
    %364 = arith.addf %362, %363 : vector<8x512xf32>
    %365 = vector.broadcast %9 : vector<1x512xf32> to vector<8x512xf32>
    %366 = arith.addf %364, %365 : vector<8x512xf32>
    %367 = vector.extract_strided_slice %356 {offsets = [0, 0], sizes = [8, 128], strides = [1, 1]} : vector<8x512xf32> to vector<8x128xf32>
    %368 = arith.negf %367 : vector<8x128xf32>
    %369 = math.exp %368 : vector<8x128xf32>
    %cst_102 = arith.constant 1.000000e+00 : f32
    %370 = vector.broadcast %cst_102 : f32 to vector<8x128xf32>
    %371 = arith.addf %370, %369 : vector<8x128xf32>
    %372 = arith.divf %370, %371 : vector<8x128xf32>
    %373 = vector.extract_strided_slice %356 {offsets = [0, 128], sizes = [8, 128], strides = [1, 1]} : vector<8x512xf32> to vector<8x128xf32>
    %374 = arith.negf %373 : vector<8x128xf32>
    %375 = math.exp %374 : vector<8x128xf32>
    %cst_103 = arith.constant 1.000000e+00 : f32
    %376 = vector.broadcast %cst_103 : f32 to vector<8x128xf32>
    %377 = arith.addf %376, %375 : vector<8x128xf32>
    %378 = arith.divf %376, %377 : vector<8x128xf32>
    %379 = vector.extract_strided_slice %356 {offsets = [0, 256], sizes = [8, 128], strides = [1, 1]} : vector<8x512xf32> to vector<8x128xf32>
    %380 = math.tanh %379 : vector<8x128xf32>
    %381 = vector.extract_strided_slice %356 {offsets = [0, 384], sizes = [8, 128], strides = [1, 1]} : vector<8x512xf32> to vector<8x128xf32>
    %382 = arith.negf %381 : vector<8x128xf32>
    %383 = math.exp %382 : vector<8x128xf32>
    %cst_104 = arith.constant 1.000000e+00 : f32
    %384 = vector.broadcast %cst_104 : f32 to vector<8x128xf32>
    %385 = arith.addf %384, %383 : vector<8x128xf32>
    %386 = arith.divf %384, %385 : vector<8x128xf32>
    %387 = arith.mulf %378, %335 : vector<8x128xf32>
    %388 = arith.mulf %372, %380 : vector<8x128xf32>
    %389 = arith.addf %387, %388 : vector<8x128xf32>
    %390 = math.tanh %389 : vector<8x128xf32>
    %391 = arith.mulf %386, %390 : vector<8x128xf32>
    %392 = vector.extract_strided_slice %361 {offsets = [0, 0], sizes = [8, 128], strides = [1, 1]} : vector<8x512xf32> to vector<8x128xf32>
    %393 = arith.negf %392 : vector<8x128xf32>
    %394 = math.exp %393 : vector<8x128xf32>
    %cst_105 = arith.constant 1.000000e+00 : f32
    %395 = vector.broadcast %cst_105 : f32 to vector<8x128xf32>
    %396 = arith.addf %395, %394 : vector<8x128xf32>
    %397 = arith.divf %395, %396 : vector<8x128xf32>
    %398 = vector.extract_strided_slice %361 {offsets = [0, 128], sizes = [8, 128], strides = [1, 1]} : vector<8x512xf32> to vector<8x128xf32>
    %399 = arith.negf %398 : vector<8x128xf32>
    %400 = math.exp %399 : vector<8x128xf32>
    %cst_106 = arith.constant 1.000000e+00 : f32
    %401 = vector.broadcast %cst_106 : f32 to vector<8x128xf32>
    %402 = arith.addf %401, %400 : vector<8x128xf32>
    %403 = arith.divf %401, %402 : vector<8x128xf32>
    %404 = vector.extract_strided_slice %361 {offsets = [0, 256], sizes = [8, 128], strides = [1, 1]} : vector<8x512xf32> to vector<8x128xf32>
    %405 = math.tanh %404 : vector<8x128xf32>
    %406 = vector.extract_strided_slice %361 {offsets = [0, 384], sizes = [8, 128], strides = [1, 1]} : vector<8x512xf32> to vector<8x128xf32>
    %407 = arith.negf %406 : vector<8x128xf32>
    %408 = math.exp %407 : vector<8x128xf32>
    %cst_107 = arith.constant 1.000000e+00 : f32
    %409 = vector.broadcast %cst_107 : f32 to vector<8x128xf32>
    %410 = arith.addf %409, %408 : vector<8x128xf32>
    %411 = arith.divf %409, %410 : vector<8x128xf32>
    %412 = arith.mulf %403, %337 : vector<8x128xf32>
    %413 = arith.mulf %397, %405 : vector<8x128xf32>
    %414 = arith.addf %412, %413 : vector<8x128xf32>
    %415 = math.tanh %414 : vector<8x128xf32>
    %416 = arith.mulf %411, %415 : vector<8x128xf32>
    %417 = vector.extract_strided_slice %366 {offsets = [0, 0], sizes = [8, 128], strides = [1, 1]} : vector<8x512xf32> to vector<8x128xf32>
    %418 = arith.negf %417 : vector<8x128xf32>
    %419 = math.exp %418 : vector<8x128xf32>
    %cst_108 = arith.constant 1.000000e+00 : f32
    %420 = vector.broadcast %cst_108 : f32 to vector<8x128xf32>
    %421 = arith.addf %420, %419 : vector<8x128xf32>
    %422 = arith.divf %420, %421 : vector<8x128xf32>
    %423 = vector.extract_strided_slice %366 {offsets = [0, 128], sizes = [8, 128], strides = [1, 1]} : vector<8x512xf32> to vector<8x128xf32>
    %424 = arith.negf %423 : vector<8x128xf32>
    %425 = math.exp %424 : vector<8x128xf32>
    %cst_109 = arith.constant 1.000000e+00 : f32
    %426 = vector.broadcast %cst_109 : f32 to vector<8x128xf32>
    %427 = arith.addf %426, %425 : vector<8x128xf32>
    %428 = arith.divf %426, %427 : vector<8x128xf32>
    %429 = vector.extract_strided_slice %366 {offsets = [0, 256], sizes = [8, 128], strides = [1, 1]} : vector<8x512xf32> to vector<8x128xf32>
    %430 = math.tanh %429 : vector<8x128xf32>
    %431 = vector.extract_strided_slice %366 {offsets = [0, 384], sizes = [8, 128], strides = [1, 1]} : vector<8x512xf32> to vector<8x128xf32>
    %432 = arith.negf %431 : vector<8x128xf32>
    %433 = math.exp %432 : vector<8x128xf32>
    %cst_110 = arith.constant 1.000000e+00 : f32
    %434 = vector.broadcast %cst_110 : f32 to vector<8x128xf32>
    %435 = arith.addf %434, %433 : vector<8x128xf32>
    %436 = arith.divf %434, %435 : vector<8x128xf32>
    %437 = arith.mulf %428, %339 : vector<8x128xf32>
    %438 = arith.mulf %422, %430 : vector<8x128xf32>
    %439 = arith.addf %437, %438 : vector<8x128xf32>
    %440 = math.tanh %439 : vector<8x128xf32>
    %441 = arith.mulf %436, %440 : vector<8x128xf32>
    %442 = arith.select %342, %391, %334 : vector<8x128xf32>
    %443 = arith.select %342, %389, %335 : vector<8x128xf32>
    %444 = arith.select %345, %416, %336 : vector<8x128xf32>
    %445 = arith.select %345, %414, %337 : vector<8x128xf32>
    %446 = arith.select %348, %441, %338 : vector<8x128xf32>
    %447 = arith.select %348, %439, %339 : vector<8x128xf32>
    %c4_i32_111 = arith.constant 4 : i32
    %c0_112 = arith.constant 0 : index
    %c0_113 = arith.constant 0 : index
    %448 = vector.load %arg12[%c0_112, %c0_113] : memref<8x128xf32, #tpu.memory_space<vmem>>, vector<8x128xf32>
    tpu.vector_store %arg12[%c0_112, %c0_113], %442 {strides = array<i32>} : memref<8x128xf32, #tpu.memory_space<vmem>>, vector<8x128xf32>,
    %c0_114 = arith.constant 0 : index
    %c0_115 = arith.constant 0 : index
    %449 = vector.load %arg13[%c0_114, %c0_115] : memref<8x128xf32, #tpu.memory_space<vmem>>, vector<8x128xf32>
    tpu.vector_store %arg13[%c0_114, %c0_115], %443 {strides = array<i32>} : memref<8x128xf32, #tpu.memory_space<vmem>>, vector<8x128xf32>,
    %c0_116 = arith.constant 0 : index
    %c0_117 = arith.constant 0 : index
    %450 = vector.load %arg14[%c0_116, %c0_117] : memref<8x128xf32, #tpu.memory_space<vmem>>, vector<8x128xf32>
    tpu.vector_store %arg14[%c0_116, %c0_117], %444 {strides = array<i32>} : memref<8x128xf32, #tpu.memory_space<vmem>>, vector<8x128xf32>,
    %c0_118 = arith.constant 0 : index
    %c0_119 = arith.constant 0 : index
    %451 = vector.load %arg15[%c0_118, %c0_119] : memref<8x128xf32, #tpu.memory_space<vmem>>, vector<8x128xf32>
    tpu.vector_store %arg15[%c0_118, %c0_119], %445 {strides = array<i32>} : memref<8x128xf32, #tpu.memory_space<vmem>>, vector<8x128xf32>,
    %c0_120 = arith.constant 0 : index
    %c0_121 = arith.constant 0 : index
    %452 = vector.load %arg16[%c0_120, %c0_121] : memref<8x128xf32, #tpu.memory_space<vmem>>, vector<8x128xf32>
    tpu.vector_store %arg16[%c0_120, %c0_121], %446 {strides = array<i32>} : memref<8x128xf32, #tpu.memory_space<vmem>>, vector<8x128xf32>,
    %c0_122 = arith.constant 0 : index
    %c0_123 = arith.constant 0 : index
    %453 = vector.load %arg17[%c0_122, %c0_123] : memref<8x128xf32, #tpu.memory_space<vmem>>, vector<8x128xf32>
    tpu.vector_store %arg17[%c0_122, %c0_123], %447 {strides = array<i32>} : memref<8x128xf32, #tpu.memory_space<vmem>>, vector<8x128xf32>,
    %c2_i32_124 = arith.constant 2 : i32
    %454 = arith.cmpi eq, %arg0, %c2_i32_124 : i32
    %455 = arith.extui %454 : i1 to i32
    %c0_i32_125 = arith.constant 0 : i32
    %456 = arith.cmpi ne, %455, %c0_i32_125 : i32
    scf.if %456 {
      %457 = arith.truncf %446 : vector<8x128xf32> to vector<8x128xbf16>
      %c0_126 = arith.constant 0 : index
      %c0_127 = arith.constant 0 : index
      %458 = vector.load %arg9[%c0_126, %c0_127] : memref<128x128xbf16, #tpu.memory_space<vmem>>, vector<128x128xbf16>
      %cst_128 = arith.constant dense<0.000000e+00> : vector<8x128xf32>
      %459 = tpu.matmul %457, %458, %cst_128 {dimension_numbers = #tpu.dot_dimension_numbers<[1], [0], [0], [1], [0, 0, 1, 1], [], []>} : vector<8x128xbf16>, vector<128x128xbf16>, vector<8x128xf32> -> vector<8x128xf32>
      %c0_129 = arith.constant 0 : index
      %c0_130 = arith.constant 0 : index
      %460 = vector.load %arg10[%c0_129, %c0_130] : memref<1x128xf32, #tpu.memory_space<vmem>>, vector<1x128xf32>
      %461 = vector.broadcast %460 : vector<1x128xf32> to vector<8x128xf32>
      %462 = arith.addf %459, %461 : vector<8x128xf32>
      %463 = arith.negf %462 : vector<8x128xf32>
      %464 = math.exp %463 : vector<8x128xf32>
      %cst_131 = arith.constant 1.000000e+00 : f32
      %465 = vector.broadcast %cst_131 : f32 to vector<8x128xf32>
      %466 = arith.addf %465, %464 : vector<8x128xf32>
      %467 = arith.divf %465, %466 : vector<8x128xf32>
      %c0_132 = arith.constant 0 : index
      %c0_133 = arith.constant 0 : index
      %468 = vector.load %arg11[%c0_132, %c0_133] : memref<8x128xf32, #tpu.memory_space<vmem>>, vector<8x128xf32>
      tpu.vector_store %arg11[%c0_132, %c0_133], %467 {strides = array<i32>} : memref<8x128xf32, #tpu.memory_space<vmem>>, vector<8x128xf32>,
    } else {
    }
    return
  }
  func.func @transform_0(%arg0: i32) -> (i32, i32, i32) {
    %c0_i32 = arith.constant 0 : i32
    %c0_i32_0 = arith.constant 0 : i32
    %c0_i32_1 = arith.constant 0 : i32
    return %arg0, %c0_i32, %c0_i32_0 : i32, i32, i32
  }
  func.func @transform_1(%arg0: i32) -> (i32, i32) {
    %c0_i32 = arith.constant 0 : i32
    %c0_i32_0 = arith.constant 0 : i32
    %c0_i32_1 = arith.constant 0 : i32
    return %c0_i32, %c0_i32_0 : i32, i32
  }
  func.func @transform_2(%arg0: i32) -> (i32, i32) {
    %c0_i32 = arith.constant 0 : i32
    %c0_i32_0 = arith.constant 0 : i32
    %c0_i32_1 = arith.constant 0 : i32
    return %c0_i32, %c0_i32_0 : i32, i32
  }
  func.func @transform_3(%arg0: i32) -> (i32, i32) {
    %c0_i32 = arith.constant 0 : i32
    %c0_i32_0 = arith.constant 0 : i32
    %c0_i32_1 = arith.constant 0 : i32
    return %c0_i32, %c0_i32_0 : i32, i32
  }
  func.func @transform_4(%arg0: i32) -> (i32, i32) {
    %c0_i32 = arith.constant 0 : i32
    %c0_i32_0 = arith.constant 0 : i32
    %c0_i32_1 = arith.constant 0 : i32
    return %c0_i32, %c0_i32_0 : i32, i32
  }
  func.func @transform_5(%arg0: i32) -> (i32, i32) {
    %c0_i32 = arith.constant 0 : i32
    %c0_i32_0 = arith.constant 0 : i32
    %c0_i32_1 = arith.constant 0 : i32
    return %c0_i32, %c0_i32_0 : i32, i32
  }
  func.func @transform_6(%arg0: i32) -> (i32, i32) {
    %c0_i32 = arith.constant 0 : i32
    %c0_i32_0 = arith.constant 0 : i32
    %c0_i32_1 = arith.constant 0 : i32
    return %c0_i32, %c0_i32_0 : i32, i32
  }
  func.func @transform_7(%arg0: i32) -> (i32, i32) {
    %c0_i32 = arith.constant 0 : i32
    %c0_i32_0 = arith.constant 0 : i32
    %c0_i32_1 = arith.constant 0 : i32
    return %c0_i32, %c0_i32_0 : i32, i32
  }
  func.func @transform_8(%arg0: i32) -> (i32, i32) {
    %c0_i32 = arith.constant 0 : i32
    %c0_i32_0 = arith.constant 0 : i32
    %c0_i32_1 = arith.constant 0 : i32
    return %c0_i32, %c0_i32_0 : i32, i32
  }
  func.func @transform_9(%arg0: i32) -> (i32, i32) {
    %c0_i32 = arith.constant 0 : i32
    %c0_i32_0 = arith.constant 0 : i32
    %c0_i32_1 = arith.constant 0 : i32
    return %c0_i32, %c0_i32_0 : i32, i32
  }
  func.func @transform_10(%arg0: i32) -> (i32, i32) {
    %c0_i32 = arith.constant 0 : i32
    %c0_i32_0 = arith.constant 0 : i32
    %c0_i32_1 = arith.constant 0 : i32
    return %c0_i32, %c0_i32_0 : i32, i32
  }
}

</mosaic_0001>

<bundles_post_ra>
// kernel: lstm_forward.1
= control target key start
LH: loop header
LB: loop body
LE: loop exit
PB: predicated region body
PF: predicated region fallthrough
CT: control target
= control target key end

     0   :  { %15 = vsyncpa [#allocation9], 0  ;;  %s6965_s0 = inlined_call_operand.vmem [shape: f32[12,8,512], index: 0, kind: input, shape index: {}]   ;;  %s6966_s1 = inlined_call_operand.vmem [shape: bf16[128,512], index: 1, kind: input, shape index: {}]   ;;  %s6967_s2 = inlined_call_operand.vmem [shape: bf16[128,512], index: 2, kind: input, shape index: {}]   ;;  %s6968_s3 = inlined_call_operand.hbm [shape: bf16[128,512], index: 3, kind: input, shape index: {}]   ;;  %s6969_s4 = inlined_call_operand.vmem [shape: f32[1,512], index: 4, kind: input, shape index: {}]   ;;  %s6970_s5 = inlined_call_operand.hbm [shape: bf16[128,512], index: 5, kind: input, shape index: {}]   ;;  %s6971_s6 = inlined_call_operand.hbm [shape: bf16[128,512], index: 6, kind: input, shape index: {}]   ;;  %s6972_s7 = inlined_call_operand.vmem [shape: f32[1,512], index: 7, kind: input, shape index: {}]   ;;  %s6973_s8 = inlined_call_operand.vmem [shape: bf16[128,128], index: 8, kind: input, shape index: {}]   ;;  %s6974_s9 = inlined_call_operand.vmem [shape: f32[1,128], index: 9, kind: input, shape index: {}]   ;;  %s6975_s10 = inlined_call_operand.vmem [shape: f32[8,128], index: 10, kind: output, shape index: {}]  }
   0x1   :  { %16 = vsyncpa [#allocation11], 0  ;;  %s4797_s13 = smov 0  }
   0x2 LB: > { %s4803_s14 = sadd.s32 4294967295, %s4731_s13   ;;  %p3711_p0 = scmp.ge.s32.totalorder %s4731_s13, 1  ;;  %s4731_s13 = sphi %s4797_s13, %s22_s13  }
   0x3   : > { %p263_p1 = scmp.lt.s32.totalorder %s4731_s13, 4  ;;  %p6976_p3 = scmp.eq.s32.totalorder %s4803_s14, 0 }
   0x4   : > { %s4733_s16 = smov [#allocation10]   ;;  %s4734_s18 = smov [#allocation8]  }
   0x5   : > { %p4809_p4 = pnand %p3711_p0, %p263_p1  ;;  %s297_s17 = sshll.u32 %s4733_s16, 4  ;;  %s298_s17 = int_to_ptr.vmem [resolvable:$true] %s297_s17 }
   0x6   : > { %s281_s19 = sshll.u32 %s4734_s18, 4  ;;  %s4735_s21 = smov [#allocation12]   ;;  %s4821_s19 = int_to_ptr.vmem [resolvable:$true] %s281_s19 }
   0x7   : > { %s7195_s15 = scalar_select %p4809_p4, 1, 0 }
   0x8   : > { %p3996_p5 = pneg %p4809_p4  ;;  %s310_s22 = sshll.u32 %s4735_s21, 4  ;;  %s4823_s22 = int_to_ptr.vmem [resolvable:$true] %s310_s22 }
   0x9   : > { %s4633_s25 = scalar_lea.hbm %s6970_s5, 4096 }
   0xa   : > { %p4817_p6 = pnand %p6976_p3, %p3996_p5  ;;  %p4634_p7 = scmp.ne.s32.totalorder %s6970_s5, %s4633_s25 }
   0xb   : > { %p4640_p11 = scmp.lt.u32.totalorder %s4633_s25, %s6970_s5 }
   0xc   : > { %p4833_p8 = pneg %p4817_p6 }
   0xe   : > { %p4636_p9 = pnand %p4833_p8, %p4634_p7 }
  0x10   : > { %p4637_p10 = pneg %p4636_p9 }
  0x12   : > { %p4642_p12 = pnand %p4640_p11, %p4637_p10 }
  0x14   : > { %4645 = shalt.err (!%p4642_p12)
}
  0x15   : > { %s4646_s11 = scalar_lea.vmem %s298_s17, 4096  ;;  %p4654_p5 = scmp.lt.s32.totalorder %s298_s17, %s298_s17 }
  0x16   : > { %p4647_p13 = scmp.ne.s32.totalorder %s298_s17, %s4646_s11  ;;  %p4655_p2 = scmp.lt.s32.totalorder %s4646_s11, %s4646_s11 }
  0x18   : > { %p4649_p0 = pnand %p4647_p13, %p4833_p8  ;;  %p4656_p3 = por %p4655_p2, %p4654_p5 }
  0x1a   : > { %p4650_p1 = pneg %p4649_p0 }
  0x1c   : > { %p4657_p4 = pnand %p4656_p3, %p4650_p1 }
  0x1e   : > { %4660 = shalt.err (!%p4657_p4)
}
  0x1f   : > { %s4736_s12 = smov 256   ;;  %s4737_s16 = smov 16  }
  0x20   : > { %4002 = dma.hbm_to_vmem [thread:$0]  (!%p4817_p6), %s6970_s5, 4096, %s298_s17, [#allocation11], %s4736_s12, %s4736_s12, %s4737_s16  }
  0x21   : > { %s4661_s25 = scalar_lea.hbm %s6968_s3, 4096 }
  0x22   : > { %p4662_p2 = scmp.ne.s32.totalorder %s6968_s3, %s4661_s25  ;;  %p4668_p7 = scmp.lt.u32.totalorder %s4661_s25, %s6968_s3 }
  0x24   : > { %p4664_p3 = pnand %p4662_p2, %p4833_p8 }
  0x26   : > { %p4665_p4 = pneg %p4664_p3 }
  0x28   : > { %p4670_p9 = pnand %p4668_p7, %p4665_p4 }
  0x2a   : > { %4673 = shalt.err (!%p4670_p9)
}
  0x2b   : > { %s4674_s17 = scalar_lea.vmem %s4821_s19, 4096  ;;  %p4682_p13 = scmp.lt.s32.totalorder %s4821_s19, %s4821_s19 }
  0x2c   : > { %p4675_p10 = scmp.ne.s32.totalorder %s4821_s19, %s4674_s17  ;;  %p4683_p0 = scmp.lt.s32.totalorder %s4674_s17, %s4674_s17 }
  0x2e   : > { %p4677_p11 = pnand %p4675_p10, %p4833_p8  ;;  %p4684_p1 = por %p4683_p0, %p4682_p13 }
  0x30   : > { %p4678_p12 = pneg %p4677_p11 }
  0x32   : > { %p4685_p5 = pnand %p4684_p1, %p4678_p12 }
  0x34   : > { %4688 = shalt.err (!%p4685_p5)
}
  0x35   : > { %3999 = dma.hbm_to_vmem [thread:$0]  (!%p4817_p6), %s6968_s3, 4096, %s4821_s19, [#allocation9], %s4736_s12, %s4736_s12, %s4737_s16  }
  0x36   : > { %s4689_s24 = scalar_lea.hbm %s6971_s6, 4096 }
  0x37   : > { %p4690_p2 = scmp.ne.s32.totalorder %s6971_s6, %s4689_s24  ;;  %p4696_p7 = scmp.lt.u32.totalorder %s4689_s24, %s6971_s6 }
  0x39   : > { %p4692_p3 = pnand %p4690_p2, %p4833_p8 }
  0x3b   : > { %p4693_p4 = pneg %p4692_p3 }
  0x3d   : > { %p4698_p9 = pnand %p4696_p7, %p4693_p4 }
  0x3f   : > { %4701 = shalt.err (!%p4698_p9)
}
  0x40   : > { %s4702_s19 = scalar_lea.vmem %s4823_s22, 4096  ;;  %p4710_p13 = scmp.lt.s32.totalorder %s4823_s22, %s4823_s22 }
  0x41   : > { %p4703_p10 = scmp.ne.s32.totalorder %s4823_s22, %s4702_s19  ;;  %p4711_p0 = scmp.lt.s32.totalorder %s4702_s19, %s4702_s19 }
  0x43   : > { %p4705_p11 = pnand %p4703_p10, %p4833_p8  ;;  %p4712_p1 = por %p4711_p0, %p4710_p13 }
  0x45   : > { %p4706_p12 = pneg %p4705_p11 }
  0x47   : > { %p4713_p5 = pnand %p4712_p1, %p4706_p12 }
  0x49   : > { %4716 = shalt.err (!%p4713_p5)
}
  0x4a   : > { %4005 = dma.hbm_to_vmem [thread:$0]  (!%p4817_p6), %s6971_s6, 4096, %s4823_s22, [#allocation11], %s4736_s12, %s4736_s12, %s4737_s16  }
  0x4b   : > { %p7198_p2 = scmp.ne.s32.totalorder %s7195_s15, 0 }
  0x4d   : > { %345 = sbr.rel (%p7198_p2) target bundleno = 1672 (0x688), region = 60 }
  0x54   : > { %p7199_p8 = scmp.eq.s32.totalorder %s4803_s14, 0 }
  0x56   : > { %4722 = dma.done.wait (%p7199_p8), [#allocation9], 4096   ;;  %p7200_p3 = pmov %p7199_p8 }
  0x58   : > { %4724 = vsyncadd (%p7200_p3), [#allocation9], 4294963200  ;;  %p7201_p4 = pmov %p7200_p3 }
  0x59   : > { %p7202_p7 = pmov %p7200_p3 }
  0x5a   : > { %4726 = dma.done.wait (%p7201_p4), [#allocation11], 8192  }
  0x5b   : > { %4728 = vsyncadd (%p7202_p7), [#allocation11], 4294959104  ;;  %s4915_s20 = sshll.u32 %s4803_s14, 2  ;;  %p7203_p9 = scmp.ne.s32.totalorder %s4803_s14, 0 }
  0x5c   : > { %p388_p6 = scmp.lt.s32.totalorder %s4915_s20, 11  ;;  %v4738_v0 = vmov (!%p7203_p9), 0.0  }
  0x5d   : > { %398 = sbr.rel (%p7203_p9) target bundleno = 100 (0x64), region = 76  ;;  %399 = vst [vmem:[#allocation2] sm:$0xff] (!%p7203_p9), %v4738_v0  ;;  %400 = vst [vmem:[#allocation3] sm:$0xff] (!%p7203_p9), %v4738_v0 }
  0x5e   : > { %s389_s15 = scalar_select %p388_p6, %s4915_s20, 11 }
  0x5f   : > { %401 = vst [vmem:[#allocation4] sm:$0xff] (!%p7203_p9), %v4738_v0  ;;  %402 = vst [vmem:[#allocation5] sm:$0xff] (!%p7203_p9), %v4738_v0 }
  0x60   : > { %s3954_s22 = sshll.u32 %s389_s15, 5  ;;  %403 = vst [vmem:[#allocation6] sm:$0xff] (!%p7203_p9), %v4738_v0  ;;  %404 = vst [vmem:[#allocation7] sm:$0xff] (!%p7203_p9), %v4738_v0 }
  0x61   : > { %s4922_s16 = scalar_lea.vmem %s6965_s0, %s3954_s22 }
  0x64 PF: > { %v4929_v1 = vld [vmem:[%s6966_s1 + $0x4] ss:$16 sps:$4 sm:$0xff]   ;;  %v4934_v2 = vld [vmem:[%s6966_s1 + $0xc] ss:$16 sps:$4 sm:$0xff]   ;;  %v6978_v3 = vmov 0   ;;  %p574_p10 = scmp.lt.s32.totalorder %s4915_s20, 8 }
  0x65   : > { %782 = vmatprep.mubr.bf16.mxu0 %v6978_v3  ;;  %823 = vmatprep.mubr.bf16.mxu1 %v6978_v3  ;;  %v4942_v4 = vld [vmem:[%s6966_s1] ss:$16 sps:$4 sm:$0xff]   ;;  %v4947_v5 = vld [vmem:[%s6966_s1 + $0x8] ss:$16 sps:$4 sm:$0xff]   ;;  %v4953_v6 = vld [vmem:[%s6966_s1 + $0x24] ss:$16 sps:$4 sm:$0xff]  }
  0x66   : > { %750 = vmatprep.subr.bf16.mxu0 %v4929_v1  ;;  %791 = vmatprep.subr.bf16.mxu1 %v4934_v2  ;;  %v4960_v7 = vld [vmem:[%s6966_s1 + $0x2c] ss:$16 sps:$4 sm:$0xff]   ;;  %v4965_v8 = vld [vmem:[%s6966_s1 + $0x20] ss:$16 sps:$4 sm:$0xff]   ;;  %v4971_v9 = vld [vmem:[%s6966_s1 + $0x28] ss:$16 sps:$4 sm:$0xff]  }
  0x67   : > { %751 = vmatpush1.bf16.msra.mxu0 %v4942_v4  ;;  %792 = vmatpush1.bf16.msra.mxu1 %v4947_v5  ;;  %v4977_v10 = vld [vmem:[%s6966_s1 + $0x44] ss:$16 sps:$4 sm:$0xff]   ;;  %v4982_v11 = vld [vmem:[%s6966_s1 + $0x4c] ss:$16 sps:$4 sm:$0xff]   ;;  %v4987_v12 = vld [vmem:[%s6966_s1 + $0x40] ss:$16 sps:$4 sm:$0xff]  }
  0x68   : > { %752 = vmatprep.subr.bf16.mxu0 %v4953_v6  ;;  %793 = vmatprep.subr.bf16.mxu1 %v4960_v7  ;;  %v4992_v13 = vld [vmem:[%s6966_s1 + $0x48] ss:$16 sps:$4 sm:$0xff]   ;;  %v4999_v14 = vld [vmem:[%s6966_s1 + $0x64] ss:$16 sps:$4 sm:$0xff]   ;;  %v5006_v15 = vld [vmem:[%s6966_s1 + $0x6c] ss:$16 sps:$4 sm:$0xff]  }
  0x69   : > { %v5011_v16 = vld [vmem:[%s6966_s1 + $0x60] ss:$16 sps:$4 sm:$0xff]   ;;  %v5018_v17 = vld [vmem:[%s6966_s1 + $0x68] ss:$16 sps:$4 sm:$0xff]   ;;  %v5023_v18 = vld [vmem:[%s6966_s1 + $0x84] ss:$16 sps:$4 sm:$0xff]  }
  0x6a   : > { %v5030_v19 = vld [vmem:[%s6966_s1 + $0x8c] ss:$16 sps:$4 sm:$0xff]   ;;  %v5035_v20 = vld [vmem:[%s6966_s1 + $0x80] ss:$16 sps:$4 sm:$0xff]   ;;  %v5040_v21 = vld [vmem:[%s6966_s1 + $0x88] ss:$16 sps:$4 sm:$0xff]  }
  0x6b   : > { %753 = vmatpush1.bf16.msra.mxu0 %v4965_v8  ;;  %794 = vmatpush1.bf16.msra.mxu1 %v4971_v9  ;;  %v5047_v22 = vld [vmem:[%s6966_s1 + $0xa4] ss:$16 sps:$4 sm:$0xff]   ;;  %v5054_v23 = vld [vmem:[%s6966_s1 + $0xac] ss:$16 sps:$4 sm:$0xff]   ;;  %v5061_v24 = vld [vmem:[%s6966_s1 + $0xa0] ss:$16 sps:$4 sm:$0xff]  }
  0x6c   : > { %754 = vmatprep.subr.bf16.mxu0 %v4977_v10  ;;  %795 = vmatprep.subr.bf16.mxu1 %v4982_v11  ;;  %v5066_v25 = vld [vmem:[%s6966_s1 + $0xa8] ss:$16 sps:$4 sm:$0xff]   ;;  %v5073_v26 = vld [vmem:[%s6966_s1 + $0xc4] ss:$16 sps:$4 sm:$0xff]   ;;  %v5078_v27 = vld [vmem:[%s6966_s1 + $0xcc] ss:$16 sps:$4 sm:$0xff]  }
  0x6d   : > { %v5083_v28 = vld [vmem:[%s6966_s1 + $0xc0] ss:$16 sps:$4 sm:$0xff]   ;;  %v5088_v29 = vld [vmem:[%s6966_s1 + $0xc8] ss:$16 sps:$4 sm:$0xff]   ;;  %v5095_v30 = vld [vmem:[%s6966_s1 + $0xe4] ss:$16 sps:$4 sm:$0xff]  }
  0x6e   : > { %v5102_v31 = vld [vmem:[%s6966_s1 + $0xec] ss:$16 sps:$4 sm:$0xff]   ;;  %v5107_v32 = vld [vmem:[%s6966_s1 + $0xe0] ss:$16 sps:$4 sm:$0xff]   ;;  %v5112_v33 = vld [vmem:[%s6966_s1 + $0xe8] ss:$16 sps:$4 sm:$0xff]  }
  0x6f   : > { %755 = vmatpush1.bf16.msra.mxu0 %v4987_v12  ;;  %796 = vmatpush1.bf16.msra.mxu1 %v4992_v13  ;;  %v5116_v34 = vld [vmem:[#allocation2] sm:$0xff]  ;;  %v5122_v36 = vld [vmem:[#allocation8 + $0xc] ss:$16 sps:$4 sm:$0xff]   ;;  %v5130_v39 = vld [vmem:[#allocation8 + $0x8] ss:$16 sps:$4 sm:$0xff]   ;;  %p575_p11 = scmp.ge.s32.totalorder %s4915_s20, 1 }
  0x70   : > { %756 = vmatprep.subr.bf16.mxu0 %v4999_v14  ;;  %797 = vmatprep.subr.bf16.mxu1 %v5006_v15  ;;  %v5120_v35 = vld [vmem:[#allocation8 + $0x4] ss:$16 sps:$4 sm:$0xff]   ;;  %v5126_v37 = vpack.c.bf16 %v5116_v34, %v5116_v34  ;;  %v5128_v38 = vld [vmem:[#allocation8] ss:$16 sps:$4 sm:$0xff]   ;;  %v5138_v41 = vld [vmem:[#allocation8 + $0x2c] ss:$16 sps:$4 sm:$0xff]  }
  0x71   : > { %v5134_v40 = vld [vmem:[#allocation8 + $0x24] ss:$16 sps:$4 sm:$0xff]   ;;  %v5142_v42 = vld [vmem:[#allocation8 + $0x20] ss:$16 sps:$4 sm:$0xff]   ;;  %v5146_v43 = vld [vmem:[#allocation8 + $0x28] ss:$16 sps:$4 sm:$0xff]  }
  0x72   : > { %v5150_v44 = vld [vmem:[#allocation8 + $0x44] ss:$16 sps:$4 sm:$0xff]   ;;  %v5152_v45 = vld [vmem:[#allocation8 + $0x4c] ss:$16 sps:$4 sm:$0xff]   ;;  %v5156_v46 = vld [vmem:[#allocation8 + $0x40] ss:$16 sps:$4 sm:$0xff]  }
  0x73   : > { %757 = vmatpush1.bf16.msra.mxu0 %v5011_v16  ;;  %798 = vmatpush1.bf16.msra.mxu1 %v5018_v17  ;;  %v5158_v47 = vld [vmem:[#allocation8 + $0x48] ss:$16 sps:$4 sm:$0xff]   ;;  %v5162_v48 = vld [vmem:[#allocation8 + $0x64] ss:$16 sps:$4 sm:$0xff]   ;;  %v5166_v49 = vld [vmem:[#allocation8 + $0x6c] ss:$16 sps:$4 sm:$0xff]  }
  0x74   : > { %758 = vmatprep.subr.bf16.mxu0 %v5023_v18  ;;  %799 = vmatprep.subr.bf16.mxu1 %v5030_v19  ;;  %v5168_v50 = vld [vmem:[#allocation8 + $0x60] ss:$16 sps:$4 sm:$0xff]   ;;  %v5172_v51 = vld [vmem:[#allocation8 + $0x68] ss:$16 sps:$4 sm:$0xff]   ;;  %v5176_v52 = vld [vmem:[#allocation8 + $0x84] ss:$16 sps:$4 sm:$0xff]  }
  0x75   : > { %v5178_v53 = vld [vmem:[#allocation8 + $0x8c] ss:$16 sps:$4 sm:$0xff]   ;;  %v5180_v54 = vld [vmem:[#allocation8 + $0x80] ss:$16 sps:$4 sm:$0xff]   ;;  %v5184_v55 = vld [vmem:[#allocation8 + $0x88] ss:$16 sps:$4 sm:$0xff]  }
  0x76   : > { %7204 = vst [vmem:[#allocation15_spill] sm:$0xff] %v5184_v55  ;;  %v5186_v56 = vld [vmem:[#allocation8 + $0xa4] ss:$16 sps:$4 sm:$0xff]   ;;  %v5190_v57 = vld [vmem:[#allocation8 + $0xac] ss:$16 sps:$4 sm:$0xff]   ;;  %p576_p12 = scmp.le.s32.totalorder %s4915_s20, 8 }
  0x77   : > { %759 = vmatpush1.bf16.msra.mxu0 %v5035_v20  ;;  %800 = vmatpush1.bf16.msra.mxu1 %v5040_v21  ;;  %7205 = vst [vmem:[#allocation16_spill] sm:$0xff] %v5186_v56  ;;  %7206 = vst [vmem:[#allocation17_spill] sm:$0xff] %v5190_v57  ;;  %v5192_v58 = vld [vmem:[#allocation8 + $0xa0] ss:$16 sps:$4 sm:$0xff]   ;;  %v5196_v59 = vld [vmem:[#allocation8 + $0xa8] ss:$16 sps:$4 sm:$0xff]  }
  0x78   : > { %760 = vmatprep.subr.bf16.mxu0 %v5047_v22  ;;  %801 = vmatprep.subr.bf16.mxu1 %v5054_v23  ;;  %7207 = vst [vmem:[#allocation18_spill] sm:$0xff] %v5192_v58  ;;  %7208 = vst [vmem:[#allocation19_spill] sm:$0xff] %v5196_v59  ;;  %v5200_v60 = vld [vmem:[#allocation8 + $0xc4] ss:$16 sps:$4 sm:$0xff]   ;;  %v5202_v61 = vld [vmem:[#allocation8 + $0xcc] ss:$16 sps:$4 sm:$0xff]   ;;  %p577_p13 = pnand %p576_p12, %p575_p11 }
  0x79   : > { %7209 = vst [vmem:[#allocation20_spill] sm:$0xff] %v5200_v60  ;;  %7210 = vst [vmem:[#allocation21_spill] sm:$0xff] %v5202_v61  ;;  %v5204_v62 = vld [vmem:[#allocation8 + $0xc0] ss:$16 sps:$4 sm:$0xff]   ;;  %v5208_v63 = vld [vmem:[#allocation8 + $0xc8] ss:$16 sps:$4 sm:$0xff]  }
  0x7a   : > { %7211 = vst [vmem:[#allocation22_spill] sm:$0xff] %v5204_v62  ;;  %7212 = vst [vmem:[#allocation23_spill] sm:$0xff] %v5208_v63  ;;  %v5210_v0 = vld [vmem:[#allocation8 + $0xe4] ss:$16 sps:$4 sm:$0xff]   ;;  %s1926_s11 = scalar_select %p574_p10, 1, 0 }
  0x7b   : > { %761 = vmatpush1.bf16.msra.mxu0 %v5061_v24  ;;  %802 = vmatpush1.bf16.msra.mxu1 %v5066_v25  ;;  %7213 = vst [vmem:[#allocation24_spill] sm:$0xff] %v5210_v0  ;;  %s3894_s23 = scalar_select %p577_p13, 0, 1 }
  0x7c   : > { %762 = vmatprep.subr.bf16.mxu0 %v5073_v26  ;;  %803 = vmatprep.subr.bf16.mxu1 %v5078_v27  ;;  %p579_p0 = scmp.ge.s32.totalorder %s4915_s20, 2  ;;  %p580_p1 = scmp.le.s32.totalorder %s4915_s20, 9 }
  0x7d   : > { %s6117_s29 = sadd.s32 1, %s4915_s20 }
  0x7e   : > { %p5833_p5 = pnand %p580_p1, %p579_p0  ;;  %p1942_p2 = scmp.lt.s32.totalorder %s6117_s29, 8 }
  0x7f   : > { %763 = vmatpush1.bf16.msra.mxu0 %v5083_v28  ;;  %804 = vmatpush1.bf16.msra.mxu1 %v5088_v29  ;;  %p1943_p8 = scmp.ge.s32.totalorder %s6117_s29, 1  ;;  %p1944_p3 = scmp.le.s32.totalorder %s6117_s29, 8 }
  0x80   : > { %764 = vmatprep.subr.bf16.mxu0 %v5095_v30  ;;  %805 = vmatprep.subr.bf16.mxu1 %v5102_v31  ;;  %s3895_s27 = scalar_select %p5833_p5, 0, 1 }
  0x81   : > { %s2453_s19 = scalar_select %p1942_p2, 1, 0 }
  0x82   : > { %p1945_p4 = pnand %p1944_p3, %p1943_p8  ;;  %p1947_p7 = scmp.ge.s32.totalorder %s6117_s29, 2 }
  0x83   : > { %765 = vmatpush1.bf16.msra.mxu0 %v5107_v32  ;;  %806 = vmatpush1.bf16.msra.mxu1 %v5112_v33  ;;  %p1948_p6 = scmp.le.s32.totalorder %s6117_s29, 9 }
  0x84   : > { %996 = vmatprep.subr.bf16.mxu0 %v5120_v35  ;;  %1037 = vmatprep.subr.bf16.mxu1 %v5122_v36  ;;  %s3909_s28 = scalar_select %p1945_p4, 0, 1 }
  0x85   : > { %p6468_p9 = pnand %p1948_p6, %p1947_p7 }
  0x86   : > { %783 = vmatmul.mubr.bf16.vlgmr.msra.gmra.mrb[0].mxu0 %v5126_v37  ;;  %824 = vmatmul.mubr.bf16.vlgmr.msra.gmra.mrb[0].mxu1 %v5126_v37 }
  0x87   : > { %997 = vmatpush1.bf16.msra.mxu0 %v5128_v38  ;;  %1038 = vmatpush1.bf16.msra.mxu1 %v5130_v39  ;;  %s3910_s29 = scalar_select %p6468_p9, 0, 1 }
  0x88   : > { %998 = vmatprep.subr.bf16.mxu0 %v5134_v40  ;;  %1039 = vmatprep.subr.bf16.mxu1 %v5138_v41 }
  0x89   : > { %1028 = vmatprep.mubr.bf16.mxu0 %v6978_v3  ;;  %1069 = vmatprep.mubr.bf16.mxu1 %v6978_v3  ;;  %v5214_v3 = vld [vmem:[#allocation8 + $0xec] ss:$16 sps:$4 sm:$0xff]  }
  0x8a   : > { %7214 = vst [vmem:[#allocation25_spill] sm:$0xff] %v5214_v3 }
  0x8b   : > { %999 = vmatpush1.bf16.msra.mxu0 %v5142_v42  ;;  %1040 = vmatpush1.bf16.msra.mxu1 %v5146_v43 }
  0x8c   : > { %1000 = vmatprep.subr.bf16.mxu0 %v5150_v44  ;;  %1041 = vmatprep.subr.bf16.mxu1 %v5152_v45 }
  0x8f   : > { %1001 = vmatpush1.bf16.msra.mxu0 %v5156_v46  ;;  %1042 = vmatpush1.bf16.msra.mxu1 %v5158_v47 }
  0x90   : > { %1002 = vmatprep.subr.bf16.mxu0 %v5162_v48  ;;  %1043 = vmatprep.subr.bf16.mxu1 %v5166_v49 }
  0x93   : > { %1003 = vmatpush1.bf16.msra.mxu0 %v5168_v50  ;;  %1044 = vmatpush1.bf16.msra.mxu1 %v5172_v51 }
  0x94   : > { %1004 = vmatprep.subr.bf16.mxu0 %v5176_v52  ;;  %1045 = vmatprep.subr.bf16.mxu1 %v5178_v53 }
  0x97   : > { %1005 = vmatpush1.bf16.msra.mxu0 %v5180_v54  ;;  %1046 = vmatpush1.bf16.msra.mxu1 %v5184_v55  ;;  %v5436_v55 = vld [vmem:[#allocation12 + $0x24] ss:$16 sps:$4 sm:$0xff]  }
  0x98   : > { %1006 = vmatprep.subr.bf16.mxu0 %v5186_v56  ;;  %1047 = vmatprep.subr.bf16.mxu1 %v5190_v57  ;;  %v5216_v57 = vld [vmem:[#allocation8 + $0xe0] ss:$16 sps:$4 sm:$0xff]   ;;  %v5218_v56 = vld [vmem:[#allocation8 + $0xe8] ss:$16 sps:$4 sm:$0xff]   ;;  %7255 = vst [vmem:[#allocation65_spill] sm:$0xff] %v5436_v55 }
  0x99   : > { %7215 = vst [vmem:[#allocation26_spill] sm:$0xff] %v5216_v57  ;;  %7216 = vst [vmem:[#allocation27_spill] sm:$0xff] %v5218_v56 }
  0x9b   : > { %1007 = vmatpush1.bf16.msra.mxu0 %v5192_v58  ;;  %1048 = vmatpush1.bf16.msra.mxu1 %v5196_v59  ;;  %v5222_v58 = vld [vmem:[#allocation4] sm:$0xff]  ;;  %v5428_v59 = vld [vmem:[#allocation12 + $0xc] ss:$16 sps:$4 sm:$0xff]  }
  0x9c   : > { %1008 = vmatprep.subr.bf16.mxu0 %v5200_v60  ;;  %1049 = vmatprep.subr.bf16.mxu1 %v5202_v61  ;;  %7217 = vst [vmem:[#allocation28_spill] sm:$0xff] %v5222_v58  ;;  %v5229_v61 = vld [vmem:[%s6967_s2 + $0x4] ss:$16 sps:$4 sm:$0xff]   ;;  %v5234_v60 = vld [vmem:[%s6967_s2 + $0xc] ss:$16 sps:$4 sm:$0xff]   ;;  %7252 = vst [vmem:[#allocation62_spill] sm:$0xff] %v5428_v59 }
  0x9d   : > { %7218 = vst [vmem:[#allocation29_spill] sm:$0xff] %v5229_v61  ;;  %7219 = vst [vmem:[#allocation30_spill] sm:$0xff] %v5234_v60 }
  0x9f   : > { %1009 = vmatpush1.bf16.msra.mxu0 %v5204_v62  ;;  %1050 = vmatpush1.bf16.msra.mxu1 %v5208_v63  ;;  %v5238_v62 = vpack.c.bf16 %v5222_v58, %v5222_v58  ;;  %v5255_v63 = vld [vmem:[%s6967_s2 + $0x24] ss:$16 sps:$4 sm:$0xff]   ;;  %v5262_v58 = vld [vmem:[%s6967_s2 + $0x2c] ss:$16 sps:$4 sm:$0xff]  }
  0xa0   : > { %1010 = vmatprep.subr.bf16.mxu0 %v5210_v0  ;;  %1051 = vmatprep.subr.bf16.mxu1 %v5214_v3  ;;  %v5243_v0 = vld [vmem:[%s6967_s2] ss:$16 sps:$4 sm:$0xff]   ;;  %v5250_v3 = vld [vmem:[%s6967_s2 + $0x8] ss:$16 sps:$4 sm:$0xff]   ;;  %7222 = vst [vmem:[#allocation33_spill] sm:$0xff] %v5255_v63  ;;  %7223 = vst [vmem:[#allocation34_spill] sm:$0xff] %v5262_v58 }
  0xa1   : > { %7220 = vst [vmem:[#allocation31_spill] sm:$0xff] %v5243_v0  ;;  %7221 = vst [vmem:[#allocation32_spill] sm:$0xff] %v5250_v3 }
  0xa3   : > { %1011 = vmatpush1.bf16.msra.mxu0 %v5216_v57  ;;  %1052 = vmatpush1.bf16.msra.mxu1 %v5218_v56  ;;  %v5269_v56 = vld [vmem:[%s6967_s2 + $0x20] ss:$16 sps:$4 sm:$0xff]   ;;  %v5307_v57 = vld [vmem:[%s6967_s2 + $0x64] ss:$16 sps:$4 sm:$0xff]  }
  0xa4   : > { %1238 = vmatprep.subr.bf16.mxu0 %v5229_v61  ;;  %1279 = vmatprep.subr.bf16.mxu1 %v5234_v60  ;;  %7224 = vst [vmem:[#allocation35_spill] sm:$0xff] %v5269_v56  ;;  %v5276_v60 = vld [vmem:[%s6967_s2 + $0x28] ss:$16 sps:$4 sm:$0xff]   ;;  %v5283_v61 = vld [vmem:[%s6967_s2 + $0x44] ss:$16 sps:$4 sm:$0xff]   ;;  %7231 = vst [vmem:[#allocation41_spill] sm:$0xff] %v5307_v57 }
  0xa5   : > { %7225 = vst [vmem:[#allocation36_spill] sm:$0xff] %v5276_v60  ;;  %7226 = vst [vmem:[#allocation37_spill] sm:$0xff] %v5283_v61 }
  0xa6   : > { %1029 = vmatmul.mubr.bf16.vlgmr.msra.gmra.mrb[4].mxu0 %v5238_v62  ;;  %1070 = vmatmul.mubr.bf16.vlgmr.msra.gmra.mrb[4].mxu1 %v5238_v62 }
  0xa7   : > { %1239 = vmatpush1.bf16.msra.mxu0 %v5243_v0  ;;  %1280 = vmatpush1.bf16.msra.mxu1 %v5250_v3  ;;  %v5288_v0 = vld [vmem:[%s6967_s2 + $0x4c] ss:$16 sps:$4 sm:$0xff]   ;;  %v7228_v3 = vmov 0  }
  0xa8   : > { %1240 = vmatprep.subr.bf16.mxu0 %v5255_v63  ;;  %1281 = vmatprep.subr.bf16.mxu1 %v5262_v58  ;;  %7227 = vst [vmem:[#allocation38_spill] sm:$0xff] %v5288_v0  ;;  %v5295_v63 = vld [vmem:[%s6967_s2 + $0x40] ss:$16 sps:$4 sm:$0xff]   ;;  %v5302_v58 = vld [vmem:[%s6967_s2 + $0x48] ss:$16 sps:$4 sm:$0xff]  }
  0xa9   : > { %1270 = vmatprep.mubr.bf16.mxu0 %v7228_v3  ;;  %1311 = vmatprep.mubr.bf16.mxu1 %v7228_v3  ;;  %7229 = vst [vmem:[#allocation39_spill] sm:$0xff] %v5295_v63  ;;  %7230 = vst [vmem:[#allocation40_spill] sm:$0xff] %v5302_v58 }
  0xab   : > { %1241 = vmatpush1.bf16.msra.mxu0 %v5269_v56  ;;  %1282 = vmatpush1.bf16.msra.mxu1 %v5276_v60  ;;  %v5314_v56 = vld [vmem:[%s6967_s2 + $0x6c] ss:$16 sps:$4 sm:$0xff]   ;;  %v5319_v60 = vld [vmem:[%s6967_s2 + $0x60] ss:$16 sps:$4 sm:$0xff]  }
  0xac   : > { %1242 = vmatprep.subr.bf16.mxu0 %v5283_v61  ;;  %1283 = vmatprep.subr.bf16.mxu1 %v5288_v0  ;;  %7232 = vst [vmem:[#allocation42_spill] sm:$0xff] %v5314_v56  ;;  %7233 = vst [vmem:[#allocation43_spill] sm:$0xff] %v5319_v60  ;;  %v5326_v61 = vld [vmem:[%s6967_s2 + $0x68] ss:$16 sps:$4 sm:$0xff]   ;;  %v5333_v0 = vld [vmem:[%s6967_s2 + $0x84] ss:$16 sps:$4 sm:$0xff]  }
  0xad   : > { %7234 = vst [vmem:[#allocation44_spill] sm:$0xff] %v5326_v61  ;;  %7235 = vst [vmem:[#allocation45_spill] sm:$0xff] %v5333_v0 }
  0xaf   : > { %1243 = vmatpush1.bf16.msra.mxu0 %v5295_v63  ;;  %1284 = vmatpush1.bf16.msra.mxu1 %v5302_v58  ;;  %v5338_v63 = vld [vmem:[%s6967_s2 + $0x8c] ss:$16 sps:$4 sm:$0xff]   ;;  %v5343_v58 = vld [vmem:[%s6967_s2 + $0x80] ss:$16 sps:$4 sm:$0xff]  }
  0xb0   : > { %1244 = vmatprep.subr.bf16.mxu0 %v5307_v57  ;;  %1285 = vmatprep.subr.bf16.mxu1 %v5314_v56  ;;  %7236 = vst [vmem:[#allocation46_spill] sm:$0xff] %v5338_v63  ;;  %7237 = vst [vmem:[#allocation47_spill] sm:$0xff] %v5343_v58  ;;  %v5350_v56 = vld [vmem:[%s6967_s2 + $0x88] ss:$16 sps:$4 sm:$0xff]   ;;  %v5355_v57 = vld [vmem:[%s6967_s2 + $0xa4] ss:$16 sps:$4 sm:$0xff]  }
  0xb1   : > { %7238 = vst [vmem:[#allocation48_spill] sm:$0xff] %v5350_v56  ;;  %7239 = vst [vmem:[#allocation49_spill] sm:$0xff] %v5355_v57 }
  0xb3   : > { %1245 = vmatpush1.bf16.msra.mxu0 %v5319_v60  ;;  %1286 = vmatpush1.bf16.msra.mxu1 %v5326_v61  ;;  %v5362_v60 = vld [vmem:[%s6967_s2 + $0xac] ss:$16 sps:$4 sm:$0xff]   ;;  %v5367_v61 = vld [vmem:[%s6967_s2 + $0xa0] ss:$16 sps:$4 sm:$0xff]  }
  0xb4   : > { %1246 = vmatprep.subr.bf16.mxu0 %v5333_v0  ;;  %1287 = vmatprep.subr.bf16.mxu1 %v5338_v63  ;;  %7240 = vst [vmem:[#allocation50_spill] sm:$0xff] %v5362_v60  ;;  %7241 = vst [vmem:[#allocation51_spill] sm:$0xff] %v5367_v61  ;;  %v5374_v0 = vld [vmem:[%s6967_s2 + $0xa8] ss:$16 sps:$4 sm:$0xff]   ;;  %v5381_v63 = vld [vmem:[%s6967_s2 + $0xc4] ss:$16 sps:$4 sm:$0xff]  }
  0xb5   : > { %7242 = vst [vmem:[#allocation52_spill] sm:$0xff] %v5374_v0  ;;  %7243 = vst [vmem:[#allocation53_spill] sm:$0xff] %v5381_v63 }
  0xb7   : > { %1247 = vmatpush1.bf16.msra.mxu0 %v5343_v58  ;;  %1288 = vmatpush1.bf16.msra.mxu1 %v5350_v56  ;;  %v5386_v58 = vld [vmem:[%s6967_s2 + $0xcc] ss:$16 sps:$4 sm:$0xff]   ;;  %v5403_v56 = vld [vmem:[%s6967_s2 + $0xe4] ss:$16 sps:$4 sm:$0xff]  }
  0xb8   : > { %1248 = vmatprep.subr.bf16.mxu0 %v5355_v57  ;;  %1289 = vmatprep.subr.bf16.mxu1 %v5362_v60  ;;  %7244 = vst [vmem:[#allocation54_spill] sm:$0xff] %v5386_v58  ;;  %v5393_v57 = vld [vmem:[%s6967_s2 + $0xc0] ss:$16 sps:$4 sm:$0xff]   ;;  %v5398_v60 = vld [vmem:[%s6967_s2 + $0xc8] ss:$16 sps:$4 sm:$0xff]   ;;  %7247 = vst [vmem:[#allocation57_spill] sm:$0xff] %v5403_v56 }
  0xb9   : > { %7245 = vst [vmem:[#allocation55_spill] sm:$0xff] %v5393_v57  ;;  %7246 = vst [vmem:[#allocation56_spill] sm:$0xff] %v5398_v60 }
  0xbb   : > { %1249 = vmatpush1.bf16.msra.mxu0 %v5367_v61  ;;  %1290 = vmatpush1.bf16.msra.mxu1 %v5374_v0  ;;  %v5410_v0 = vld [vmem:[%s6967_s2 + $0xec] ss:$16 sps:$4 sm:$0xff]   ;;  %v5415_v61 = vld [vmem:[%s6967_s2 + $0xe0] ss:$16 sps:$4 sm:$0xff]  }
  0xbc   : > { %1250 = vmatprep.subr.bf16.mxu0 %v5381_v63  ;;  %1291 = vmatprep.subr.bf16.mxu1 %v5386_v58  ;;  %7248 = vst [vmem:[#allocation58_spill] sm:$0xff] %v5410_v0  ;;  %7249 = vst [vmem:[#allocation59_spill] sm:$0xff] %v5415_v61  ;;  %v5422_v63 = vld [vmem:[%s6967_s2 + $0xe8] ss:$16 sps:$4 sm:$0xff]   ;;  %v5426_v58 = vld [vmem:[#allocation12 + $0x4] ss:$16 sps:$4 sm:$0xff]  }
  0xbd   : > { %7250 = vst [vmem:[#allocation60_spill] sm:$0xff] %v5422_v63  ;;  %7251 = vst [vmem:[#allocation61_spill] sm:$0xff] %v5426_v58 }
  0xbf   : > { %1251 = vmatpush1.bf16.msra.mxu0 %v5393_v57  ;;  %1292 = vmatpush1.bf16.msra.mxu1 %v5398_v60  ;;  %v5432_v57 = vld [vmem:[#allocation12] ss:$16 sps:$4 sm:$0xff]   ;;  %v5434_v60 = vld [vmem:[#allocation12 + $0x8] ss:$16 sps:$4 sm:$0xff]  }
  0xc0   : > { %1252 = vmatprep.subr.bf16.mxu0 %v5403_v56  ;;  %1293 = vmatprep.subr.bf16.mxu1 %v5410_v0  ;;  %7253 = vst [vmem:[#allocation63_spill] sm:$0xff] %v5432_v57  ;;  %7254 = vst [vmem:[#allocation64_spill] sm:$0xff] %v5434_v60  ;;  %v5440_v56 = vld [vmem:[#allocation12 + $0x2c] ss:$16 sps:$4 sm:$0xff]   ;;  %v5444_v0 = vld [vmem:[#allocation12 + $0x20] ss:$16 sps:$4 sm:$0xff]  }
  0xc1   : > { %7256 = vst [vmem:[#allocation66_spill] sm:$0xff] %v5440_v56  ;;  %7257 = vst [vmem:[#allocation67_spill] sm:$0xff] %v5444_v0 }
  0xc3   : > { %1253 = vmatpush1.bf16.msra.mxu0 %v5415_v61  ;;  %1294 = vmatpush1.bf16.msra.mxu1 %v5422_v63  ;;  %v5448_v63 = vld [vmem:[#allocation12 + $0x28] ss:$16 sps:$4 sm:$0xff]   ;;  %v5480_v61 = vld [vmem:[#allocation12 + $0x8c] ss:$16 sps:$4 sm:$0xff]  }
  0xc4   : > { %1505 = vmatprep.subr.bf16.mxu0 %v5426_v58  ;;  %1546 = vmatprep.subr.bf16.mxu1 %v5428_v59  ;;  %7258 = vst [vmem:[#allocation68_spill] sm:$0xff] %v5448_v63  ;;  %v5452_v58 = vld [vmem:[#allocation12 + $0x44] ss:$16 sps:$4 sm:$0xff]   ;;  %v5454_v59 = vld [vmem:[#allocation12 + $0x4c] ss:$16 sps:$4 sm:$0xff]   ;;  %7268 = vst [vmem:[#allocation78_spill] sm:$0xff] %v5480_v61 }
  0xc5   : > { %7259 = vst [vmem:[#allocation69_spill] sm:$0xff] %v5452_v58  ;;  %7260 = vst [vmem:[#allocation70_spill] sm:$0xff] %v5454_v59 }
  0xc6   : > { %1271 = vmatmul.mubr.bf16.vlgmr.msra.gmra.mrb[8].mxu0 %v5126_v37  ;;  %1312 = vmatmul.mubr.bf16.vlgmr.msra.gmra.mrb[8].mxu1 %v5126_v37  ;;  %v5460_v37 = vld [vmem:[#allocation12 + $0x40] ss:$16 sps:$4 sm:$0xff]  }
  0xc7   : > { %1506 = vmatpush1.bf16.msra.mxu0 %v5432_v57  ;;  %1547 = vmatpush1.bf16.msra.mxu1 %v5434_v60  ;;  %7261 = vst [vmem:[#allocation71_spill] sm:$0xff] %v5460_v37  ;;  %v5462_v60 = vld [vmem:[#allocation12 + $0x48] ss:$16 sps:$4 sm:$0xff]   ;;  %v5464_v57 = vld [vmem:[#allocation12 + $0x64] ss:$16 sps:$4 sm:$0xff]  }
  0xc8   : > { %1507 = vmatprep.subr.bf16.mxu0 %v5436_v55  ;;  %1548 = vmatprep.subr.bf16.mxu1 %v5440_v56  ;;  %7262 = vst [vmem:[#allocation72_spill] sm:$0xff] %v5462_v60  ;;  %7263 = vst [vmem:[#allocation73_spill] sm:$0xff] %v5464_v57  ;;  %v5468_v56 = vld [vmem:[#allocation12 + $0x6c] ss:$16 sps:$4 sm:$0xff]   ;;  %v5472_v55 = vld [vmem:[#allocation12 + $0x60] ss:$16 sps:$4 sm:$0xff]  }
  0xc9   : > { %1537 = vmatprep.mubr.bf16.mxu0 %v7228_v3  ;;  %1578 = vmatprep.mubr.bf16.mxu1 %v7228_v3  ;;  %7264 = vst [vmem:[#allocation74_spill] sm:$0xff] %v5468_v56  ;;  %7265 = vst [vmem:[#allocation75_spill] sm:$0xff] %v5472_v55 }
  0xcb   : > { %1508 = vmatpush1.bf16.msra.mxu0 %v5444_v0  ;;  %1549 = vmatpush1.bf16.msra.mxu1 %v5448_v63  ;;  %v5474_v0 = vld [vmem:[#allocation12 + $0x68] ss:$16 sps:$4 sm:$0xff]   ;;  %v5478_v63 = vld [vmem:[#allocation12 + $0x84] ss:$16 sps:$4 sm:$0xff]  }
  0xcc   : > { %1509 = vmatprep.subr.bf16.mxu0 %v5452_v58  ;;  %1550 = vmatprep.subr.bf16.mxu1 %v5454_v59  ;;  %7266 = vst [vmem:[#allocation76_spill] sm:$0xff] %v5474_v0  ;;  %7267 = vst [vmem:[#allocation77_spill] sm:$0xff] %v5478_v63  ;;  %v5484_v59 = vld [vmem:[#allocation12 + $0x80] ss:$16 sps:$4 sm:$0xff]  }
  0xcd   : > { %7269 = vst [vmem:[#allocation79_spill] sm:$0xff] %v5484_v59 }
  0xcf   : > { %1510 = vmatpush1.bf16.msra.mxu0 %v5460_v37  ;;  %1551 = vmatpush1.bf16.msra.mxu1 %v5462_v60  ;;  %v5486_v37 = vld [vmem:[#allocation12 + $0x88] ss:$16 sps:$4 sm:$0xff]   ;;  %v5490_v60 = vld [vmem:[#allocation12 + $0xa4] ss:$16 sps:$4 sm:$0xff]  }
  0xd0   : > { %1511 = vmatprep.subr.bf16.mxu0 %v5464_v57  ;;  %1552 = vmatprep.subr.bf16.mxu1 %v5468_v56  ;;  %7270 = vst [vmem:[#allocation80_spill] sm:$0xff] %v5486_v37  ;;  %7271 = vst [vmem:[#allocation81_spill] sm:$0xff] %v5490_v60  ;;  %v5492_v57 = vld [vmem:[#allocation12 + $0xac] ss:$16 sps:$4 sm:$0xff]   ;;  %v5496_v56 = vld [vmem:[#allocation12 + $0xa0] ss:$16 sps:$4 sm:$0xff]  }
  0xd1   : > { %7272 = vst [vmem:[#allocation82_spill] sm:$0xff] %v5492_v57  ;;  %7273 = vst [vmem:[#allocation83_spill] sm:$0xff] %v5496_v56 }
  0xd3   : > { %1512 = vmatpush1.bf16.msra.mxu0 %v5472_v55  ;;  %1553 = vmatpush1.bf16.msra.mxu1 %v5474_v0  ;;  %v5498_v55 = vld [vmem:[#allocation12 + $0xa8] ss:$16 sps:$4 sm:$0xff]   ;;  %v5502_v0 = vld [vmem:[#allocation12 + $0xc4] ss:$16 sps:$4 sm:$0xff]  }
  0xd4   : > { %1513 = vmatprep.subr.bf16.mxu0 %v5478_v63  ;;  %1554 = vmatprep.subr.bf16.mxu1 %v5480_v61  ;;  %7274 = vst [vmem:[#allocation84_spill] sm:$0xff] %v5498_v55  ;;  %7275 = vst [vmem:[#allocation85_spill] sm:$0xff] %v5502_v0  ;;  %v5504_v63 = vld [vmem:[#allocation12 + $0xcc] ss:$16 sps:$4 sm:$0xff]   ;;  %v5508_v61 = vld [vmem:[#allocation12 + $0xc0] ss:$16 sps:$4 sm:$0xff]  }
  0xd5   : > { %7276 = vst [vmem:[#allocation86_spill] sm:$0xff] %v5504_v63  ;;  %7277 = vst [vmem:[#allocation87_spill] sm:$0xff] %v5508_v61 }
  0xd7   : > { %1514 = vmatpush1.bf16.msra.mxu0 %v5484_v59  ;;  %1555 = vmatpush1.bf16.msra.mxu1 %v5486_v37  ;;  %v5510_v59 = vld [vmem:[#allocation12 + $0xc8] ss:$16 sps:$4 sm:$0xff]   ;;  %v5514_v37 = vld [vmem:[#allocation12 + $0xe4] ss:$16 sps:$4 sm:$0xff]  }
  0xd8   : > { %1515 = vmatprep.subr.bf16.mxu0 %v5490_v60  ;;  %1556 = vmatprep.subr.bf16.mxu1 %v5492_v57  ;;  %7278 = vst [vmem:[#allocation88_spill] sm:$0xff] %v5510_v59  ;;  %7279 = vst [vmem:[#allocation89_spill] sm:$0xff] %v5514_v37  ;;  %v5516_v60 = vld [vmem:[#allocation12 + $0xec] ss:$16 sps:$4 sm:$0xff]   ;;  %v5520_v57 = vld [vmem:[#allocation12 + $0xe0] ss:$16 sps:$4 sm:$0xff]  }
  0xd9   : > { %7280 = vst [vmem:[#allocation90_spill] sm:$0xff] %v5516_v60 }
  0xdb   : > { %1516 = vmatpush1.bf16.msra.mxu0 %v5496_v56  ;;  %1557 = vmatpush1.bf16.msra.mxu1 %v5498_v55  ;;  %v5522_v56 = vld [vmem:[#allocation12 + $0xe8] ss:$16 sps:$4 sm:$0xff]   ;;  %v5524_v55 = vld [vmem:[#allocation6] sm:$0xff] }
  0xdc   : > { %1517 = vmatprep.subr.bf16.mxu0 %v5502_v0  ;;  %1558 = vmatprep.subr.bf16.mxu1 %v5504_v63  ;;  %7281 = vst [vmem:[#allocation91_spill] sm:$0xff] %v5522_v56  ;;  %7282 = vst [vmem:[#allocation92_spill] sm:$0xff] %v5524_v55  ;;  %v5528_v0 = vld [vmem:[#allocation10 + $0x4] ss:$16 sps:$4 sm:$0xff]   ;;  %v5530_v63 = vld [vmem:[#allocation10 + $0xc] ss:$16 sps:$4 sm:$0xff]   ;;  %v585_v58 = vpack.c.bf16 %v5524_v55, %v5524_v55 }
  0xdd   : > { %7283 = vst [vmem:[#allocation93_spill] sm:$0xff] %v5528_v0  ;;  %7284 = vst [vmem:[#allocation94_spill] sm:$0xff] %v5530_v63  ;;  %v5548_v55 = vld [vmem:[#allocation10 + $0x20] ss:$16 sps:$4 sm:$0xff]  }
  0xde   : > { %7289 = vst [vmem:[#allocation99_spill] sm:$0xff] %v5548_v55 }
  0xdf   : > { %1518 = vmatpush1.bf16.msra.mxu0 %v5508_v61  ;;  %1559 = vmatpush1.bf16.msra.mxu1 %v5510_v59  ;;  %v5536_v59 = vld [vmem:[#allocation10] ss:$16 sps:$4 sm:$0xff]   ;;  %v5538_v61 = vld [vmem:[#allocation10 + $0x8] ss:$16 sps:$4 sm:$0xff]  }
  0xe0   : > { %1519 = vmatprep.subr.bf16.mxu0 %v5514_v37  ;;  %1560 = vmatprep.subr.bf16.mxu1 %v5516_v60  ;;  %7285 = vst [vmem:[#allocation95_spill] sm:$0xff] %v5536_v59  ;;  %7286 = vst [vmem:[#allocation96_spill] sm:$0xff] %v5538_v61  ;;  %v5542_v60 = vld [vmem:[#allocation10 + $0x24] ss:$16 sps:$4 sm:$0xff]   ;;  %v5544_v37 = vld [vmem:[#allocation10 + $0x2c] ss:$16 sps:$4 sm:$0xff]  }
  0xe1   : > { %7287 = vst [vmem:[#allocation97_spill] sm:$0xff] %v5542_v60  ;;  %7288 = vst [vmem:[#allocation98_spill] sm:$0xff] %v5544_v37 }
  0xe3   : > { %1520 = vmatpush1.bf16.msra.mxu0 %v5520_v57  ;;  %1561 = vmatpush1.bf16.msra.mxu1 %v5522_v56  ;;  %v5550_v56 = vld [vmem:[#allocation10 + $0x28] ss:$16 sps:$4 sm:$0xff]  }
  0xe4   : > { %1747 = vmatprep.subr.bf16.mxu0 %v5528_v0  ;;  %1788 = vmatprep.subr.bf16.mxu1 %v5530_v63  ;;  %7290 = vst [vmem:[#allocation100_spill] sm:$0xff] %v5550_v56  ;;  %v5554_v0 = vld [vmem:[#allocation10 + $0x44] ss:$16 sps:$4 sm:$0xff]   ;;  %v5556_v63 = vld [vmem:[#allocation10 + $0x4c] ss:$16 sps:$4 sm:$0xff]  }
  0xe5   : > { %7291 = vst [vmem:[#allocation101_spill] sm:$0xff] %v5554_v0  ;;  %7292 = vst [vmem:[#allocation102_spill] sm:$0xff] %v5556_v63 }
  0xe6   : > { %1538 = vmatmul.mubr.bf16.vlgmr.msra.gmra.mrb[12].mxu0 %v585_v58  ;;  %1579 = vmatmul.mubr.bf16.vlgmr.msra.gmra.mrb[12].mxu1 %v585_v58  ;;  %v5562_v58 = vld [vmem:[#allocation10 + $0x40] ss:$16 sps:$4 sm:$0xff]  }
  0xe7   : > { %1748 = vmatpush1.bf16.msra.mxu0 %v5536_v59  ;;  %1789 = vmatpush1.bf16.msra.mxu1 %v5538_v61  ;;  %7293 = vst [vmem:[#allocation103_spill] sm:$0xff] %v5562_v58  ;;  %v5564_v61 = vld [vmem:[#allocation10 + $0x48] ss:$16 sps:$4 sm:$0xff]   ;;  %v5574_v59 = vld [vmem:[#allocation10 + $0x60] ss:$16 sps:$4 sm:$0xff]  }
  0xe8   : > { %1749 = vmatprep.subr.bf16.mxu0 %v5542_v60  ;;  %1790 = vmatprep.subr.bf16.mxu1 %v5544_v37  ;;  %7294 = vst [vmem:[#allocation104_spill] sm:$0xff] %v5564_v61  ;;  %v5568_v37 = vld [vmem:[#allocation10 + $0x64] ss:$16 sps:$4 sm:$0xff]   ;;  %v5570_v60 = vld [vmem:[#allocation10 + $0x6c] ss:$16 sps:$4 sm:$0xff]   ;;  %7297 = vst [vmem:[#allocation107_spill] sm:$0xff] %v5574_v59 }
  0xe9   : > { %1779 = vmatprep.mubr.bf16.mxu0 %v7228_v3  ;;  %1820 = vmatprep.mubr.bf16.mxu1 %v7228_v3  ;;  %7295 = vst [vmem:[#allocation105_spill] sm:$0xff] %v5568_v37  ;;  %7296 = vst [vmem:[#allocation106_spill] sm:$0xff] %v5570_v60 }
  0xeb   : > { %1750 = vmatpush1.bf16.msra.mxu0 %v5548_v55  ;;  %1791 = vmatpush1.bf16.msra.mxu1 %v5550_v56  ;;  %v5576_v55 = vld [vmem:[#allocation10 + $0x68] ss:$16 sps:$4 sm:$0xff]   ;;  %v5580_v56 = vld [vmem:[#allocation10 + $0x84] ss:$16 sps:$4 sm:$0xff]  }
  0xec   : > { %1751 = vmatprep.subr.bf16.mxu0 %v5554_v0  ;;  %1792 = vmatprep.subr.bf16.mxu1 %v5556_v63  ;;  %7298 = vst [vmem:[#allocation108_spill] sm:$0xff] %v5576_v55  ;;  %7299 = vst [vmem:[#allocation109_spill] sm:$0xff] %v5580_v56  ;;  %v5582_v0 = vld [vmem:[#allocation10 + $0x8c] ss:$16 sps:$4 sm:$0xff]   ;;  %v5586_v63 = vld [vmem:[#allocation10 + $0x80] ss:$16 sps:$4 sm:$0xff]  }
  0xed   : > { %7300 = vst [vmem:[#allocation110_spill] sm:$0xff] %v5582_v0  ;;  %7301 = vst [vmem:[#allocation111_spill] sm:$0xff] %v5586_v63 }
  0xef   : > { %1752 = vmatpush1.bf16.msra.mxu0 %v5562_v58  ;;  %1793 = vmatpush1.bf16.msra.mxu1 %v5564_v61  ;;  %v5588_v58 = vld [vmem:[#allocation10 + $0x88] ss:$16 sps:$4 sm:$0xff]   ;;  %v5592_v61 = vld [vmem:[#allocation10 + $0xa4] ss:$16 sps:$4 sm:$0xff]  }
  0xf0   : > { %1753 = vmatprep.subr.bf16.mxu0 %v5568_v37  ;;  %1794 = vmatprep.subr.bf16.mxu1 %v5570_v60  ;;  %7302 = vst [vmem:[#allocation112_spill] sm:$0xff] %v5588_v58  ;;  %7303 = vst [vmem:[#allocation113_spill] sm:$0xff] %v5592_v61  ;;  %v5594_v37 = vld [vmem:[#allocation10 + $0xac] ss:$16 sps:$4 sm:$0xff]   ;;  %v5598_v60 = vld [vmem:[#allocation10 + $0xa0] ss:$16 sps:$4 sm:$0xff]  }
  0xf1   : > { %7304 = vst [vmem:[#allocation114_spill] sm:$0xff] %v5594_v37  ;;  %7305 = vst [vmem:[#allocation115_spill] sm:$0xff] %v5598_v60 }
  0xf3   : > { %1754 = vmatpush1.bf16.msra.mxu0 %v5574_v59  ;;  %1795 = vmatpush1.bf16.msra.mxu1 %v5576_v55  ;;  %v5600_v59 = vld [vmem:[#allocation10 + $0xa8] ss:$16 sps:$4 sm:$0xff]   ;;  %v5604_v55 = vld [vmem:[#allocation10 + $0xc4] ss:$16 sps:$4 sm:$0xff]  }
  0xf4   : > { %1755 = vmatprep.subr.bf16.mxu0 %v5580_v56  ;;  %1796 = vmatprep.subr.bf16.mxu1 %v5582_v0  ;;  %v5606_v56 = vld [vmem:[#allocation10 + $0xcc] ss:$16 sps:$4 sm:$0xff]   ;;  %v5610_v0 = vld [vmem:[#allocation10 + $0xc0] ss:$16 sps:$4 sm:$0xff]  }
  0xf7   : > { %1756 = vmatpush1.bf16.msra.mxu0 %v5586_v63  ;;  %1797 = vmatpush1.bf16.msra.mxu1 %v5588_v58  ;;  %v5612_v63 = vld [vmem:[#allocation10 + $0xc8] ss:$16 sps:$4 sm:$0xff]   ;;  %v5616_v58 = vld [vmem:[#allocation10 + $0xe4] ss:$16 sps:$4 sm:$0xff]  }
  0xf8   : > { %1757 = vmatprep.subr.bf16.mxu0 %v5592_v61  ;;  %1798 = vmatprep.subr.bf16.mxu1 %v5594_v37  ;;  %v5618_v61 = vld [vmem:[#allocation10 + $0xec] ss:$16 sps:$4 sm:$0xff]   ;;  %v5622_v37 = vld [vmem:[#allocation10 + $0xe0] ss:$16 sps:$4 sm:$0xff]  }
  0xfb   : > { %1758 = vmatpush1.bf16.msra.mxu0 %v5598_v60  ;;  %1799 = vmatpush1.bf16.msra.mxu1 %v5600_v59  ;;  %v5624_v60 = vld [vmem:[#allocation10 + $0xe8] ss:$16 sps:$4 sm:$0xff]  }
  0xfc   : > { %1759 = vmatprep.subr.bf16.mxu0 %v5604_v55  ;;  %1800 = vmatprep.subr.bf16.mxu1 %v5606_v56 }
  0xff   : > { %1760 = vmatpush1.bf16.msra.mxu0 %v5610_v0  ;;  %1801 = vmatpush1.bf16.msra.mxu1 %v5612_v63 }
 0x100   : > { %1761 = vmatprep.subr.bf16.mxu0 %v5616_v58  ;;  %1802 = vmatprep.subr.bf16.mxu1 %v5618_v61 }
 0x103   : > { %1762 = vmatpush1.bf16.msra.mxu0 %v5622_v37  ;;  %1803 = vmatpush1.bf16.msra.mxu1 %v5624_v60 }
 0x104   : > { %1959 = vmatprep.subr.bf16.mxu0 %v4929_v1  ;;  %2000 = vmatprep.subr.bf16.mxu1 %v4934_v2  ;;  %v586_v1 = vld [vmem:[%s4922_s16] sm:$0xff]  ;;  %v587_v2 = vld [vmem:[%s4922_s16 + $0x8] sm:$0xff] }
 0x106   : > { %1780 = vmatmul.mubr.bf16.vlgmr.msra.gmra.mrb[16].mxu0 %v5238_v62  ;;  %1821 = vmatmul.mubr.bf16.vlgmr.msra.gmra.mrb[16].mxu1 %v5238_v62 }
 0x107   : > { %1960 = vmatpush1.bf16.msra.mxu0 %v4942_v4  ;;  %2001 = vmatpush1.bf16.msra.mxu1 %v4947_v5 }
 0x108   : > { %1961 = vmatprep.subr.bf16.mxu0 %v4953_v6  ;;  %2002 = vmatprep.subr.bf16.mxu1 %v4960_v7 }
 0x109   : > { %1991 = vmatprep.mubr.bf16.mxu0 %v7228_v3  ;;  %2032 = vmatprep.mubr.bf16.mxu1 %v7228_v3 }
 0x10b   : > { %1962 = vmatpush1.bf16.msra.mxu0 %v4965_v8  ;;  %2003 = vmatpush1.bf16.msra.mxu1 %v4971_v9 }
 0x10c   : > { %1963 = vmatprep.subr.bf16.mxu0 %v4977_v10  ;;  %2004 = vmatprep.subr.bf16.mxu1 %v4982_v11 }
 0x10f   : > { %1964 = vmatpush1.bf16.msra.mxu0 %v4987_v12  ;;  %2005 = vmatpush1.bf16.msra.mxu1 %v4992_v13 }
 0x110   : > { %1965 = vmatprep.subr.bf16.mxu0 %v4999_v14  ;;  %2006 = vmatprep.subr.bf16.mxu1 %v5006_v15 }
 0x113   : > { %1966 = vmatpush1.bf16.msra.mxu0 %v5011_v16  ;;  %2007 = vmatpush1.bf16.msra.mxu1 %v5018_v17  ;;  %v589_v16 = vld [vmem:[%s4922_s16 + $0x18] sm:$0xff] }
 0x114   : > { %1967 = vmatprep.subr.bf16.mxu0 %v5023_v18  ;;  %2008 = vmatprep.subr.bf16.mxu1 %v5030_v19  ;;  %v588_v18 = vld [vmem:[%s4922_s16 + $0x10] sm:$0xff] }
 0x117   : > { %1968 = vmatpush1.bf16.msra.mxu0 %v5035_v20  ;;  %2009 = vmatpush1.bf16.msra.mxu1 %v5040_v21 }
 0x118   : > { %1969 = vmatprep.subr.bf16.mxu0 %v5047_v22  ;;  %2010 = vmatprep.subr.bf16.mxu1 %v5054_v23 }
 0x11b   : > { %1970 = vmatpush1.bf16.msra.mxu0 %v5061_v24  ;;  %2011 = vmatpush1.bf16.msra.mxu1 %v5066_v25 }
 0x11c   : > { %1971 = vmatprep.subr.bf16.mxu0 %v5073_v26  ;;  %2012 = vmatprep.subr.bf16.mxu1 %v5078_v27  ;;  %v568_v27 = vld [vmem:[#allocation3] sm:$0xff] }
 0x11f   : > { %1972 = vmatpush1.bf16.msra.mxu0 %v5083_v28  ;;  %2013 = vmatpush1.bf16.msra.mxu1 %v5088_v29 }
 0x120   : > { %1973 = vmatprep.subr.bf16.mxu0 %v5095_v30  ;;  %2014 = vmatprep.subr.bf16.mxu1 %v5102_v31  ;;  %v1927_v30 = vstv %s1926_s11  ;;  %s6706_s11 = sadd.s32 2, %s4915_s20 }
 0x121   : > { %vm5673_vm0 = vcmp.eq.s32.totalorder %v1927_v30, 1  ;;  %p2469_p10 = scmp.lt.s32.totalorder %s6706_s11, 8  ;;  %p2470_p11 = scmp.ge.s32.totalorder %s6706_s11, 1 }
 0x122   : > { %p2471_p12 = scmp.le.s32.totalorder %s6706_s11, 8  ;;  %p2474_p0 = scmp.ge.s32.totalorder %s6706_s11, 2 }
 0x123   : > { %1974 = vmatpush1.bf16.msra.mxu0 %v5107_v32  ;;  %2015 = vmatpush1.bf16.msra.mxu1 %v5112_v33  ;;  %s2980_s18 = scalar_select %p2469_p10, 1, 0 }
 0x124   : > { %2045 = vmatprep.subr.bf16.mxu0 %v5120_v35  ;;  %2086 = vmatprep.subr.bf16.mxu1 %v5122_v36  ;;  %v7317_v35 = vld [vmem:[#allocation24_spill] sm:$0xff]  ;;  %p2472_p13 = pnand %p2471_p12, %p2470_p11  ;;  %p2475_p1 = scmp.le.s32.totalorder %s6706_s11, 9 }
 0x125   : > { %p3941_p10 = scmp.ne.s32.totalorder %s4803_s14, 2 }
 0x126   : > { %s3924_s21 = scalar_select %p2472_p13, 0, 1 }
 0x127   : > { %p6821_p5 = pnand %p2475_p1, %p2474_p0  ;;  %vm4741_vm12 = vmmov (!%p3941_p10), 0  }
 0x129   : > { %s3925_s24 = scalar_select %p6821_p5, 0, 1 }
 0x159   : > { %v784_v4 = vpop.f32.mrb[0].mxu0  ;;  %v825_v5 = vpop.f32.mrb[0].mxu1 }
 0x15a   : > { %v832_v6 = vadd.f32 %v784_v4, %v586_v1  ;;  %v786_v7 = vpop.f32.mrb[1].mxu0  ;;  %v827_v8 = vpop.f32.mrb[1].mxu1  ;;  %v834_v20 = vadd.f32 %v825_v5, %v588_v18 }
 0x15b   : > { %v833_v9 = vadd.f32 %v786_v7, %v587_v2  ;;  %v788_v10 = vpop.f32.mrb[2].mxu0  ;;  %v829_v11 = vpop.f32.mrb[2].mxu1  ;;  %v835_v17 = vadd.f32 %v827_v8, %v589_v16 }
 0x15c   : > { %v3885_v12 = vmul.f32 -1.442695, %v832_v6  ;;  %v789_v13 = vpop.f32.mrb[3].mxu0  ;;  %v830_v14 = vpop.f32.mrb[3].mxu1 }
 0x15d   : > { %v3886_v15 = vmul.f32 -1.442695, %v833_v9  ;;  %v3887_v19 = vmul.f32 -1.442695, %v835_v17 }
 0x15e   : > { %4269 = vpow2.f32 %v3885_v12 }
 0x15f   : > { %4271 = vpow2.f32 %v3886_v15  ;;  %v1321_v15 = vlaneseq }
 0x160   : > { %4273 = vpow2.f32 %v3887_v19 }
 0x161   : > { %4275 = vtanh.f32 %v834_v20 }
 0x168   : > { %v4270_v21 = vpop.eup %4269 }
 0x169   : > { %v4272_v22 = vpop.eup %4271  ;;  %v1857_v23 = vadd.f32 1.0, %v4270_v21  ;;  %v7308_v21 = vld [vmem:[#allocation15_spill] sm:$0xff] }
 0x16a   : > { %v1863_v24 = vadd.f32 1.0, %v4272_v22  ;;  %v4274_v25 = vpop.eup %4273  ;;  %v7310_v22 = vld [vmem:[#allocation17_spill] sm:$0xff] }
 0x16b   : > { %4277 = vrcp.f32 %v1857_v23  ;;  %v4276_v26 = vpop.eup %4275  ;;  %v1870_v29 = vadd.f32 1.0, %v4274_v25 }
 0x16c   : > { %4279 = vrcp.f32 %v1863_v24 }
 0x16d   : > { %4281 = vrcp.f32 %v1870_v29  ;;  %v7314_v29 = vld [vmem:[#allocation21_spill] sm:$0xff] }
 0x175   : > { %v4278_v28 = vpop.eup %4277 }
 0x176   : > { %v4280_v31 = vpop.eup %4279  ;;  %v1874_v32 = vmul.f32 %v4278_v28, %v4276_v26  ;;  %v7313_v28 = vld [vmem:[#allocation20_spill] sm:$0xff] }
 0x177   : > { %v1873_v33 = vmul.f32 %v4280_v31, %v568_v27  ;;  %v4282_v10 = vpop.eup %4281 }
 0x179   : > { %v1875_v36 = vadd.f32 %v1874_v32, %v1873_v33  ;;  %v1030_v62 = vpop.f32.mrb[4].mxu0  ;;  %v1071_v1 = vpop.f32.mrb[4].mxu1  ;;  %v7315_v32 = vld [vmem:[#allocation22_spill] sm:$0xff]  ;;  %v7316_v33 = vld [vmem:[#allocation23_spill] sm:$0xff] }
 0x17a   : > { %v1032_v2 = vpop.f32.mrb[5].mxu0  ;;  %v1073_v4 = vpop.f32.mrb[5].mxu1 }
 0x17b   : > { %4283 = vtanh.f32 %v1875_v36  ;;  %v1034_v5 = vpop.f32.mrb[6].mxu0  ;;  %v1075_v6 = vpop.f32.mrb[6].mxu1  ;;  %v5679_v7 = vsel %vm5673_vm0, %v1875_v36, %v568_v27  ;;  %v7311_v27 = vld [vmem:[#allocation18_spill] sm:$0xff]  ;;  %v7318_v36 = vld [vmem:[#allocation25_spill] sm:$0xff] }
 0x17c   : > { %v1035_v8 = vpop.f32.mrb[7].mxu0  ;;  %v1076_v9 = vpop.f32.mrb[7].mxu1  ;;  %v7321_v5 = vld [vmem:[#allocation29_spill] sm:$0xff]  ;;  %v7322_v6 = vld [vmem:[#allocation30_spill] sm:$0xff] }
 0x185   : > { %v4284_v11 = vpop.eup %4283 }
 0x186   : > { %v1877_v12 = vmul.f32 %v4284_v11, %v4282_v10 }
 0x188   : > { %v5684_v13 = vsel %vm5673_vm0, %v1877_v12, %v5116_v34  ;;  %v5698_v34 = vshrl.u32 %v1321_v15, 7 }
 0x189   : > { %v5688_v14 = vpack.c.bf16 %v5684_v13, %v5684_v13 }
 0x18a   : > { %v1331_v26 = vsub.s32 2, %v5698_v34 }
 0x18b   : > { %1992 = vmatmul.mubr.bf16.vlgmr.msra.gmra.mrb[20].mxu0 %v5688_v14  ;;  %2033 = vmatmul.mubr.bf16.vlgmr.msra.gmra.mrb[20].mxu1 %v5688_v14 }
 0x18c   : > { %2046 = vmatpush1.bf16.msra.mxu0 %v5128_v38  ;;  %2087 = vmatpush1.bf16.msra.mxu1 %v5130_v39  ;;  %v1323_v38 = vsub.s32 0, %v5698_v34  ;;  %v565_v39 = vld [vmem:[%s6969_s4] sm:$0xf] }
 0x18d   : > { %2047 = vmatprep.subr.bf16.mxu0 %v5134_v40  ;;  %2088 = vmatprep.subr.bf16.mxu1 %v5138_v41  ;;  %v1327_v40 = vsub.s32 1, %v5698_v34  ;;  %v5744_v31 = vrot.slane %v565_v39, %v1331_v26 }
 0x18e   : > { %2077 = vmatprep.mubr.bf16.mxu0 %v7228_v3  ;;  %2118 = vmatprep.mubr.bf16.mxu1 %v7228_v3  ;;  %v5715_v41 = vrot.slane %v565_v39, %v1323_v38 }
 0x190   : > { %2048 = vmatpush1.bf16.msra.mxu0 %v5142_v42  ;;  %2089 = vmatpush1.bf16.msra.mxu1 %v5146_v43 }
 0x191   : > { %2049 = vmatprep.subr.bf16.mxu0 %v5150_v44  ;;  %2090 = vmatprep.subr.bf16.mxu1 %v5152_v45  ;;  %v5721_v44 = vrot.slane %v565_v39, %v1327_v40 }
 0x194   : > { %2050 = vmatpush1.bf16.msra.mxu0 %v5156_v46  ;;  %2091 = vmatpush1.bf16.msra.mxu1 %v5158_v47 }
 0x195   : > { %2051 = vmatprep.subr.bf16.mxu0 %v5162_v48  ;;  %2092 = vmatprep.subr.bf16.mxu1 %v5166_v49 }
 0x198   : > { %2052 = vmatpush1.bf16.msra.mxu0 %v5168_v50  ;;  %2093 = vmatpush1.bf16.msra.mxu1 %v5172_v51  ;;  %v1335_v50 = vsub.s32 3, %v5698_v34 }
 0x199   : > { %v1272_v42 = vpop.f32.mrb[8].mxu0  ;;  %v1313_v43 = vpop.f32.mrb[8].mxu1  ;;  %2053 = vmatprep.subr.bf16.mxu0 %v5176_v52  ;;  %2094 = vmatprep.subr.bf16.mxu1 %v5178_v53  ;;  %v7309_v53 = vld [vmem:[#allocation16_spill] sm:$0xff] }
 0x19a   : > { %v1273_v45 = vadd.f32 %v1272_v42, %v1030_v62  ;;  %v1314_v46 = vadd.f32 %v1313_v43, %v1071_v1  ;;  %v1274_v47 = vpop.f32.mrb[9].mxu0  ;;  %v1315_v48 = vpop.f32.mrb[9].mxu1  ;;  %v5734_v25 = vrot.slane %v565_v39, %v1335_v50  ;;  %v570_v39 = vld [vmem:[#allocation5] sm:$0xff]  ;;  %v1932_v43 = vstv %s3894_s23 }
 0x19b   : > { %v1275_v49 = vadd.f32 %v1274_v47, %v1032_v2  ;;  %v1316_v16 = vadd.f32 %v1315_v48, %v1073_v4  ;;  %v1276_v17 = vpop.f32.mrb[10].mxu0  ;;  %v1317_v51 = vpop.f32.mrb[10].mxu1  ;;  %v7319_v2 = vld [vmem:[#allocation26_spill] sm:$0xff]  ;;  %v7320_v4 = vld [vmem:[#allocation27_spill] sm:$0xff]  ;;  %vm1933_vm1 = vcmp.eq.s32.totalorder %v1932_v43, 1  ;;  %v7337_v43 = vld [vmem:[#allocation44_spill] sm:$0xff] }
 0x19c   : > { %v1341_v18 = vadd.f32 %v5715_v41, %v1273_v45  ;;  %v1277_v19 = vpop.f32.mrb[11].mxu0  ;;  %v1318_v20 = vpop.f32.mrb[11].mxu1  ;;  %2054 = vmatpush1.bf16.msra.mxu0 %v5180_v54  ;;  %2095 = vmatpush1.bf16.msra.mxu1 %v7308_v21  ;;  %v7312_v54 = vld [vmem:[#allocation19_spill] sm:$0xff]  ;;  %v1343_v1 = vadd.f32 %v5744_v31, %v1314_v46 }
 0x19d   : > { %v1342_v52 = vadd.f32 %v5721_v44, %v1275_v49  ;;  %2055 = vmatprep.subr.bf16.mxu0 %v7309_v53  ;;  %2096 = vmatprep.subr.bf16.mxu1 %v7310_v22  ;;  %v1344_v30 = vadd.f32 %v5734_v25, %v1316_v16 }
 0x19e   : > { %v3888_v23 = vmul.f32 -1.442695, %v1341_v18 }
 0x19f   : > { %v3889_v24 = vmul.f32 -1.442695, %v1342_v52  ;;  %v3890_v62 = vmul.f32 -1.442695, %v1344_v30  ;;  %v7325_v30 = vld [vmem:[#allocation32_spill] sm:$0xff] }
 0x1a0   : > { %4285 = vpow2.f32 %v3888_v23  ;;  %2056 = vmatpush1.bf16.msra.mxu0 %v7311_v27  ;;  %2097 = vmatpush1.bf16.msra.mxu1 %v7312_v54  ;;  %v7323_v27 = vld [vmem:[#allocation28_spill] sm:$0xff] }
 0x1a1   : > { %4287 = vpow2.f32 %v3889_v24  ;;  %2057 = vmatprep.subr.bf16.mxu0 %v7313_v28  ;;  %2098 = vmatprep.subr.bf16.mxu1 %v7314_v29  ;;  %v7324_v29 = vld [vmem:[#allocation31_spill] sm:$0xff] }
 0x1a2   : > { %4289 = vpow2.f32 %v3890_v62  ;;  %v7330_v62 = vld [vmem:[#allocation37_spill] sm:$0xff] }
 0x1a3   : > { %4291 = vtanh.f32 %v1343_v1  ;;  %v7331_v1 = vld [vmem:[#allocation38_spill] sm:$0xff] }
 0x1a4   : > { %2058 = vmatpush1.bf16.msra.mxu0 %v7315_v32  ;;  %2099 = vmatpush1.bf16.msra.mxu1 %v7316_v33  ;;  %v7326_v32 = vld [vmem:[#allocation33_spill] sm:$0xff]  ;;  %v7327_v33 = vld [vmem:[#allocation34_spill] sm:$0xff] }
 0x1a5   : > { %2059 = vmatprep.subr.bf16.mxu0 %v7317_v35  ;;  %2100 = vmatprep.subr.bf16.mxu1 %v7318_v36  ;;  %v7328_v35 = vld [vmem:[#allocation35_spill] sm:$0xff]  ;;  %v7329_v36 = vld [vmem:[#allocation36_spill] sm:$0xff] }
 0x1a8   : > { %2060 = vmatpush1.bf16.msra.mxu0 %v7319_v2  ;;  %2101 = vmatpush1.bf16.msra.mxu1 %v7320_v4  ;;  %v566_v2 = vld [vmem:[%s6972_s7] sm:$0xf]  ;;  %v7332_v4 = vld [vmem:[#allocation39_spill] sm:$0xff] }
 0x1a9   : > { %2127 = vmatprep.subr.bf16.mxu0 %v7321_v5  ;;  %2168 = vmatprep.subr.bf16.mxu1 %v7322_v6  ;;  %v7333_v5 = vld [vmem:[#allocation40_spill] sm:$0xff]  ;;  %v7334_v6 = vld [vmem:[#allocation41_spill] sm:$0xff] }
 0x1aa   : > { %v4286_v8 = vpop.eup %4285 }
 0x1ab   : > { %v4288_v9 = vpop.eup %4287  ;;  %v1881_v10 = vadd.f32 1.0, %v4286_v8  ;;  %v7335_v8 = vld [vmem:[#allocation42_spill] sm:$0xff] }
 0x1ac   : > { %v1887_v11 = vadd.f32 1.0, %v4288_v9  ;;  %v4290_v12 = vpop.eup %4289  ;;  %v5787_v9 = vrot.slane %v566_v2, %v1323_v38  ;;  %v7339_v38 = vld [vmem:[#allocation46_spill] sm:$0xff] }
 0x1ad   : > { %4293 = vrcp.f32 %v1881_v10  ;;  %v4292_v15 = vpop.eup %4291  ;;  %v1894_v47 = vadd.f32 1.0, %v4290_v12  ;;  %v5791_v12 = vrot.slane %v566_v2, %v1327_v40 }
 0x1ae   : > { %4295 = vrcp.f32 %v1887_v11 }
 0x1af   : > { %4297 = vrcp.f32 %v1894_v47 }
 0x1b7   : > { %v4294_v42 = vpop.eup %4293 }
 0x1b8   : > { %v4296_v45 = vpop.eup %4295  ;;  %v1898_v46 = vmul.f32 %v4294_v42, %v4292_v15  ;;  %v7336_v42 = vld [vmem:[#allocation43_spill] sm:$0xff] }
 0x1b9   : > { %v1539_v48 = vpop.f32.mrb[12].mxu0  ;;  %v1580_v49 = vpop.f32.mrb[12].mxu1  ;;  %v1897_v16 = vmul.f32 %v4296_v45, %v570_v39 }
 0x1ba   : > { %v1541_v17 = vpop.f32.mrb[13].mxu0  ;;  %v1582_v51 = vpop.f32.mrb[13].mxu1 }
 0x1bb   : > { %v1543_v18 = vpop.f32.mrb[14].mxu0  ;;  %v1584_v19 = vpop.f32.mrb[14].mxu1  ;;  %v1899_v20 = vadd.f32 %v1898_v46, %v1897_v16 }
 0x1bc   : > { %v1544_v21 = vpop.f32.mrb[15].mxu0  ;;  %v1585_v52 = vpop.f32.mrb[15].mxu1  ;;  %v7338_v19 = vld [vmem:[#allocation45_spill] sm:$0xff] }
 0x1bd   : > { %4299 = vtanh.f32 %v1899_v20  ;;  %v5757_v53 = vsel %vm1933_vm1, %v1899_v20, %v570_v39  ;;  %v4298_v22 = vpop.eup %4297 }
 0x1c7   : > { %v4300_v23 = vpop.eup %4299 }
 0x1c8   : > { %v1901_v24 = vmul.f32 %v4300_v23, %v4298_v22  ;;  %v7340_v22 = vld [vmem:[#allocation47_spill] sm:$0xff]  ;;  %v7341_v23 = vld [vmem:[#allocation48_spill] sm:$0xff] }
 0x1ca   : > { %v5760_v54 = vsel %vm1933_vm1, %v1901_v24, %v7323_v27  ;;  %v7344_v27 = vld [vmem:[#allocation50_spill] sm:$0xff] }
 0x1cb   : > { %v5764_v28 = vpack.c.bf16 %v5760_v54, %v5760_v54 }
 0x1cd   : > { %2078 = vmatmul.mubr.bf16.vlgmr.msra.gmra.mrb[24].mxu0 %v5764_v28  ;;  %2119 = vmatmul.mubr.bf16.vlgmr.msra.gmra.mrb[24].mxu1 %v5764_v28 }
 0x1ce   : > { %2128 = vmatpush1.bf16.msra.mxu0 %v7324_v29  ;;  %2169 = vmatpush1.bf16.msra.mxu1 %v7325_v30  ;;  %v7345_v29 = vld [vmem:[#allocation51_spill] sm:$0xff]  ;;  %v7346_v30 = vld [vmem:[#allocation52_spill] sm:$0xff] }
 0x1cf   : > { %2129 = vmatprep.subr.bf16.mxu0 %v7326_v32  ;;  %2170 = vmatprep.subr.bf16.mxu1 %v7327_v33  ;;  %v7347_v33 = vld [vmem:[#allocation53_spill] sm:$0xff] }
 0x1d0   : > { %2159 = vmatprep.mubr.bf16.mxu0 %v7228_v3  ;;  %2200 = vmatprep.mubr.bf16.mxu1 %v7228_v3 }
 0x1d2   : > { %2130 = vmatpush1.bf16.msra.mxu0 %v7328_v35  ;;  %2171 = vmatpush1.bf16.msra.mxu1 %v7329_v36  ;;  %v7348_v35 = vld [vmem:[#allocation54_spill] sm:$0xff]  ;;  %v7350_v36 = vld [vmem:[#allocation55_spill] sm:$0xff] }
 0x1d3   : > { %2131 = vmatprep.subr.bf16.mxu0 %v7330_v62  ;;  %2172 = vmatprep.subr.bf16.mxu1 %v7331_v1  ;;  %v7351_v62 = vld [vmem:[#allocation56_spill] sm:$0xff] }
 0x1d6   : > { %2132 = vmatpush1.bf16.msra.mxu0 %v7332_v4  ;;  %2173 = vmatpush1.bf16.msra.mxu1 %v7333_v5  ;;  %v7352_v4 = vld [vmem:[#allocation57_spill] sm:$0xff]  ;;  %v7353_v5 = vld [vmem:[#allocation58_spill] sm:$0xff] }
 0x1d7   : > { %2133 = vmatprep.subr.bf16.mxu0 %v7334_v6  ;;  %2174 = vmatprep.subr.bf16.mxu1 %v7335_v8 }
 0x1d9   : > { %v1781_v10 = vpop.f32.mrb[16].mxu0  ;;  %v1822_v11 = vpop.f32.mrb[16].mxu1 }
 0x1da   : > { %v1782_v15 = vadd.f32 %v1781_v10, %v1539_v48  ;;  %v1823_v39 = vadd.f32 %v1822_v11, %v1580_v49  ;;  %2134 = vmatpush1.bf16.msra.mxu0 %v7336_v42  ;;  %2175 = vmatpush1.bf16.msra.mxu1 %v7337_v43  ;;  %v1783_v45 = vpop.f32.mrb[17].mxu0  ;;  %v1824_v46 = vpop.f32.mrb[17].mxu1  ;;  %v7354_v10 = vld [vmem:[#allocation59_spill] sm:$0xff]  ;;  %v7355_v11 = vld [vmem:[#allocation60_spill] sm:$0xff] }
 0x1db   : > { %v1784_v47 = vadd.f32 %v1783_v45, %v1541_v17  ;;  %v1825_v16 = vadd.f32 %v1824_v46, %v1582_v51  ;;  %v1785_v18 = vpop.f32.mrb[18].mxu0  ;;  %2135 = vmatprep.subr.bf16.mxu0 %v7338_v19  ;;  %2176 = vmatprep.subr.bf16.mxu1 %v7339_v38  ;;  %v1826_v20 = vpop.f32.mrb[18].mxu1  ;;  %v5803_v17 = vrot.slane %v566_v2, %v1335_v50  ;;  %v7343_v51 = vld [vmem:[#allocation49_spill] sm:$0xff]  ;;  %v7359_v43 = vld [vmem:[#allocation64_spill] sm:$0xff]  ;;  %v7361_v46 = vld [vmem:[#allocation66_spill] sm:$0xff] }
 0x1dc   : > { %v1850_v21 = vadd.f32 %v5787_v9, %v1782_v15  ;;  %v1786_v40 = vpop.f32.mrb[19].mxu0  ;;  %v1827_v52 = vpop.f32.mrb[19].mxu1  ;;  %v5814_v50 = vrot.slane %v566_v2, %v1331_v26  ;;  %v7356_v2 = vld [vmem:[#allocation61_spill] sm:$0xff]  ;;  %v7357_v15 = vld [vmem:[#allocation62_spill] sm:$0xff]  ;;  %v7367_v20 = vld [vmem:[#allocation71_spill] sm:$0xff] }
 0x1dd   : > { %v1851_v48 = vadd.f32 %v5791_v12, %v1784_v47  ;;  %7342 = vst [vmem:[#allocation15_spill] sm:$0xff] %v5803_v17  ;;  %v1853_v32 = vadd.f32 %v5803_v17, %v1825_v16  ;;  %v7360_v45 = vld [vmem:[#allocation65_spill] sm:$0xff]  ;;  %v7363_v47 = vld [vmem:[#allocation67_spill] sm:$0xff]  ;;  %v7366_v18 = vld [vmem:[#allocation70_spill] sm:$0xff] }
 0x1de   : > { %v3891_v49 = vmul.f32 -1.442695, %v1850_v21  ;;  %2136 = vmatpush1.bf16.msra.mxu0 %v7340_v22  ;;  %2177 = vmatpush1.bf16.msra.mxu1 %v7341_v23  ;;  %7349 = vst [vmem:[#allocation16_spill] sm:$0xff] %v5814_v50  ;;  %v1852_v6 = vadd.f32 %v5814_v50, %v1823_v39  ;;  %v7358_v39 = vld [vmem:[#allocation63_spill] sm:$0xff]  ;;  %v7365_v16 = vld [vmem:[#allocation69_spill] sm:$0xff]  ;;  %v7368_v21 = vld [vmem:[#allocation72_spill] sm:$0xff]  ;;  %v1937_v22 = vstv %s3895_s27 }
 0x1df   : > { %v3892_v24 = vmul.f32 -1.442695, %v1851_v48  ;;  %2137 = vmatprep.subr.bf16.mxu0 %v7343_v51  ;;  %2178 = vmatprep.subr.bf16.mxu1 %v7344_v27  ;;  %v3893_v1 = vmul.f32 -1.442695, %v1853_v32  ;;  %v572_v40 = vld [vmem:[#allocation7] sm:$0xff]  ;;  %v7369_v48 = vld [vmem:[#allocation73_spill] sm:$0xff] }
 0x1e0   : > { %4301 = vpow2.f32 %v3891_v49  ;;  %v7370_v49 = vld [vmem:[#allocation74_spill] sm:$0xff]  ;;  %vm1938_vm2 = vcmp.eq.s32.totalorder %v1937_v22, 1  ;;  %v7373_v32 = vld [vmem:[#allocation77_spill] sm:$0xff]  ;;  %v7400_v22 = vld [vmem:[#allocation104_spill] sm:$0xff] }
 0x1e1   : > { %4303 = vpow2.f32 %v3892_v24 }
 0x1e2   : > { %2138 = vmatpush1.bf16.msra.mxu0 %v7345_v29  ;;  %2179 = vmatpush1.bf16.msra.mxu1 %v7346_v30  ;;  %4305 = vpow2.f32 %v3893_v1  ;;  %v7371_v29 = vld [vmem:[#allocation75_spill] sm:$0xff]  ;;  %v7372_v30 = vld [vmem:[#allocation76_spill] sm:$0xff] }
 0x1e3   : > { %2139 = vmatprep.subr.bf16.mxu0 %v7347_v33  ;;  %2180 = vmatprep.subr.bf16.mxu1 %v7348_v35  ;;  %4307 = vtanh.f32 %v1852_v6  ;;  %v7374_v33 = vld [vmem:[#allocation78_spill] sm:$0xff]  ;;  %v7376_v1 = vld [vmem:[#allocation80_spill] sm:$0xff]  ;;  %v7379_v6 = vld [vmem:[#allocation83_spill] sm:$0xff] }
 0x1e6   : > { %2140 = vmatpush1.bf16.msra.mxu0 %v7350_v36  ;;  %2181 = vmatpush1.bf16.msra.mxu1 %v7351_v62  ;;  %v7375_v62 = vld [vmem:[#allocation79_spill] sm:$0xff] }
 0x1e7   : > { %2141 = vmatprep.subr.bf16.mxu0 %v7352_v4  ;;  %2182 = vmatprep.subr.bf16.mxu1 %v7353_v5  ;;  %v7377_v4 = vld [vmem:[#allocation81_spill] sm:$0xff]  ;;  %v7378_v5 = vld [vmem:[#allocation82_spill] sm:$0xff] }
 0x1ea   : > { %v4302_v8 = vpop.eup %4301  ;;  %2142 = vmatpush1.bf16.msra.mxu0 %v7354_v10  ;;  %2183 = vmatpush1.bf16.msra.mxu1 %v7355_v11  ;;  %v7381_v10 = vld [vmem:[#allocation85_spill] sm:$0xff]  ;;  %v7382_v11 = vld [vmem:[#allocation86_spill] sm:$0xff] }
 0x1eb   : > { %v4304_v34 = vpop.eup %4303  ;;  %v1905_v26 = vadd.f32 1.0, %v4302_v8  ;;  %2213 = vmatprep.subr.bf16.mxu0 %v7356_v2  ;;  %2254 = vmatprep.subr.bf16.mxu1 %v7357_v15  ;;  %v7380_v8 = vld [vmem:[#allocation84_spill] sm:$0xff] }
 0x1ec   : > { %v1911_v42 = vadd.f32 1.0, %v4304_v34  ;;  %v4306_v19 = vpop.eup %4305  ;;  %v7384_v2 = vld [vmem:[#allocation88_spill] sm:$0xff] }
 0x1ed   : > { %4309 = vrcp.f32 %v1905_v26  ;;  %2160 = vmatmul.mubr.bf16.vlgmr.msra.gmra.mrb[28].mxu0 %v5688_v14  ;;  %2201 = vmatmul.mubr.bf16.vlgmr.msra.gmra.mrb[28].mxu1 %v5688_v14  ;;  %v7364_v14 = vld [vmem:[#allocation68_spill] sm:$0xff]  ;;  %v4308_v38 = vpop.eup %4307  ;;  %v1918_v51 = vadd.f32 1.0, %v4306_v19  ;;  %v7383_v26 = vld [vmem:[#allocation87_spill] sm:$0xff] }
 0x1ee   : > { %4311 = vrcp.f32 %v1911_v42  ;;  %2214 = vmatpush1.bf16.msra.mxu0 %v7358_v39  ;;  %2255 = vmatpush1.bf16.msra.mxu1 %v7359_v43  ;;  %v7385_v42 = vld [vmem:[#allocation89_spill] sm:$0xff]  ;;  %v7386_v39 = vld [vmem:[#allocation90_spill] sm:$0xff]  ;;  %v7391_v19 = vld [vmem:[#allocation95_spill] sm:$0xff] }
 0x1ef   : > { %2215 = vmatprep.subr.bf16.mxu0 %v7360_v45  ;;  %2256 = vmatprep.subr.bf16.mxu1 %v7361_v46  ;;  %4313 = vrcp.f32 %v1918_v51  ;;  %v7387_v45 = vld [vmem:[#allocation91_spill] sm:$0xff]  ;;  %v7388_v46 = vld [vmem:[#allocation92_spill] sm:$0xff] }
 0x1f0   : > { %2245 = vmatprep.mubr.bf16.mxu0 %v7228_v3  ;;  %2286 = vmatprep.mubr.bf16.mxu1 %v7228_v3  ;;  %v7403_v51 = vld [vmem:[#allocation107_spill] sm:$0xff] }
 0x1f2   : > { %2216 = vmatpush1.bf16.msra.mxu0 %v7363_v47  ;;  %2257 = vmatpush1.bf16.msra.mxu1 %v7364_v14  ;;  %v7389_v14 = vld [vmem:[#allocation93_spill] sm:$0xff] }
 0x1f3   : > { %2217 = vmatprep.subr.bf16.mxu0 %v7365_v16  ;;  %2258 = vmatprep.subr.bf16.mxu1 %v7366_v18  ;;  %v7390_v16 = vld [vmem:[#allocation94_spill] sm:$0xff] }
 0x1f6   : > { %2218 = vmatpush1.bf16.msra.mxu0 %v7367_v20  ;;  %2259 = vmatpush1.bf16.msra.mxu1 %v7368_v21  ;;  %v7394_v20 = vld [vmem:[#allocation98_spill] sm:$0xff]  ;;  %v7395_v21 = vld [vmem:[#allocation99_spill] sm:$0xff] }
 0x1f7   : > { %v4310_v52 = vpop.eup %4309  ;;  %2219 = vmatprep.subr.bf16.mxu0 %v7369_v48  ;;  %2260 = vmatprep.subr.bf16.mxu1 %v7370_v49  ;;  %v7398_v48 = vld [vmem:[#allocation102_spill] sm:$0xff]  ;;  %v7399_v49 = vld [vmem:[#allocation103_spill] sm:$0xff] }
 0x1f8   : > { %v4312_v23 = vpop.eup %4311  ;;  %v1922_v24 = vmul.f32 %v4310_v52, %v4308_v38  ;;  %v7392_v38 = vld [vmem:[#allocation96_spill] sm:$0xff]  ;;  %v7397_v52 = vld [vmem:[#allocation101_spill] sm:$0xff] }
 0x1f9   : > { %v1921_v27 = vmul.f32 %v4312_v23, %v572_v40  ;;  %v4314_v34 = vpop.eup %4313  ;;  %v7401_v23 = vld [vmem:[#allocation105_spill] sm:$0xff] }
 0x1fa   : > { %2220 = vmatpush1.bf16.msra.mxu0 %v7371_v29  ;;  %2261 = vmatpush1.bf16.msra.mxu1 %v7372_v30  ;;  %v7405_v29 = vld [vmem:[#allocation109_spill] sm:$0xff]  ;;  %v7406_v30 = vld [vmem:[#allocation110_spill] sm:$0xff] }
 0x1fb   : > { %2221 = vmatprep.subr.bf16.mxu0 %v7373_v32  ;;  %2262 = vmatprep.subr.bf16.mxu1 %v7374_v33  ;;  %v1923_v35 = vadd.f32 %v1922_v24, %v1921_v27  ;;  %v7402_v24 = vld [vmem:[#allocation106_spill] sm:$0xff]  ;;  %v7404_v27 = vld [vmem:[#allocation108_spill] sm:$0xff]  ;;  %v7407_v32 = vld [vmem:[#allocation111_spill] sm:$0xff] }
 0x1fc   : > { %v7408_v33 = vld [vmem:[#allocation112_spill] sm:$0xff] }
 0x1fd   : > { %4315 = vtanh.f32 %v1923_v35  ;;  %v5854_v36 = vsel %vm1938_vm2, %v1923_v35, %v572_v40  ;;  %v7396_v40 = vld [vmem:[#allocation100_spill] sm:$0xff]  ;;  %v7409_v35 = vld [vmem:[#allocation113_spill] sm:$0xff] }
 0x1fe   : > { %2222 = vmatpush1.bf16.msra.mxu0 %v7375_v62  ;;  %2263 = vmatpush1.bf16.msra.mxu1 %v7376_v1  ;;  %v7410_v62 = vld [vmem:[#allocation114_spill] sm:$0xff]  ;;  %v7411_v1 = vld [vmem:[#allocation115_spill] sm:$0xff] }
 0x1ff   : > { %2223 = vmatprep.subr.bf16.mxu0 %v7377_v4  ;;  %2264 = vmatprep.subr.bf16.mxu1 %v7378_v5  ;;  %v5977_v4 = vld [vmem:[%s6966_s1 + $0x40] ss:$16 sps:$4 sm:$0xff]   ;;  %v5983_v5 = vld [vmem:[%s6966_s1 + $0x48] ss:$16 sps:$4 sm:$0xff]  }
 0x202   : > { %2224 = vmatpush1.bf16.msra.mxu0 %v7379_v6  ;;  %2265 = vmatpush1.bf16.msra.mxu1 %v7380_v8  ;;  %v5989_v6 = vld [vmem:[%s6966_s1 + $0x64] ss:$16 sps:$4 sm:$0xff]   ;;  %v5995_v8 = vld [vmem:[%s6966_s1 + $0x6c] ss:$16 sps:$4 sm:$0xff]  }
 0x203   : > { %2225 = vmatprep.subr.bf16.mxu0 %v7381_v10  ;;  %2266 = vmatprep.subr.bf16.mxu1 %v7382_v11  ;;  %v6001_v10 = vld [vmem:[%s6966_s1 + $0x60] ss:$16 sps:$4 sm:$0xff]   ;;  %v6007_v11 = vld [vmem:[%s6966_s1 + $0x68] ss:$16 sps:$4 sm:$0xff]  }
 0x206   : > { %2226 = vmatpush1.bf16.msra.mxu0 %v7383_v26  ;;  %2267 = vmatpush1.bf16.msra.mxu1 %v7384_v2  ;;  %v6019_v26 = vld [vmem:[%s6966_s1 + $0x8c] ss:$16 sps:$4 sm:$0xff]   ;;  %v6025_v2 = vld [vmem:[%s6966_s1 + $0x80] ss:$16 sps:$4 sm:$0xff]  }
 0x207   : > { %v4316_v15 = vpop.eup %4315  ;;  %2227 = vmatprep.subr.bf16.mxu0 %v7385_v42  ;;  %2268 = vmatprep.subr.bf16.mxu1 %v7386_v39  ;;  %v6037_v42 = vld [vmem:[%s6966_s1 + $0xa4] ss:$16 sps:$4 sm:$0xff]   ;;  %v6043_v39 = vld [vmem:[%s6966_s1 + $0xac] ss:$16 sps:$4 sm:$0xff]  }
 0x208   : > { %v1925_v43 = vmul.f32 %v4316_v15, %v4314_v34  ;;  %v6013_v34 = vld [vmem:[%s6966_s1 + $0x84] ss:$16 sps:$4 sm:$0xff]   ;;  %v6031_v15 = vld [vmem:[%s6966_s1 + $0x88] ss:$16 sps:$4 sm:$0xff]  }
 0x20a   : > { %2228 = vmatpush1.bf16.msra.mxu0 %v5520_v57  ;;  %2269 = vmatpush1.bf16.msra.mxu1 %v7387_v45  ;;  %v5872_v47 = vsel %vm1938_vm2, %v1925_v43, %v7388_v46  ;;  %v7393_v57 = vld [vmem:[#allocation97_spill] sm:$0xff]  ;;  %v6055_v45 = vld [vmem:[%s6966_s1 + $0xa8] ss:$16 sps:$4 sm:$0xff]  }
 0x20b   : > { %2295 = vmatprep.subr.bf16.mxu0 %v7389_v14  ;;  %2336 = vmatprep.subr.bf16.mxu1 %v7390_v16  ;;  %v1953_v18 = vpack.c.bf16 %v5872_v47, %v5872_v47  ;;  %v6049_v43 = vld [vmem:[%s6966_s1 + $0xa0] ss:$16 sps:$4 sm:$0xff]   ;;  %v6061_v46 = vld [vmem:[%s6966_s1 + $0xc4] ss:$16 sps:$4 sm:$0xff]   ;;  %v6067_v14 = vld [vmem:[%s6966_s1 + $0xcc] ss:$16 sps:$4 sm:$0xff]  }
 0x20c   : > { %v6073_v16 = vld [vmem:[%s6966_s1 + $0xc0] ss:$16 sps:$4 sm:$0xff]  }
 0x20d   : > { %2246 = vmatmul.mubr.bf16.vlgmr.msra.gmra.mrb[32].mxu0 %v1953_v18  ;;  %2287 = vmatmul.mubr.bf16.vlgmr.msra.gmra.mrb[32].mxu1 %v1953_v18  ;;  %v6079_v18 = vld [vmem:[%s6966_s1 + $0xc8] ss:$16 sps:$4 sm:$0xff]  }
 0x20e   : > { %2296 = vmatpush1.bf16.msra.mxu0 %v7391_v19  ;;  %2337 = vmatpush1.bf16.msra.mxu1 %v7392_v38  ;;  %v6085_v19 = vld [vmem:[%s6966_s1 + $0xe4] ss:$16 sps:$4 sm:$0xff]   ;;  %v6091_v38 = vld [vmem:[%s6966_s1 + $0xec] ss:$16 sps:$4 sm:$0xff]  }
 0x20f   : > { %2297 = vmatprep.subr.bf16.mxu0 %v7393_v57  ;;  %2338 = vmatprep.subr.bf16.mxu1 %v7394_v20  ;;  %7412 = vst [vmem:[#allocation17_spill] sm:$0xff] %v6085_v19  ;;  %7413 = vst [vmem:[#allocation18_spill] sm:$0xff] %v6091_v38  ;;  %v6097_v57 = vld [vmem:[%s6966_s1 + $0xe0] ss:$16 sps:$4 sm:$0xff]   ;;  %v6103_v20 = vld [vmem:[%s6966_s1 + $0xe8] ss:$16 sps:$4 sm:$0xff]  }
 0x210   : > { %2327 = vmatprep.mubr.bf16.mxu0 %v7228_v3  ;;  %2368 = vmatprep.mubr.bf16.mxu1 %v7228_v3  ;;  %7414 = vst [vmem:[#allocation19_spill] sm:$0xff] %v6097_v57  ;;  %7415 = vst [vmem:[#allocation20_spill] sm:$0xff] %v6103_v20 }
 0x212   : > { %2298 = vmatpush1.bf16.msra.mxu0 %v7395_v21  ;;  %2339 = vmatpush1.bf16.msra.mxu1 %v7396_v40  ;;  %v6106_v21 = vld [vmem:[#allocation8 + $0x4] ss:$16 sps:$4 sm:$0xff]   ;;  %v6109_v40 = vld [vmem:[#allocation8 + $0xc] ss:$16 sps:$4 sm:$0xff]  }
 0x213   : > { %2299 = vmatprep.subr.bf16.mxu0 %v7397_v52  ;;  %2340 = vmatprep.subr.bf16.mxu1 %v7398_v48  ;;  %7416 = vst [vmem:[#allocation21_spill] sm:$0xff] %v6106_v21  ;;  %7417 = vst [vmem:[#allocation22_spill] sm:$0xff] %v6109_v40  ;;  %v3896_v52 = vld [vmem:[%s4922_s16 + $0x20] sm:$0xff]  ;;  %v3897_v48 = vld [vmem:[%s4922_s16 + $0x28] sm:$0xff] }
 0x216   : > { %2300 = vmatpush1.bf16.msra.mxu0 %v7399_v49  ;;  %2341 = vmatpush1.bf16.msra.mxu1 %v7400_v22 }
 0x217   : > { %2301 = vmatprep.subr.bf16.mxu0 %v7401_v23  ;;  %2342 = vmatprep.subr.bf16.mxu1 %v7402_v24 }
 0x21a   : > { %2302 = vmatpush1.bf16.msra.mxu0 %v7403_v51  ;;  %2343 = vmatpush1.bf16.msra.mxu1 %v7404_v27 }
 0x21b   : > { %2303 = vmatprep.subr.bf16.mxu0 %v7405_v29  ;;  %2344 = vmatprep.subr.bf16.mxu1 %v7406_v30 }
 0x21e   : > { %2304 = vmatpush1.bf16.msra.mxu0 %v7407_v32  ;;  %2345 = vmatpush1.bf16.msra.mxu1 %v7408_v33 }
 0x21f   : > { %2305 = vmatprep.subr.bf16.mxu0 %v7409_v35  ;;  %2346 = vmatprep.subr.bf16.mxu1 %v7410_v62 }
 0x222   : > { %2306 = vmatpush1.bf16.msra.mxu0 %v7411_v1  ;;  %2347 = vmatpush1.bf16.msra.mxu1 %v5600_v59  ;;  %v5913_v59 = vld [vmem:[%s6966_s1 + $0x4] ss:$16 sps:$4 sm:$0xff]   ;;  %v3899_v1 = vld [vmem:[%s4922_s16 + $0x38] sm:$0xff] }
 0x223   : > { %2307 = vmatprep.subr.bf16.mxu0 %v5604_v55  ;;  %2348 = vmatprep.subr.bf16.mxu1 %v5606_v56  ;;  %v5919_v55 = vld [vmem:[%s6966_s1 + $0xc] ss:$16 sps:$4 sm:$0xff]   ;;  %v5927_v56 = vld [vmem:[%s6966_s1] ss:$16 sps:$4 sm:$0xff]  }
 0x226   : > { %2308 = vmatpush1.bf16.msra.mxu0 %v5610_v0  ;;  %2349 = vmatpush1.bf16.msra.mxu1 %v5612_v63  ;;  %v5945_v63 = vld [vmem:[%s6966_s1 + $0x2c] ss:$16 sps:$4 sm:$0xff]   ;;  %v5953_v0 = vld [vmem:[%s6966_s1 + $0x20] ss:$16 sps:$4 sm:$0xff]  }
 0x227   : > { %2309 = vmatprep.subr.bf16.mxu0 %v5616_v58  ;;  %2350 = vmatprep.subr.bf16.mxu1 %v5618_v61  ;;  %v5939_v61 = vld [vmem:[%s6966_s1 + $0x24] ss:$16 sps:$4 sm:$0xff]  }
 0x228   : > { %v5965_v58 = vld [vmem:[%s6966_s1 + $0x44] ss:$16 sps:$4 sm:$0xff]  }
 0x22a   : > { %2310 = vmatpush1.bf16.msra.mxu0 %v5622_v37  ;;  %2351 = vmatpush1.bf16.msra.mxu1 %v5624_v60  ;;  %v5933_v60 = vld [vmem:[%s6966_s1 + $0x8] ss:$16 sps:$4 sm:$0xff]  }
 0x22b   : > { %2486 = vmatprep.subr.bf16.mxu0 %v5913_v59  ;;  %2527 = vmatprep.subr.bf16.mxu1 %v5919_v55  ;;  %v5959_v37 = vld [vmem:[%s6966_s1 + $0x28] ss:$16 sps:$4 sm:$0xff]  }
 0x22d   : > { %2328 = vmatmul.mubr.bf16.vlgmr.msra.gmra.mrb[36].mxu0 %v5764_v28  ;;  %2369 = vmatmul.mubr.bf16.vlgmr.msra.gmra.mrb[36].mxu1 %v5764_v28  ;;  %v5971_v28 = vld [vmem:[%s6966_s1 + $0x4c] ss:$16 sps:$4 sm:$0xff]  }
 0x22e   : > { %2487 = vmatpush1.bf16.msra.mxu0 %v5927_v56  ;;  %2528 = vmatpush1.bf16.msra.mxu1 %v5933_v60 }
 0x22f   : > { %2488 = vmatprep.subr.bf16.mxu0 %v5939_v61  ;;  %2529 = vmatprep.subr.bf16.mxu1 %v5945_v63 }
 0x230   : > { %2518 = vmatprep.mubr.bf16.mxu0 %v7228_v3  ;;  %2559 = vmatprep.mubr.bf16.mxu1 %v7228_v3 }
 0x232   : > { %2489 = vmatpush1.bf16.msra.mxu0 %v5953_v0  ;;  %2530 = vmatpush1.bf16.msra.mxu1 %v5959_v37 }
 0x233   : > { %2490 = vmatprep.subr.bf16.mxu0 %v5965_v58  ;;  %2531 = vmatprep.subr.bf16.mxu1 %v5971_v28 }
 0x236   : > { %2491 = vmatpush1.bf16.msra.mxu0 %v5977_v4  ;;  %2532 = vmatpush1.bf16.msra.mxu1 %v5983_v5 }
 0x237   : > { %2492 = vmatprep.subr.bf16.mxu0 %v5989_v6  ;;  %2533 = vmatprep.subr.bf16.mxu1 %v5995_v8 }
 0x23a   : > { %2493 = vmatpush1.bf16.msra.mxu0 %v6001_v10  ;;  %2534 = vmatpush1.bf16.msra.mxu1 %v6007_v11 }
 0x23b   : > { %2494 = vmatprep.subr.bf16.mxu0 %v6013_v34  ;;  %2535 = vmatprep.subr.bf16.mxu1 %v6019_v26 }
 0x23e   : > { %2495 = vmatpush1.bf16.msra.mxu0 %v6025_v2  ;;  %2536 = vmatpush1.bf16.msra.mxu1 %v6031_v15 }
 0x23f   : > { %2496 = vmatprep.subr.bf16.mxu0 %v6037_v42  ;;  %2537 = vmatprep.subr.bf16.mxu1 %v6043_v39 }
 0x242   : > { %2497 = vmatpush1.bf16.msra.mxu0 %v6049_v43  ;;  %2538 = vmatpush1.bf16.msra.mxu1 %v6055_v45 }
 0x243   : > { %2498 = vmatprep.subr.bf16.mxu0 %v6061_v46  ;;  %2539 = vmatprep.subr.bf16.mxu1 %v6067_v14 }
 0x246   : > { %2499 = vmatpush1.bf16.msra.mxu0 %v6073_v16  ;;  %2540 = vmatpush1.bf16.msra.mxu1 %v6079_v18 }
 0x247   : > { %2500 = vmatprep.subr.bf16.mxu0 %v6085_v19  ;;  %2541 = vmatprep.subr.bf16.mxu1 %v6091_v38 }
 0x24a   : > { %2501 = vmatpush1.bf16.msra.mxu0 %v6097_v57  ;;  %2542 = vmatpush1.bf16.msra.mxu1 %v6103_v20 }
 0x24b   : > { %2572 = vmatprep.subr.bf16.mxu0 %v6106_v21  ;;  %2613 = vmatprep.subr.bf16.mxu1 %v6109_v40  ;;  %v3898_v21 = vld [vmem:[%s4922_s16 + $0x30] sm:$0xff] }
 0x25e   : > { %v1993_v49 = vpop.f32.mrb[20].mxu0  ;;  %v2034_v22 = vpop.f32.mrb[20].mxu1 }
 0x25f   : > { %v2041_v23 = vadd.f32 %v3896_v52, %v1993_v49  ;;  %v1995_v24 = vpop.f32.mrb[21].mxu0  ;;  %v2036_v51 = vpop.f32.mrb[21].mxu1  ;;  %v2043_v57 = vadd.f32 %v3898_v21, %v2034_v22 }
 0x260   : > { %v2042_v27 = vadd.f32 %v3897_v48, %v1995_v24  ;;  %v1997_v29 = vpop.f32.mrb[22].mxu0  ;;  %v2038_v30 = vpop.f32.mrb[22].mxu1  ;;  %v2044_v40 = vadd.f32 %v3899_v1, %v2036_v51  ;;  %v2454_v51 = vstv %s2453_s19  ;;  %v6150_v1 = vld [vmem:[#allocation8 + $0x28] ss:$16 sps:$4 sm:$0xff]  }
 0x261   : > { %v3900_v32 = vmul.f32 -1.442695, %v2041_v23  ;;  %v1998_v33 = vpop.f32.mrb[23].mxu0  ;;  %v2039_v35 = vpop.f32.mrb[23].mxu1  ;;  %vm2455_vm3 = vcmp.eq.s32.totalorder %v2454_v51, 1  ;;  %7423 = vst [vmem:[#allocation29_spill] sm:$0xff] %v6150_v1 }
 0x262   : > { %v3901_v62 = vmul.f32 -1.442695, %v2042_v27  ;;  %v3902_v20 = vmul.f32 -1.442695, %v2044_v40  ;;  %v6133_v33 = vld [vmem:[#allocation8] ss:$16 sps:$4 sm:$0xff]  }
 0x263   : > { %4317 = vpow2.f32 %v3900_v32  ;;  %7418 = vst [vmem:[#allocation23_spill] sm:$0xff] %v6133_v33  ;;  %v6139_v35 = vld [vmem:[#allocation8 + $0x24] ss:$16 sps:$4 sm:$0xff]   ;;  %v6168_v51 = vld [vmem:[#allocation8 + $0x6c] ss:$16 sps:$4 sm:$0xff]  }
 0x264   : > { %4319 = vpow2.f32 %v3901_v62  ;;  %7420 = vst [vmem:[#allocation25_spill] sm:$0xff] %v6139_v35  ;;  %v6147_v62 = vld [vmem:[#allocation8 + $0x20] ss:$16 sps:$4 sm:$0xff]   ;;  %7429 = vst [vmem:[#allocation34_spill] sm:$0xff] %v6168_v51 }
 0x265   : > { %4321 = vpow2.f32 %v3902_v20  ;;  %7422 = vst [vmem:[#allocation27_spill] sm:$0xff] %v6147_v62 }
 0x266   : > { %4323 = vtanh.f32 %v2043_v57 }
 0x26d   : > { %v4318_v38 = vpop.eup %4317 }
 0x26e   : > { %v4320_v19 = vpop.eup %4319  ;;  %v2384_v52 = vadd.f32 1.0, %v4318_v38 }
 0x26f   : > { %v2390_v48 = vadd.f32 1.0, %v4320_v19  ;;  %v4322_v49 = vpop.eup %4321 }
 0x270   : > { %4325 = vrcp.f32 %v2384_v52  ;;  %v4324_v23 = vpop.eup %4323  ;;  %v2397_v21 = vadd.f32 1.0, %v4322_v49  ;;  %v6153_v52 = vld [vmem:[#allocation8 + $0x44] ss:$16 sps:$4 sm:$0xff]   ;;  %v6159_v49 = vld [vmem:[#allocation8 + $0x40] ss:$16 sps:$4 sm:$0xff]  }
 0x271   : > { %4327 = vrcp.f32 %v2390_v48  ;;  %7424 = vst [vmem:[#allocation30_spill] sm:$0xff] %v6153_v52  ;;  %v6156_v48 = vld [vmem:[#allocation8 + $0x4c] ss:$16 sps:$4 sm:$0xff]   ;;  %7426 = vst [vmem:[#allocation31_spill] sm:$0xff] %v6159_v49 }
 0x272   : > { %4329 = vrcp.f32 %v2397_v21  ;;  %7425 = vst [vmem:[#allocation28_spill] sm:$0xff] %v6156_v48  ;;  %v6177_v21 = vld [vmem:[#allocation8 + $0x84] ss:$16 sps:$4 sm:$0xff]  }
 0x273   : > { %7432 = vst [vmem:[#allocation37_spill] sm:$0xff] %v6177_v21 }
 0x27a   : > { %v4326_v24 = vpop.eup %4325 }
 0x27b   : > { %v4328_v27 = vpop.eup %4327  ;;  %v2401_v40 = vmul.f32 %v4326_v24, %v4324_v23  ;;  %v6162_v23 = vld [vmem:[#allocation8 + $0x48] ss:$16 sps:$4 sm:$0xff]   ;;  %v6165_v24 = vld [vmem:[#allocation8 + $0x64] ss:$16 sps:$4 sm:$0xff]  }
 0x27c   : > { %v2400_v22 = vmul.f32 %v4328_v27, %v5679_v7  ;;  %v4330_v57 = vpop.eup %4329  ;;  %7427 = vst [vmem:[#allocation32_spill] sm:$0xff] %v6162_v23  ;;  %7428 = vst [vmem:[#allocation33_spill] sm:$0xff] %v6165_v24  ;;  %v6171_v27 = vld [vmem:[#allocation8 + $0x60] ss:$16 sps:$4 sm:$0xff]  }
 0x27d   : > { %7430 = vst [vmem:[#allocation35_spill] sm:$0xff] %v6171_v27 }
 0x27e   : > { %v2402_v38 = vadd.f32 %v2401_v40, %v2400_v22  ;;  %v6174_v40 = vld [vmem:[#allocation8 + $0x68] ss:$16 sps:$4 sm:$0xff]   ;;  %v6180_v22 = vld [vmem:[#allocation8 + $0x8c] ss:$16 sps:$4 sm:$0xff]  }
 0x27f   : > { %7431 = vst [vmem:[#allocation36_spill] sm:$0xff] %v6174_v40  ;;  %7433 = vst [vmem:[#allocation38_spill] sm:$0xff] %v6180_v22 }
 0x280   : > { %4331 = vtanh.f32 %v2402_v38  ;;  %v6122_v19 = vsel %vm2455_vm3, %v2402_v38, %v5679_v7  ;;  %v6136_v7 = vld [vmem:[#allocation8 + $0x8] ss:$16 sps:$4 sm:$0xff]  }
 0x281   : > { %7419 = vst [vmem:[#allocation24_spill] sm:$0xff] %v6136_v7 }
 0x28a   : > { %v4332_v20 = vpop.eup %4331 }
 0x28b   : > { %v2404_v29 = vmul.f32 %v4332_v20, %v4330_v57 }
 0x28d   : > { %v6125_v30 = vsel %vm2455_vm3, %v2404_v29, %v5684_v13  ;;  %v6142_v13 = vld [vmem:[#allocation8 + $0x2c] ss:$16 sps:$4 sm:$0xff]  }
 0x28e   : > { %v6129_v32 = vpack.c.bf16 %v6125_v30, %v6125_v30  ;;  %7421 = vst [vmem:[#allocation26_spill] sm:$0xff] %v6142_v13 }
 0x290   : > { %2519 = vmatmul.mubr.bf16.vlgmr.msra.gmra.mrb[40].mxu0 %v6129_v32  ;;  %2560 = vmatmul.mubr.bf16.vlgmr.msra.gmra.mrb[40].mxu1 %v6129_v32 }
 0x291   : > { %2573 = vmatpush1.bf16.msra.mxu0 %v6133_v33  ;;  %2614 = vmatpush1.bf16.msra.mxu1 %v6136_v7 }
 0x292   : > { %2574 = vmatprep.subr.bf16.mxu0 %v6139_v35  ;;  %2615 = vmatprep.subr.bf16.mxu1 %v6142_v13 }
 0x293   : > { %2604 = vmatprep.mubr.bf16.mxu0 %v7228_v3  ;;  %2645 = vmatprep.mubr.bf16.mxu1 %v7228_v3 }
 0x295   : > { %2575 = vmatpush1.bf16.msra.mxu0 %v6147_v62  ;;  %2616 = vmatpush1.bf16.msra.mxu1 %v6150_v1 }
 0x296   : > { %2576 = vmatprep.subr.bf16.mxu0 %v6153_v52  ;;  %2617 = vmatprep.subr.bf16.mxu1 %v6156_v48  ;;  %v6195_v48 = vld [vmem:[#allocation8 + $0xa0] ss:$16 sps:$4 sm:$0xff]  }
 0x297   : > { %7438 = vst [vmem:[#allocation43_spill] sm:$0xff] %v6195_v48 }
 0x299   : > { %2577 = vmatpush1.bf16.msra.mxu0 %v6159_v49  ;;  %2618 = vmatpush1.bf16.msra.mxu1 %v6162_v23  ;;  %v6189_v23 = vld [vmem:[#allocation8 + $0xa4] ss:$16 sps:$4 sm:$0xff]  }
 0x29a   : > { %2578 = vmatprep.subr.bf16.mxu0 %v6165_v24  ;;  %2619 = vmatprep.subr.bf16.mxu1 %v6168_v51  ;;  %v6183_v51 = vld [vmem:[#allocation8 + $0x80] ss:$16 sps:$4 sm:$0xff]   ;;  %7436 = vst [vmem:[#allocation41_spill] sm:$0xff] %v6189_v23 }
 0x29b   : > { %7434 = vst [vmem:[#allocation39_spill] sm:$0xff] %v6183_v51 }
 0x29d   : > { %2579 = vmatpush1.bf16.msra.mxu0 %v6171_v27  ;;  %2620 = vmatpush1.bf16.msra.mxu1 %v6174_v40  ;;  %v6186_v27 = vld [vmem:[#allocation8 + $0x88] ss:$16 sps:$4 sm:$0xff]  }
 0x29e   : > { %2580 = vmatprep.subr.bf16.mxu0 %v6177_v21  ;;  %2621 = vmatprep.subr.bf16.mxu1 %v6180_v22  ;;  %7435 = vst [vmem:[#allocation40_spill] sm:$0xff] %v6186_v27  ;;  %v6192_v21 = vld [vmem:[#allocation8 + $0xac] ss:$16 sps:$4 sm:$0xff]  }
 0x29f   : > { %7437 = vst [vmem:[#allocation42_spill] sm:$0xff] %v6192_v21 }
 0x2a0   : > { %v2079_v38 = vpop.f32.mrb[24].mxu0  ;;  %v2120_v57 = vpop.f32.mrb[24].mxu1 }
 0x2a1   : > { %v2081_v20 = vpop.f32.mrb[25].mxu0  ;;  %v2122_v29 = vpop.f32.mrb[25].mxu1  ;;  %2581 = vmatpush1.bf16.msra.mxu0 %v6183_v51  ;;  %2622 = vmatpush1.bf16.msra.mxu1 %v6186_v27  ;;  %v6198_v51 = vld [vmem:[#allocation8 + $0xa8] ss:$16 sps:$4 sm:$0xff]  }
 0x2a2   : > { %v2083_v40 = vpop.f32.mrb[26].mxu0  ;;  %v2124_v24 = vpop.f32.mrb[26].mxu1  ;;  %2582 = vmatprep.subr.bf16.mxu0 %v6189_v23  ;;  %2623 = vmatprep.subr.bf16.mxu1 %v6192_v21  ;;  %7439 = vst [vmem:[#allocation44_spill] sm:$0xff] %v6198_v51  ;;  %v6207_v23 = vld [vmem:[#allocation8 + $0xc0] ss:$16 sps:$4 sm:$0xff]  }
 0x2a3   : > { %v2084_v22 = vpop.f32.mrb[27].mxu0  ;;  %v2125_v49 = vpop.f32.mrb[27].mxu1  ;;  %v6201_v40 = vld [vmem:[#allocation8 + $0xc4] ss:$16 sps:$4 sm:$0xff]   ;;  %v6204_v24 = vld [vmem:[#allocation8 + $0xcc] ss:$16 sps:$4 sm:$0xff]  }
 0x2a4   : > { %7440 = vst [vmem:[#allocation45_spill] sm:$0xff] %v6201_v40  ;;  %7441 = vst [vmem:[#allocation46_spill] sm:$0xff] %v6204_v24  ;;  %v6210_v49 = vld [vmem:[#allocation8 + $0xc8] ss:$16 sps:$4 sm:$0xff]   ;;  %v6213_v22 = vld [vmem:[#allocation8 + $0xe4] ss:$16 sps:$4 sm:$0xff]  }
 0x2a5   : > { %2583 = vmatpush1.bf16.msra.mxu0 %v6195_v48  ;;  %2624 = vmatpush1.bf16.msra.mxu1 %v6198_v51  ;;  %7442 = vst [vmem:[#allocation47_spill] sm:$0xff] %v6207_v23  ;;  %7443 = vst [vmem:[#allocation48_spill] sm:$0xff] %v6210_v49  ;;  %v6216_v51 = vld [vmem:[#allocation8 + $0xec] ss:$16 sps:$4 sm:$0xff]  }
 0x2a6   : > { %2584 = vmatprep.subr.bf16.mxu0 %v6201_v40  ;;  %2625 = vmatprep.subr.bf16.mxu1 %v6204_v24  ;;  %7444 = vst [vmem:[#allocation49_spill] sm:$0xff] %v6213_v22  ;;  %7445 = vst [vmem:[#allocation50_spill] sm:$0xff] %v6216_v51  ;;  %v6219_v40 = vld [vmem:[#allocation8 + $0xe0] ss:$16 sps:$4 sm:$0xff]   ;;  %v6222_v24 = vld [vmem:[#allocation8 + $0xe8] ss:$16 sps:$4 sm:$0xff]  }
 0x2a7   : > { %7446 = vst [vmem:[#allocation51_spill] sm:$0xff] %v6219_v40  ;;  %7447 = vst [vmem:[#allocation52_spill] sm:$0xff] %v6222_v24 }
 0x2a9   : > { %2585 = vmatpush1.bf16.msra.mxu0 %v6207_v23  ;;  %2626 = vmatpush1.bf16.msra.mxu1 %v6210_v49  ;;  %v6228_v49 = vld [vmem:[%s6967_s2 + $0x4] ss:$16 sps:$4 sm:$0xff]  }
 0x2aa   : > { %2586 = vmatprep.subr.bf16.mxu0 %v6213_v22  ;;  %2627 = vmatprep.subr.bf16.mxu1 %v6216_v51  ;;  %7448 = vst [vmem:[#allocation53_spill] sm:$0xff] %v6228_v49  ;;  %v6234_v22 = vld [vmem:[%s6967_s2 + $0xc] ss:$16 sps:$4 sm:$0xff]  }
 0x2ab   : > { %7449 = vst [vmem:[#allocation54_spill] sm:$0xff] %v6234_v22 }
 0x2ad   : > { %2587 = vmatpush1.bf16.msra.mxu0 %v6219_v40  ;;  %2628 = vmatpush1.bf16.msra.mxu1 %v6222_v24 }
 0x2ae   : > { %2654 = vmatprep.subr.bf16.mxu0 %v6228_v49  ;;  %2695 = vmatprep.subr.bf16.mxu1 %v6234_v22 }
 0x2c0   : > { %v2161_v51 = vpop.f32.mrb[28].mxu0  ;;  %v2202_v40 = vpop.f32.mrb[28].mxu1 }
 0x2c1   : > { %v2162_v23 = vadd.f32 %v2161_v51, %v2079_v38  ;;  %v2203_v48 = vadd.f32 %v2202_v40, %v2120_v57  ;;  %v2163_v21 = vpop.f32.mrb[29].mxu0  ;;  %v2204_v24 = vpop.f32.mrb[29].mxu1 }
 0x2c2   : > { %v2164_v27 = vadd.f32 %v2163_v21, %v2081_v20  ;;  %v2205_v52 = vadd.f32 %v2204_v24, %v2122_v29  ;;  %v2165_v1 = vpop.f32.mrb[30].mxu0  ;;  %v2206_v62 = vpop.f32.mrb[30].mxu1 }
 0x2c3   : > { %v2209_v49 = vadd.f32 %v2162_v23, %v5715_v41  ;;  %v2166_v13 = vpop.f32.mrb[31].mxu0  ;;  %v2207_v35 = vpop.f32.mrb[31].mxu1  ;;  %v2211_v21 = vadd.f32 %v2203_v48, %v5744_v31  ;;  %v2459_v23 = vstv %s3909_s28 }
 0x2c4   : > { %v2210_v7 = vadd.f32 %v2164_v27, %v5721_v44  ;;  %v2212_v51 = vadd.f32 %v2205_v52, %v5734_v25  ;;  %vm2460_vm4 = vcmp.eq.s32.totalorder %v2459_v23, 1  ;;  %v6259_v23 = vld [vmem:[%s6967_s2] ss:$16 sps:$4 sm:$0xff]  }
 0x2c5   : > { %v3903_v33 = vmul.f32 -1.442695, %v2209_v49 }
 0x2c6   : > { %v3904_v22 = vmul.f32 -1.442695, %v2210_v7  ;;  %v3905_v38 = vmul.f32 -1.442695, %v2212_v51 }
 0x2c7   : > { %4333 = vpow2.f32 %v3903_v33 }
 0x2c8   : > { %4335 = vpow2.f32 %v3904_v22 }
 0x2c9   : > { %4337 = vpow2.f32 %v3905_v38 }
 0x2ca   : > { %4339 = vtanh.f32 %v2211_v21 }
 0x2d1   : > { %v4334_v57 = vpop.eup %4333 }
 0x2d2   : > { %v4336_v1 = vpop.eup %4335  ;;  %v2408_v62 = vadd.f32 1.0, %v4334_v57 }
 0x2d3   : > { %v2414_v13 = vadd.f32 1.0, %v4336_v1  ;;  %v4338_v7 = vpop.eup %4337 }
 0x2d4   : > { %4341 = vrcp.f32 %v2408_v62  ;;  %v4340_v33 = vpop.eup %4339  ;;  %v2421_v20 = vadd.f32 1.0, %v4338_v7 }
 0x2d5   : > { %4343 = vrcp.f32 %v2414_v13 }
 0x2d6   : > { %4345 = vrcp.f32 %v2421_v20  ;;  %v6291_v20 = vld [vmem:[%s6967_s2 + $0x28] ss:$16 sps:$4 sm:$0xff]  }
 0x2d7   : > { %7450 = vst [vmem:[#allocation55_spill] sm:$0xff] %v6291_v20 }
 0x2de   : > { %v4342_v35 = vpop.eup %4341 }
 0x2df   : > { %v4344_v52 = vpop.eup %4343  ;;  %v2425_v27 = vmul.f32 %v4342_v35, %v4340_v33 }
 0x2e0   : > { %v2424_v48 = vmul.f32 %v4344_v52, %v5757_v53  ;;  %v2247_v29 = vpop.f32.mrb[32].mxu0  ;;  %v2288_v40 = vpop.f32.mrb[32].mxu1  ;;  %v6277_v52 = vld [vmem:[%s6967_s2 + $0x2c] ss:$16 sps:$4 sm:$0xff]  }
 0x2e1   : > { %v2249_v24 = vpop.f32.mrb[33].mxu0  ;;  %v2290_v49 = vpop.f32.mrb[33].mxu1 }
 0x2e2   : > { %v2251_v22 = vpop.f32.mrb[34].mxu0  ;;  %v2292_v51 = vpop.f32.mrb[34].mxu1  ;;  %v2426_v38 = vadd.f32 %v2425_v27, %v2424_v48  ;;  %v6285_v27 = vld [vmem:[%s6967_s2 + $0x20] ss:$16 sps:$4 sm:$0xff]   ;;  %v6297_v48 = vld [vmem:[%s6967_s2 + $0x44] ss:$16 sps:$4 sm:$0xff]  }
 0x2e3   : > { %v2252_v21 = vpop.f32.mrb[35].mxu0  ;;  %v2293_v57 = vpop.f32.mrb[35].mxu1  ;;  %7451 = vst [vmem:[#allocation56_spill] sm:$0xff] %v6297_v48  ;;  %v6303_v22 = vld [vmem:[%s6967_s2 + $0x4c] ss:$16 sps:$4 sm:$0xff]  }
 0x2e4   : > { %4347 = vtanh.f32 %v2426_v38  ;;  %v6245_v1 = vsel %vm2460_vm4, %v2426_v38, %v5757_v53  ;;  %v4346_v62 = vpop.eup %4345  ;;  %v6265_v53 = vld [vmem:[%s6967_s2 + $0x8] ss:$16 sps:$4 sm:$0xff]   ;;  %7452 = vst [vmem:[#allocation57_spill] sm:$0xff] %v6303_v22  ;;  %v6309_v51 = vld [vmem:[%s6967_s2 + $0x40] ss:$16 sps:$4 sm:$0xff]  }
 0x2e5   : > { %7453 = vst [vmem:[#allocation58_spill] sm:$0xff] %v6309_v51  ;;  %v6315_v38 = vld [vmem:[%s6967_s2 + $0x48] ss:$16 sps:$4 sm:$0xff]   ;;  %v6321_v21 = vld [vmem:[%s6967_s2 + $0x64] ss:$16 sps:$4 sm:$0xff]  }
 0x2e6   : > { %7454 = vst [vmem:[#allocation59_spill] sm:$0xff] %v6315_v38  ;;  %7455 = vst [vmem:[#allocation60_spill] sm:$0xff] %v6321_v21  ;;  %v6327_v57 = vld [vmem:[%s6967_s2 + $0x6c] ss:$16 sps:$4 sm:$0xff]  }
 0x2e7   : > { %7456 = vst [vmem:[#allocation61_spill] sm:$0xff] %v6327_v57 }
 0x2ee   : > { %v4348_v13 = vpop.eup %4347 }
 0x2ef   : > { %v2428_v7 = vmul.f32 %v4348_v13, %v4346_v62 }
 0x2f1   : > { %v6248_v33 = vsel %vm2460_vm4, %v2428_v7, %v5760_v54  ;;  %v6271_v54 = vld [vmem:[%s6967_s2 + $0x24] ss:$16 sps:$4 sm:$0xff]  }
 0x2f2   : > { %v6252_v35 = vpack.c.bf16 %v6248_v33, %v6248_v33 }
 0x2f4   : > { %2605 = vmatmul.mubr.bf16.vlgmr.msra.gmra.mrb[44].mxu0 %v6252_v35  ;;  %2646 = vmatmul.mubr.bf16.vlgmr.msra.gmra.mrb[44].mxu1 %v6252_v35 }
 0x2f5   : > { %2655 = vmatpush1.bf16.msra.mxu0 %v6259_v23  ;;  %2696 = vmatpush1.bf16.msra.mxu1 %v6265_v53 }
 0x2f6   : > { %2656 = vmatprep.subr.bf16.mxu0 %v6271_v54  ;;  %2697 = vmatprep.subr.bf16.mxu1 %v6277_v52 }
 0x2f7   : > { %2686 = vmatprep.mubr.bf16.mxu0 %v7228_v3  ;;  %2727 = vmatprep.mubr.bf16.mxu1 %v7228_v3 }
 0x2f9   : > { %2657 = vmatpush1.bf16.msra.mxu0 %v6285_v27  ;;  %2698 = vmatpush1.bf16.msra.mxu1 %v6291_v20 }
 0x2fa   : > { %2658 = vmatprep.subr.bf16.mxu0 %v6297_v48  ;;  %2699 = vmatprep.subr.bf16.mxu1 %v6303_v22 }
 0x2fd   : > { %2659 = vmatpush1.bf16.msra.mxu0 %v6309_v51  ;;  %2700 = vmatpush1.bf16.msra.mxu1 %v6315_v38  ;;  %v6333_v38 = vld [vmem:[%s6967_s2 + $0x60] ss:$16 sps:$4 sm:$0xff]  }
 0x2fe   : > { %2660 = vmatprep.subr.bf16.mxu0 %v6321_v21  ;;  %2701 = vmatprep.subr.bf16.mxu1 %v6327_v57  ;;  %v6339_v21 = vld [vmem:[%s6967_s2 + $0x68] ss:$16 sps:$4 sm:$0xff]  }
 0x2ff   : > { %7457 = vst [vmem:[#allocation62_spill] sm:$0xff] %v6339_v21 }
 0x300   : > { %v2329_v62 = vpop.f32.mrb[36].mxu0  ;;  %v2370_v13 = vpop.f32.mrb[36].mxu1 }
 0x301   : > { %v2330_v7 = vadd.f32 %v2329_v62, %v2247_v29  ;;  %v2371_v51 = vadd.f32 %v2370_v13, %v2288_v40  ;;  %2661 = vmatpush1.bf16.msra.mxu0 %v6333_v38  ;;  %2702 = vmatpush1.bf16.msra.mxu1 %v6339_v21  ;;  %v2331_v22 = vpop.f32.mrb[37].mxu0  ;;  %v2372_v57 = vpop.f32.mrb[37].mxu1  ;;  %v6345_v62 = vld [vmem:[%s6967_s2 + $0x84] ss:$16 sps:$4 sm:$0xff]   ;;  %v6351_v13 = vld [vmem:[%s6967_s2 + $0x8c] ss:$16 sps:$4 sm:$0xff]  }
 0x302   : > { %v2332_v48 = vadd.f32 %v2331_v22, %v2249_v24  ;;  %v2373_v20 = vadd.f32 %v2372_v57, %v2290_v49  ;;  %v2333_v29 = vpop.f32.mrb[38].mxu0  ;;  %v2374_v40 = vpop.f32.mrb[38].mxu1  ;;  %2662 = vmatprep.subr.bf16.mxu0 %v6345_v62  ;;  %2703 = vmatprep.subr.bf16.mxu1 %v6351_v13 }
 0x303   : > { %v2377_v21 = vadd.f32 %v2330_v7, %v5787_v9  ;;  %v2334_v24 = vpop.f32.mrb[39].mxu0  ;;  %v2375_v49 = vpop.f32.mrb[39].mxu1  ;;  %v6359_v29 = vld [vmem:[%s6967_s2 + $0x80] ss:$16 sps:$4 sm:$0xff]   ;;  %v6365_v40 = vld [vmem:[%s6967_s2 + $0x88] ss:$16 sps:$4 sm:$0xff]  }
 0x304   : > { %v2378_v22 = vadd.f32 %v2332_v48, %v5791_v12  ;;  %v6371_v48 = vld [vmem:[%s6967_s2 + $0xa4] ss:$16 sps:$4 sm:$0xff]   ;;  %v6383_v24 = vld [vmem:[%s6967_s2 + $0xa0] ss:$16 sps:$4 sm:$0xff]   ;;  %v6389_v49 = vld [vmem:[%s6967_s2 + $0xa8] ss:$16 sps:$4 sm:$0xff]  }
 0x305   : > { %v3906_v57 = vmul.f32 -1.442695, %v2377_v21  ;;  %2663 = vmatpush1.bf16.msra.mxu0 %v6359_v29  ;;  %2704 = vmatpush1.bf16.msra.mxu1 %v6365_v40  ;;  %7458 = vst [vmem:[#allocation63_spill] sm:$0xff] %v6371_v48  ;;  %v6377_v21 = vld [vmem:[%s6967_s2 + $0xac] ss:$16 sps:$4 sm:$0xff]   ;;  %7460 = vst [vmem:[#allocation65_spill] sm:$0xff] %v6383_v24 }
 0x306   : > { %v3907_v7 = vmul.f32 -1.442695, %v2378_v22  ;;  %2664 = vmatprep.subr.bf16.mxu0 %v6371_v48  ;;  %7459 = vst [vmem:[#allocation64_spill] sm:$0xff] %v6377_v21  ;;  %2705 = vmatprep.subr.bf16.mxu1 %v6377_v21  ;;  %7461 = vst [vmem:[#allocation66_spill] sm:$0xff] %v6389_v49  ;;  %v2380_v22 = vadd.f32 %v2373_v20, %v5803_v17  ;;  %v6414_v20 = vld [vmem:[%s6967_s2 + $0xc8] ss:$16 sps:$4 sm:$0xff]  }
 0x307   : > { %4349 = vpow2.f32 %v3906_v57  ;;  %v6396_v57 = vld [vmem:[%s6967_s2 + $0xc4] ss:$16 sps:$4 sm:$0xff]   ;;  %7465 = vst [vmem:[#allocation70_spill] sm:$0xff] %v6414_v20 }
 0x308   : > { %4351 = vpow2.f32 %v3907_v7  ;;  %7462 = vst [vmem:[#allocation67_spill] sm:$0xff] %v6396_v57  ;;  %v6402_v7 = vld [vmem:[%s6967_s2 + $0xcc] ss:$16 sps:$4 sm:$0xff]   ;;  %v6420_v17 = vld [vmem:[%s6967_s2 + $0xe4] ss:$16 sps:$4 sm:$0xff]  }
 0x309   : > { %2665 = vmatpush1.bf16.msra.mxu0 %v6383_v24  ;;  %2706 = vmatpush1.bf16.msra.mxu1 %v6389_v49  ;;  %7463 = vst [vmem:[#allocation68_spill] sm:$0xff] %v6402_v7  ;;  %v6408_v49 = vld [vmem:[%s6967_s2 + $0xc0] ss:$16 sps:$4 sm:$0xff]   ;;  %7466 = vst [vmem:[#allocation71_spill] sm:$0xff] %v6420_v17 }
 0x30a   : > { %2666 = vmatprep.subr.bf16.mxu0 %v6396_v57  ;;  %2707 = vmatprep.subr.bf16.mxu1 %v6402_v7  ;;  %7464 = vst [vmem:[#allocation69_spill] sm:$0xff] %v6408_v49  ;;  %v3908_v57 = vmul.f32 -1.442695, %v2380_v22  ;;  %v2379_v7 = vadd.f32 %v2371_v51, %v5814_v50  ;;  %v6433_v22 = vld [vmem:[%s6967_s2 + $0xe0] ss:$16 sps:$4 sm:$0xff]  }
 0x30b   : > { %7468 = vst [vmem:[#allocation73_spill] sm:$0xff] %v6433_v22  ;;  %v6445_v51 = vld [vmem:[#allocation12 + $0xc] ss:$16 sps:$4 sm:$0xff]  }
 0x30c   : > { %4353 = vpow2.f32 %v3908_v57  ;;  %7471 = vst [vmem:[#allocation76_spill] sm:$0xff] %v6445_v51  ;;  %v6452_v57 = vld [vmem:[#allocation12] ss:$16 sps:$4 sm:$0xff]  }
 0x30d   : > { %2667 = vmatpush1.bf16.msra.mxu0 %v6408_v49  ;;  %2708 = vmatpush1.bf16.msra.mxu1 %v6414_v20  ;;  %v6426_v49 = vld [vmem:[%s6967_s2 + $0xec] ss:$16 sps:$4 sm:$0xff]   ;;  %4355 = vtanh.f32 %v2379_v7  ;;  %7472 = vst [vmem:[#allocation77_spill] sm:$0xff] %v6452_v57 }
 0x30e   : > { %2668 = vmatprep.subr.bf16.mxu0 %v6420_v17  ;;  %7467 = vst [vmem:[#allocation72_spill] sm:$0xff] %v6426_v49  ;;  %2709 = vmatprep.subr.bf16.mxu1 %v6426_v49  ;;  %v6439_v17 = vld [vmem:[%s6967_s2 + $0xe8] ss:$16 sps:$4 sm:$0xff]   ;;  %v6442_v49 = vld [vmem:[#allocation12 + $0x4] ss:$16 sps:$4 sm:$0xff]  }
 0x30f   : > { %7469 = vst [vmem:[#allocation74_spill] sm:$0xff] %v6439_v17  ;;  %7470 = vst [vmem:[#allocation75_spill] sm:$0xff] %v6442_v49  ;;  %v6461_v7 = vld [vmem:[#allocation12 + $0x2c] ss:$16 sps:$4 sm:$0xff]  }
 0x310   : > { %7475 = vst [vmem:[#allocation80_spill] sm:$0xff] %v6461_v7 }
 0x311   : > { %v4350_v20 = vpop.eup %4349  ;;  %2669 = vmatpush1.bf16.msra.mxu0 %v6433_v22  ;;  %2710 = vmatpush1.bf16.msra.mxu1 %v6439_v17 }
 0x312   : > { %v4352_v24 = vpop.eup %4351  ;;  %v2432_v21 = vadd.f32 1.0, %v4350_v20  ;;  %2740 = vmatprep.subr.bf16.mxu0 %v6442_v49  ;;  %2781 = vmatprep.subr.bf16.mxu1 %v6445_v51  ;;  %v6455_v20 = vld [vmem:[#allocation12 + $0x8] ss:$16 sps:$4 sm:$0xff]   ;;  %v6458_v51 = vld [vmem:[#allocation12 + $0x24] ss:$16 sps:$4 sm:$0xff]  }
 0x313   : > { %v2438_v22 = vadd.f32 1.0, %v4352_v24  ;;  %7473 = vst [vmem:[#allocation78_spill] sm:$0xff] %v6455_v20  ;;  %7474 = vst [vmem:[#allocation79_spill] sm:$0xff] %v6458_v51  ;;  %v6480_v24 = vld [vmem:[#allocation12 + $0x44] ss:$16 sps:$4 sm:$0xff]  }
 0x314   : > { %4357 = vrcp.f32 %v2432_v21  ;;  %2687 = vmatmul.mubr.bf16.vlgmr.msra.gmra.mrb[48].mxu0 %v6129_v32  ;;  %2728 = vmatmul.mubr.bf16.vlgmr.msra.gmra.mrb[48].mxu1 %v6129_v32  ;;  %v6474_v32 = vld [vmem:[#allocation12 + $0x20] ss:$16 sps:$4 sm:$0xff]   ;;  %v6477_v21 = vld [vmem:[#allocation12 + $0x28] ss:$16 sps:$4 sm:$0xff]   ;;  %7479 = vst [vmem:[#allocation83_spill] sm:$0xff] %v6480_v24 }
 0x315   : > { %4359 = vrcp.f32 %v2438_v22  ;;  %2741 = vmatpush1.bf16.msra.mxu0 %v6452_v57  ;;  %2782 = vmatpush1.bf16.msra.mxu1 %v6455_v20  ;;  %7477 = vst [vmem:[#allocation81_spill] sm:$0xff] %v6474_v32  ;;  %7478 = vst [vmem:[#allocation82_spill] sm:$0xff] %v6477_v21  ;;  %v6483_v22 = vld [vmem:[#allocation12 + $0x4c] ss:$16 sps:$4 sm:$0xff]   ;;  %v6488_v20 = vld [vmem:[#allocation12 + $0x40] ss:$16 sps:$4 sm:$0xff]  }
 0x316   : > { %2742 = vmatprep.subr.bf16.mxu0 %v6458_v51  ;;  %2783 = vmatprep.subr.bf16.mxu1 %v6461_v7  ;;  %7480 = vst [vmem:[#allocation84_spill] sm:$0xff] %v6483_v22  ;;  %v4354_v7 = vpop.eup %4353  ;;  %7481 = vst [vmem:[#allocation85_spill] sm:$0xff] %v6488_v20  ;;  %v6494_v57 = vld [vmem:[#allocation12 + $0x64] ss:$16 sps:$4 sm:$0xff]  }
 0x317   : > { %2772 = vmatprep.mubr.bf16.mxu0 %v7228_v3  ;;  %2813 = vmatprep.mubr.bf16.mxu1 %v7228_v3  ;;  %v4356_v51 = vpop.eup %4355  ;;  %7483 = vst [vmem:[#allocation87_spill] sm:$0xff] %v6494_v57  ;;  %v2445_v50 = vadd.f32 1.0, %v4354_v7  ;;  %v6517_v7 = vld [vmem:[#allocation12 + $0x80] ss:$16 sps:$4 sm:$0xff]  }
 0x318   : > { %7487 = vst [vmem:[#allocation91_spill] sm:$0xff] %v6517_v7 }
 0x319   : > { %2743 = vmatpush1.bf16.msra.mxu0 %v6474_v32  ;;  %2784 = vmatpush1.bf16.msra.mxu1 %v6477_v21  ;;  %v6491_v32 = vld [vmem:[#allocation12 + $0x48] ss:$16 sps:$4 sm:$0xff]   ;;  %4361 = vrcp.f32 %v2445_v50 }
 0x31a   : > { %2744 = vmatprep.subr.bf16.mxu0 %v6480_v24  ;;  %2785 = vmatprep.subr.bf16.mxu1 %v6483_v22  ;;  %7482 = vst [vmem:[#allocation86_spill] sm:$0xff] %v6491_v32  ;;  %v6497_v24 = vld [vmem:[#allocation12 + $0x6c] ss:$16 sps:$4 sm:$0xff]   ;;  %v2464_v22 = vstv %s3910_s29  ;;  %v6532_v50 = vld [vmem:[#allocation12 + $0xa8] ss:$16 sps:$4 sm:$0xff]  }
 0x31b   : > { %7484 = vst [vmem:[#allocation88_spill] sm:$0xff] %v6497_v24  ;;  %vm2465_vm5 = vcmp.eq.s32.totalorder %v2464_v22, 1  ;;  %7492 = vst [vmem:[#allocation96_spill] sm:$0xff] %v6532_v50  ;;  %v6574_v22 = vld [vmem:[#allocation10 + $0x8] ss:$16 sps:$4 sm:$0xff]  }
 0x31c   : > { %7500 = vst [vmem:[#allocation104_spill] sm:$0xff] %v6574_v22 }
 0x31d   : > { %2745 = vmatpush1.bf16.msra.mxu0 %v6488_v20  ;;  %2786 = vmatpush1.bf16.msra.mxu1 %v6491_v32  ;;  %v6501_v20 = vld [vmem:[#allocation12 + $0x60] ss:$16 sps:$4 sm:$0xff]   ;;  %v6504_v32 = vld [vmem:[#allocation12 + $0x68] ss:$16 sps:$4 sm:$0xff]  }
 0x31e   : > { %v4358_v21 = vpop.eup %4357  ;;  %2746 = vmatprep.subr.bf16.mxu0 %v6494_v57  ;;  %2787 = vmatprep.subr.bf16.mxu1 %v6497_v24  ;;  %v6507_v57 = vld [vmem:[#allocation12 + $0x84] ss:$16 sps:$4 sm:$0xff]   ;;  %v6510_v24 = vld [vmem:[#allocation12 + $0x8c] ss:$16 sps:$4 sm:$0xff]  }
 0x31f   : > { %v4360_v49 = vpop.eup %4359  ;;  %v2449_v17 = vmul.f32 %v4358_v21, %v4356_v51  ;;  %7485 = vst [vmem:[#allocation89_spill] sm:$0xff] %v6507_v57  ;;  %7486 = vst [vmem:[#allocation90_spill] sm:$0xff] %v6510_v24  ;;  %v6520_v21 = vld [vmem:[#allocation12 + $0x88] ss:$16 sps:$4 sm:$0xff]  }
 0x320   : > { %v2448_v48 = vmul.f32 %v4360_v49, %v5854_v36  ;;  %7488 = vst [vmem:[#allocation92_spill] sm:$0xff] %v6520_v21 }
 0x321   : > { %2747 = vmatpush1.bf16.msra.mxu0 %v6501_v20  ;;  %2788 = vmatpush1.bf16.msra.mxu1 %v6504_v32 }
 0x322   : > { %2748 = vmatprep.subr.bf16.mxu0 %v6507_v57  ;;  %2789 = vmatprep.subr.bf16.mxu1 %v6510_v24  ;;  %v2450_v51 = vadd.f32 %v2449_v17, %v2448_v48  ;;  %v6523_v57 = vld [vmem:[#allocation12 + $0xa4] ss:$16 sps:$4 sm:$0xff]   ;;  %v6526_v24 = vld [vmem:[#allocation12 + $0xac] ss:$16 sps:$4 sm:$0xff]   ;;  %v6529_v17 = vld [vmem:[#allocation12 + $0xa0] ss:$16 sps:$4 sm:$0xff]  }
 0x323   : > { %7489 = vst [vmem:[#allocation93_spill] sm:$0xff] %v6523_v57  ;;  %7490 = vst [vmem:[#allocation94_spill] sm:$0xff] %v6526_v24  ;;  %v6538_v48 = vld [vmem:[#allocation12 + $0xcc] ss:$16 sps:$4 sm:$0xff]  }
 0x324   : > { %4363 = vtanh.f32 %v2450_v51  ;;  %v6515_v49 = vsel %vm2465_vm5, %v2450_v51, %v5854_v36  ;;  %7491 = vst [vmem:[#allocation95_spill] sm:$0xff] %v6529_v17  ;;  %v6535_v36 = vld [vmem:[#allocation12 + $0xc4] ss:$16 sps:$4 sm:$0xff]   ;;  %7494 = vst [vmem:[#allocation98_spill] sm:$0xff] %v6538_v48  ;;  %v4362_v51 = vpop.eup %4361 }
 0x325   : > { %2749 = vmatpush1.bf16.msra.mxu0 %v6517_v7  ;;  %2790 = vmatpush1.bf16.msra.mxu1 %v6520_v21  ;;  %7493 = vst [vmem:[#allocation97_spill] sm:$0xff] %v6535_v36  ;;  %v6547_v21 = vld [vmem:[#allocation12 + $0xe4] ss:$16 sps:$4 sm:$0xff]   ;;  %v6556_v7 = vld [vmem:[#allocation12 + $0xe8] ss:$16 sps:$4 sm:$0xff]  }
 0x326   : > { %2750 = vmatprep.subr.bf16.mxu0 %v6523_v57  ;;  %2791 = vmatprep.subr.bf16.mxu1 %v6526_v24  ;;  %v6541_v57 = vld [vmem:[#allocation12 + $0xc0] ss:$16 sps:$4 sm:$0xff]   ;;  %v6544_v24 = vld [vmem:[#allocation12 + $0xc8] ss:$16 sps:$4 sm:$0xff]   ;;  %7497 = vst [vmem:[#allocation101_spill] sm:$0xff] %v6547_v21 }
 0x327   : > { %7495 = vst [vmem:[#allocation99_spill] sm:$0xff] %v6541_v57  ;;  %7496 = vst [vmem:[#allocation100_spill] sm:$0xff] %v6544_v24 }
 0x329   : > { %2751 = vmatpush1.bf16.msra.mxu0 %v6529_v17  ;;  %2792 = vmatpush1.bf16.msra.mxu1 %v6532_v50  ;;  %v6550_v50 = vld [vmem:[#allocation12 + $0xec] ss:$16 sps:$4 sm:$0xff]  }
 0x32a   : > { %2752 = vmatprep.subr.bf16.mxu0 %v6535_v36  ;;  %2793 = vmatprep.subr.bf16.mxu1 %v6538_v48  ;;  %v6553_v48 = vld [vmem:[#allocation12 + $0xe0] ss:$16 sps:$4 sm:$0xff]  }
 0x32d   : > { %2753 = vmatpush1.bf16.msra.mxu0 %v6541_v57  ;;  %2794 = vmatpush1.bf16.msra.mxu1 %v6544_v24  ;;  %v6563_v57 = vld [vmem:[#allocation10 + $0x4] ss:$16 sps:$4 sm:$0xff]  }
 0x32e   : > { %v4364_v17 = vpop.eup %4363  ;;  %2754 = vmatprep.subr.bf16.mxu0 %v6547_v21  ;;  %2795 = vmatprep.subr.bf16.mxu1 %v6550_v50  ;;  %v6566_v21 = vld [vmem:[#allocation10 + $0xc] ss:$16 sps:$4 sm:$0xff]  }
 0x32f   : > { %v2452_v36 = vmul.f32 %v4364_v17, %v4362_v51  ;;  %7498 = vst [vmem:[#allocation102_spill] sm:$0xff] %v6566_v21  ;;  %v6571_v51 = vld [vmem:[#allocation10] ss:$16 sps:$4 sm:$0xff]  }
 0x330   : > { %7499 = vst [vmem:[#allocation103_spill] sm:$0xff] %v6571_v51 }
 0x331   : > { %2755 = vmatpush1.bf16.msra.mxu0 %v6553_v48  ;;  %2796 = vmatpush1.bf16.msra.mxu1 %v6556_v7  ;;  %v6561_v24 = vsel %vm2465_vm5, %v2452_v36, %v5872_v47  ;;  %v6577_v47 = vld [vmem:[#allocation10 + $0x24] ss:$16 sps:$4 sm:$0xff]   ;;  %v6580_v36 = vld [vmem:[#allocation10 + $0x2c] ss:$16 sps:$4 sm:$0xff]  }
 0x332   : > { %2822 = vmatprep.subr.bf16.mxu0 %v6563_v57  ;;  %2863 = vmatprep.subr.bf16.mxu1 %v6566_v21  ;;  %v2480_v17 = vpack.c.bf16 %v6561_v24, %v6561_v24  ;;  %7501 = vst [vmem:[#allocation105_spill] sm:$0xff] %v6577_v47  ;;  %7502 = vst [vmem:[#allocation106_spill] sm:$0xff] %v6580_v36  ;;  %v6600_v21 = vld [vmem:[#allocation10 + $0x48] ss:$16 sps:$4 sm:$0xff]  }
 0x333   : > { %7508 = vst [vmem:[#allocation112_spill] sm:$0xff] %v6600_v21 }
 0x334   : > { %2773 = vmatmul.mubr.bf16.vlgmr.msra.gmra.mrb[52].mxu0 %v2480_v17  ;;  %2814 = vmatmul.mubr.bf16.vlgmr.msra.gmra.mrb[52].mxu1 %v2480_v17  ;;  %v6585_v17 = vld [vmem:[#allocation10 + $0x20] ss:$16 sps:$4 sm:$0xff]  }
 0x335   : > { %2823 = vmatpush1.bf16.msra.mxu0 %v6571_v51  ;;  %2864 = vmatpush1.bf16.msra.mxu1 %v6574_v22  ;;  %7503 = vst [vmem:[#allocation107_spill] sm:$0xff] %v6585_v17  ;;  %v6588_v51 = vld [vmem:[#allocation10 + $0x28] ss:$16 sps:$4 sm:$0xff]   ;;  %v6591_v22 = vld [vmem:[#allocation10 + $0x44] ss:$16 sps:$4 sm:$0xff]  }
 0x336   : > { %2824 = vmatprep.subr.bf16.mxu0 %v6577_v47  ;;  %2865 = vmatprep.subr.bf16.mxu1 %v6580_v36  ;;  %7504 = vst [vmem:[#allocation108_spill] sm:$0xff] %v6588_v51  ;;  %7505 = vst [vmem:[#allocation109_spill] sm:$0xff] %v6591_v22  ;;  %v6594_v47 = vld [vmem:[#allocation10 + $0x4c] ss:$16 sps:$4 sm:$0xff]   ;;  %v6597_v36 = vld [vmem:[#allocation10 + $0x40] ss:$16 sps:$4 sm:$0xff]  }
 0x337   : > { %2854 = vmatprep.mubr.bf16.mxu0 %v7228_v3  ;;  %2895 = vmatprep.mubr.bf16.mxu1 %v7228_v3  ;;  %7506 = vst [vmem:[#allocation110_spill] sm:$0xff] %v6594_v47  ;;  %7507 = vst [vmem:[#allocation111_spill] sm:$0xff] %v6597_v36 }
 0x339   : > { %2825 = vmatpush1.bf16.msra.mxu0 %v6585_v17  ;;  %2866 = vmatpush1.bf16.msra.mxu1 %v6588_v51  ;;  %v6603_v17 = vld [vmem:[#allocation10 + $0x64] ss:$16 sps:$4 sm:$0xff]   ;;  %v6606_v51 = vld [vmem:[#allocation10 + $0x6c] ss:$16 sps:$4 sm:$0xff]  }
 0x33a   : > { %2826 = vmatprep.subr.bf16.mxu0 %v6591_v22  ;;  %2867 = vmatprep.subr.bf16.mxu1 %v6594_v47  ;;  %7509 = vst [vmem:[#allocation113_spill] sm:$0xff] %v6603_v17  ;;  %7510 = vst [vmem:[#allocation114_spill] sm:$0xff] %v6606_v51  ;;  %v6609_v22 = vld [vmem:[#allocation10 + $0x60] ss:$16 sps:$4 sm:$0xff]   ;;  %v6612_v47 = vld [vmem:[#allocation10 + $0x68] ss:$16 sps:$4 sm:$0xff]  }
 0x33b   : > { %7511 = vst [vmem:[#allocation115_spill] sm:$0xff] %v6609_v22  ;;  %7512 = vst [vmem:[#allocation116_spill] sm:$0xff] %v6612_v47 }
 0x33d   : > { %2827 = vmatpush1.bf16.msra.mxu0 %v6597_v36  ;;  %2868 = vmatpush1.bf16.msra.mxu1 %v6600_v21  ;;  %v6615_v36 = vld [vmem:[#allocation10 + $0x84] ss:$16 sps:$4 sm:$0xff]   ;;  %v6618_v21 = vld [vmem:[#allocation10 + $0x8c] ss:$16 sps:$4 sm:$0xff]  }
 0x33e   : > { %2828 = vmatprep.subr.bf16.mxu0 %v6603_v17  ;;  %2869 = vmatprep.subr.bf16.mxu1 %v6606_v51  ;;  %7513 = vst [vmem:[#allocation117_spill] sm:$0xff] %v6615_v36  ;;  %7514 = vst [vmem:[#allocation118_spill] sm:$0xff] %v6618_v21  ;;  %v6621_v17 = vld [vmem:[#allocation10 + $0x80] ss:$16 sps:$4 sm:$0xff]   ;;  %v6624_v51 = vld [vmem:[#allocation10 + $0x88] ss:$16 sps:$4 sm:$0xff]  }
 0x33f   : > { %7515 = vst [vmem:[#allocation119_spill] sm:$0xff] %v6621_v17  ;;  %7516 = vst [vmem:[#allocation120_spill] sm:$0xff] %v6624_v51 }
 0x341   : > { %2829 = vmatpush1.bf16.msra.mxu0 %v6609_v22  ;;  %2870 = vmatpush1.bf16.msra.mxu1 %v6612_v47  ;;  %v6627_v22 = vld [vmem:[#allocation10 + $0xa4] ss:$16 sps:$4 sm:$0xff]   ;;  %v6630_v47 = vld [vmem:[#allocation10 + $0xac] ss:$16 sps:$4 sm:$0xff]  }
 0x342   : > { %2830 = vmatprep.subr.bf16.mxu0 %v6615_v36  ;;  %2871 = vmatprep.subr.bf16.mxu1 %v6618_v21  ;;  %7517 = vst [vmem:[#allocation121_spill] sm:$0xff] %v6627_v22  ;;  %7518 = vst [vmem:[#allocation122_spill] sm:$0xff] %v6630_v47  ;;  %v6633_v36 = vld [vmem:[#allocation10 + $0xa0] ss:$16 sps:$4 sm:$0xff]   ;;  %v6636_v21 = vld [vmem:[#allocation10 + $0xa8] ss:$16 sps:$4 sm:$0xff]  }
 0x343   : > { %7519 = vst [vmem:[#allocation123_spill] sm:$0xff] %v6633_v36  ;;  %7520 = vst [vmem:[#allocation124_spill] sm:$0xff] %v6636_v21 }
 0x345   : > { %2831 = vmatpush1.bf16.msra.mxu0 %v6621_v17  ;;  %2872 = vmatpush1.bf16.msra.mxu1 %v6624_v51  ;;  %v6639_v17 = vld [vmem:[#allocation10 + $0xc4] ss:$16 sps:$4 sm:$0xff]   ;;  %v6642_v51 = vld [vmem:[#allocation10 + $0xcc] ss:$16 sps:$4 sm:$0xff]  }
 0x346   : > { %2832 = vmatprep.subr.bf16.mxu0 %v6627_v22  ;;  %2873 = vmatprep.subr.bf16.mxu1 %v6630_v47  ;;  %7521 = vst [vmem:[#allocation125_spill] sm:$0xff] %v6639_v17  ;;  %7522 = vst [vmem:[#allocation126_spill] sm:$0xff] %v6642_v51  ;;  %v6645_v22 = vld [vmem:[#allocation10 + $0xc0] ss:$16 sps:$4 sm:$0xff]   ;;  %v6648_v47 = vld [vmem:[#allocation10 + $0xc8] ss:$16 sps:$4 sm:$0xff]  }
 0x349   : > { %2833 = vmatpush1.bf16.msra.mxu0 %v6633_v36  ;;  %2874 = vmatpush1.bf16.msra.mxu1 %v6636_v21  ;;  %v6651_v36 = vld [vmem:[#allocation10 + $0xe4] ss:$16 sps:$4 sm:$0xff]   ;;  %v6654_v21 = vld [vmem:[#allocation10 + $0xec] ss:$16 sps:$4 sm:$0xff]  }
 0x34a   : > { %2834 = vmatprep.subr.bf16.mxu0 %v6639_v17  ;;  %2875 = vmatprep.subr.bf16.mxu1 %v6642_v51  ;;  %v6657_v17 = vld [vmem:[#allocation10 + $0xe0] ss:$16 sps:$4 sm:$0xff]   ;;  %v6660_v51 = vld [vmem:[#allocation10 + $0xe8] ss:$16 sps:$4 sm:$0xff]  }
 0x34d   : > { %2835 = vmatpush1.bf16.msra.mxu0 %v6645_v22  ;;  %2876 = vmatpush1.bf16.msra.mxu1 %v6648_v47 }
 0x34e   : > { %2836 = vmatprep.subr.bf16.mxu0 %v6651_v36  ;;  %2877 = vmatprep.subr.bf16.mxu1 %v6654_v21 }
 0x351   : > { %2837 = vmatpush1.bf16.msra.mxu0 %v6657_v17  ;;  %2878 = vmatpush1.bf16.msra.mxu1 %v6660_v51 }
 0x352   : > { %3013 = vmatprep.subr.bf16.mxu0 %v5913_v59  ;;  %3054 = vmatprep.subr.bf16.mxu1 %v5919_v55  ;;  %v3911_v59 = vld [vmem:[%s4922_s16 + $0x40] sm:$0xff]  ;;  %v3912_v55 = vld [vmem:[%s4922_s16 + $0x48] sm:$0xff] }
 0x354   : > { %2855 = vmatmul.mubr.bf16.vlgmr.msra.gmra.mrb[56].mxu0 %v6252_v35  ;;  %2896 = vmatmul.mubr.bf16.vlgmr.msra.gmra.mrb[56].mxu1 %v6252_v35 }
 0x355   : > { %3014 = vmatpush1.bf16.msra.mxu0 %v5927_v56  ;;  %3055 = vmatpush1.bf16.msra.mxu1 %v5933_v60 }
 0x356   : > { %3015 = vmatprep.subr.bf16.mxu0 %v5939_v61  ;;  %3056 = vmatprep.subr.bf16.mxu1 %v5945_v63 }
 0x357   : > { %3045 = vmatprep.mubr.bf16.mxu0 %v7228_v3  ;;  %3086 = vmatprep.mubr.bf16.mxu1 %v7228_v3 }
 0x359   : > { %3016 = vmatpush1.bf16.msra.mxu0 %v5953_v0  ;;  %3057 = vmatpush1.bf16.msra.mxu1 %v5959_v37 }
 0x35a   : > { %3017 = vmatprep.subr.bf16.mxu0 %v5965_v58  ;;  %3058 = vmatprep.subr.bf16.mxu1 %v5971_v28 }
 0x35d   : > { %3018 = vmatpush1.bf16.msra.mxu0 %v5977_v4  ;;  %3059 = vmatpush1.bf16.msra.mxu1 %v5983_v5 }
 0x35e   : > { %3019 = vmatprep.subr.bf16.mxu0 %v5989_v6  ;;  %3060 = vmatprep.subr.bf16.mxu1 %v5995_v8 }
 0x361   : > { %3020 = vmatpush1.bf16.msra.mxu0 %v6001_v10  ;;  %3061 = vmatpush1.bf16.msra.mxu1 %v6007_v11  ;;  %v3914_v10 = vld [vmem:[%s4922_s16 + $0x58] sm:$0xff] }
 0x362   : > { %3021 = vmatprep.subr.bf16.mxu0 %v6013_v34  ;;  %3062 = vmatprep.subr.bf16.mxu1 %v6019_v26  ;;  %v3913_v34 = vld [vmem:[%s4922_s16 + $0x50] sm:$0xff]  ;;  %v7523_v26 = vld [vmem:[#allocation17_spill] sm:$0xff] }
 0x363   : > { %v2520_v56 = vpop.f32.mrb[40].mxu0  ;;  %v2561_v60 = vpop.f32.mrb[40].mxu1 }
 0x364   : > { %v2568_v61 = vadd.f32 %v3911_v59, %v2520_v56  ;;  %v2522_v63 = vpop.f32.mrb[41].mxu0  ;;  %v2563_v0 = vpop.f32.mrb[41].mxu1 }
 0x365   : > { %v2569_v37 = vadd.f32 %v3912_v55, %v2522_v63  ;;  %v2524_v58 = vpop.f32.mrb[42].mxu0  ;;  %v2565_v28 = vpop.f32.mrb[42].mxu1  ;;  %3022 = vmatpush1.bf16.msra.mxu0 %v6025_v2  ;;  %3063 = vmatpush1.bf16.msra.mxu1 %v6031_v15  ;;  %v2571_v11 = vadd.f32 %v3914_v10, %v2563_v0  ;;  %v7524_v2 = vld [vmem:[#allocation18_spill] sm:$0xff] }
 0x366   : > { %v3915_v4 = vmul.f32 -1.442695, %v2568_v61  ;;  %v2525_v5 = vpop.f32.mrb[43].mxu0  ;;  %v2566_v6 = vpop.f32.mrb[43].mxu1  ;;  %3023 = vmatprep.subr.bf16.mxu0 %v6037_v42  ;;  %3064 = vmatprep.subr.bf16.mxu1 %v6043_v39  ;;  %v2570_v42 = vadd.f32 %v3913_v34, %v2561_v60  ;;  %v7525_v39 = vld [vmem:[#allocation19_spill] sm:$0xff]  ;;  %v2981_v60 = vstv %s2980_s18  ;;  %v7530_v34 = vld [vmem:[#allocation24_spill] sm:$0xff] }
 0x367   : > { %v3916_v8 = vmul.f32 -1.442695, %v2569_v37  ;;  %v3917_v15 = vmul.f32 -1.442695, %v2571_v11  ;;  %vm2982_vm6 = vcmp.eq.s32.totalorder %v2981_v60, 1  ;;  %v7529_v11 = vld [vmem:[#allocation23_spill] sm:$0xff] }
 0x368   : > { %4365 = vpow2.f32 %v3915_v4  ;;  %v7548_v60 = vld [vmem:[#allocation42_spill] sm:$0xff] }
 0x369   : > { %4367 = vpow2.f32 %v3916_v8  ;;  %3024 = vmatpush1.bf16.msra.mxu0 %v6049_v43  ;;  %3065 = vmatpush1.bf16.msra.mxu1 %v6055_v45  ;;  %v7526_v43 = vld [vmem:[#allocation20_spill] sm:$0xff] }
 0x36a   : > { %3025 = vmatprep.subr.bf16.mxu0 %v6061_v46  ;;  %3066 = vmatprep.subr.bf16.mxu1 %v6067_v14  ;;  %v7527_v46 = vld [vmem:[#allocation21_spill] sm:$0xff]  ;;  %v7528_v14 = vld [vmem:[#allocation22_spill] sm:$0xff]  ;;  %4369 = vpow2.f32 %v3917_v15 }
 0x36b   : > { %4371 = vtanh.f32 %v2570_v42  ;;  %v7535_v15 = vld [vmem:[#allocation30_spill] sm:$0xff]  ;;  %v7536_v42 = vld [vmem:[#allocation28_spill] sm:$0xff] }
 0x36d   : > { %3026 = vmatpush1.bf16.msra.mxu0 %v6073_v16  ;;  %3067 = vmatpush1.bf16.msra.mxu1 %v6079_v18 }
 0x36e   : > { %3027 = vmatprep.subr.bf16.mxu0 %v7523_v26  ;;  %3068 = vmatprep.subr.bf16.mxu1 %v7524_v2  ;;  %v7532_v26 = vld [vmem:[#allocation26_spill] sm:$0xff]  ;;  %v7534_v2 = vld [vmem:[#allocation29_spill] sm:$0xff] }
 0x371   : > { %3028 = vmatpush1.bf16.msra.mxu0 %v7525_v39  ;;  %3069 = vmatpush1.bf16.msra.mxu1 %v7526_v43  ;;  %v7537_v39 = vld [vmem:[#allocation31_spill] sm:$0xff]  ;;  %v7538_v43 = vld [vmem:[#allocation32_spill] sm:$0xff] }
 0x372   : > { %v4366_v45 = vpop.eup %4365  ;;  %3099 = vmatprep.subr.bf16.mxu0 %v7527_v46  ;;  %3140 = vmatprep.subr.bf16.mxu1 %v7528_v14  ;;  %v7540_v46 = vld [vmem:[#allocation34_spill] sm:$0xff]  ;;  %v7541_v14 = vld [vmem:[#allocation35_spill] sm:$0xff] }
 0x373   : > { %v4368_v35 = vpop.eup %4367  ;;  %v2911_v16 = vadd.f32 1.0, %v4366_v45  ;;  %v7539_v45 = vld [vmem:[#allocation33_spill] sm:$0xff] }
 0x374   : > { %v2917_v18 = vadd.f32 1.0, %v4368_v35  ;;  %v4370_v59 = vpop.eup %4369  ;;  %v7542_v35 = vld [vmem:[#allocation36_spill] sm:$0xff] }
 0x375   : > { %4373 = vrcp.f32 %v2911_v16  ;;  %v4372_v55 = vpop.eup %4371  ;;  %v2924_v0 = vadd.f32 1.0, %v4370_v59  ;;  %v7543_v16 = vld [vmem:[#allocation37_spill] sm:$0xff]  ;;  %v7545_v59 = vld [vmem:[#allocation39_spill] sm:$0xff] }
 0x376   : > { %4375 = vrcp.f32 %v2917_v18  ;;  %v7544_v18 = vld [vmem:[#allocation38_spill] sm:$0xff] }
 0x377   : > { %4377 = vrcp.f32 %v2924_v0  ;;  %v7551_v0 = vld [vmem:[#allocation45_spill] sm:$0xff] }
 0x37f   : > { %v4374_v56 = vpop.eup %4373 }
 0x380   : > { %v4376_v61 = vpop.eup %4375  ;;  %v2928_v63 = vmul.f32 %v4374_v56, %v4372_v55  ;;  %v7546_v55 = vld [vmem:[#allocation40_spill] sm:$0xff]  ;;  %v7547_v56 = vld [vmem:[#allocation41_spill] sm:$0xff] }
 0x381   : > { %v2927_v37 = vmul.f32 %v4376_v61, %v6122_v19  ;;  %v4378_v4 = vpop.eup %4377  ;;  %v7549_v61 = vld [vmem:[#allocation43_spill] sm:$0xff] }
 0x383   : > { %v2929_v58 = vadd.f32 %v2928_v63, %v2927_v37  ;;  %v7550_v63 = vld [vmem:[#allocation44_spill] sm:$0xff]  ;;  %v7552_v37 = vld [vmem:[#allocation46_spill] sm:$0xff] }
 0x385   : > { %4379 = vtanh.f32 %v2929_v58  ;;  %v6711_v28 = vsel %vm2982_vm6, %v2929_v58, %v6122_v19  ;;  %v7531_v19 = vld [vmem:[#allocation25_spill] sm:$0xff]  ;;  %v7553_v58 = vld [vmem:[#allocation47_spill] sm:$0xff] }
 0x38f   : > { %v4380_v5 = vpop.eup %4379 }
 0x390   : > { %v2931_v6 = vmul.f32 %v4380_v5, %v4378_v4  ;;  %v7554_v4 = vld [vmem:[#allocation48_spill] sm:$0xff]  ;;  %v7555_v5 = vld [vmem:[#allocation49_spill] sm:$0xff] }
 0x392   : > { %v6714_v8 = vsel %vm2982_vm6, %v2931_v6, %v6125_v30  ;;  %v7533_v30 = vld [vmem:[#allocation27_spill] sm:$0xff]  ;;  %v7556_v6 = vld [vmem:[#allocation50_spill] sm:$0xff] }
 0x393   : > { %v6718_v10 = vpack.c.bf16 %v6714_v8, %v6714_v8 }
 0x395   : > { %3046 = vmatmul.mubr.bf16.vlgmr.msra.gmra.mrb[60].mxu0 %v6718_v10  ;;  %3087 = vmatmul.mubr.bf16.vlgmr.msra.gmra.mrb[60].mxu1 %v6718_v10 }
 0x396   : > { %3100 = vmatpush1.bf16.msra.mxu0 %v7529_v11  ;;  %3141 = vmatpush1.bf16.msra.mxu1 %v7530_v34  ;;  %v7557_v11 = vld [vmem:[#allocation51_spill] sm:$0xff]  ;;  %v7558_v34 = vld [vmem:[#allocation52_spill] sm:$0xff] }
 0x397   : > { %3101 = vmatprep.subr.bf16.mxu0 %v7531_v19  ;;  %3142 = vmatprep.subr.bf16.mxu1 %v7532_v26  ;;  %v7559_v19 = vld [vmem:[#allocation53_spill] sm:$0xff]  ;;  %v7560_v26 = vld [vmem:[#allocation54_spill] sm:$0xff] }
 0x398   : > { %3131 = vmatprep.mubr.bf16.mxu0 %v7228_v3  ;;  %3172 = vmatprep.mubr.bf16.mxu1 %v7228_v3 }
 0x39a   : > { %3102 = vmatpush1.bf16.msra.mxu0 %v7533_v30  ;;  %3143 = vmatpush1.bf16.msra.mxu1 %v7534_v2 }
 0x39b   : > { %3103 = vmatprep.subr.bf16.mxu0 %v7535_v15  ;;  %3144 = vmatprep.subr.bf16.mxu1 %v7536_v42 }
 0x39e   : > { %3104 = vmatpush1.bf16.msra.mxu0 %v7537_v39  ;;  %3145 = vmatpush1.bf16.msra.mxu1 %v7538_v43 }
 0x39f   : > { %3105 = vmatprep.subr.bf16.mxu0 %v7539_v45  ;;  %3146 = vmatprep.subr.bf16.mxu1 %v7540_v46 }
 0x3a2   : > { %3106 = vmatpush1.bf16.msra.mxu0 %v7541_v14  ;;  %3147 = vmatpush1.bf16.msra.mxu1 %v7542_v35 }
 0x3a3   : > { %3107 = vmatprep.subr.bf16.mxu0 %v7543_v16  ;;  %3148 = vmatprep.subr.bf16.mxu1 %v7544_v18 }
 0x3a6   : > { %3108 = vmatpush1.bf16.msra.mxu0 %v7545_v59  ;;  %3149 = vmatpush1.bf16.msra.mxu1 %v7546_v55 }
 0x3a7   : > { %3109 = vmatprep.subr.bf16.mxu0 %v7547_v56  ;;  %3150 = vmatprep.subr.bf16.mxu1 %v7548_v60 }
 0x3aa   : > { %3110 = vmatpush1.bf16.msra.mxu0 %v7549_v61  ;;  %3151 = vmatpush1.bf16.msra.mxu1 %v7550_v63 }
 0x3ab   : > { %3111 = vmatprep.subr.bf16.mxu0 %v7551_v0  ;;  %3152 = vmatprep.subr.bf16.mxu1 %v7552_v37 }
 0x3ae   : > { %3112 = vmatpush1.bf16.msra.mxu0 %v7553_v58  ;;  %3153 = vmatpush1.bf16.msra.mxu1 %v7554_v4 }
 0x3af   : > { %3113 = vmatprep.subr.bf16.mxu0 %v7555_v5  ;;  %3154 = vmatprep.subr.bf16.mxu1 %v7556_v6 }
 0x3b2   : > { %3114 = vmatpush1.bf16.msra.mxu0 %v7557_v11  ;;  %3155 = vmatpush1.bf16.msra.mxu1 %v7558_v34 }
 0x3b3   : > { %3181 = vmatprep.subr.bf16.mxu0 %v7559_v19  ;;  %3222 = vmatprep.subr.bf16.mxu1 %v7560_v26 }
 0x3c7   : > { %v2606_v30 = vpop.f32.mrb[44].mxu0  ;;  %v2647_v2 = vpop.f32.mrb[44].mxu1 }
 0x3c8   : > { %v2608_v15 = vpop.f32.mrb[45].mxu0  ;;  %v2649_v42 = vpop.f32.mrb[45].mxu1 }
 0x3c9   : > { %v2610_v39 = vpop.f32.mrb[46].mxu0  ;;  %v2651_v43 = vpop.f32.mrb[46].mxu1 }
 0x3ca   : > { %v2611_v45 = vpop.f32.mrb[47].mxu0  ;;  %v2652_v46 = vpop.f32.mrb[47].mxu1 }
 0x3cb   : > { %v2986_v45 = vstv %s3924_s21 }
 0x3cc   : > { %vm2987_vm7 = vcmp.eq.s32.totalorder %v2986_v45, 1 }
 0x3e7   : > { %v2688_v14 = vpop.f32.mrb[48].mxu0  ;;  %v2729_v35 = vpop.f32.mrb[48].mxu1 }
 0x3e8   : > { %v2689_v16 = vadd.f32 %v2688_v14, %v2606_v30  ;;  %v2730_v18 = vadd.f32 %v2729_v35, %v2647_v2  ;;  %v2690_v59 = vpop.f32.mrb[49].mxu0  ;;  %v2731_v55 = vpop.f32.mrb[49].mxu1 }
 0x3e9   : > { %v2691_v56 = vadd.f32 %v2690_v59, %v2608_v15  ;;  %v2732_v60 = vadd.f32 %v2731_v55, %v2649_v42  ;;  %v2692_v61 = vpop.f32.mrb[50].mxu0  ;;  %v2733_v63 = vpop.f32.mrb[50].mxu1 }
 0x3ea   : > { %v2736_v0 = vadd.f32 %v2689_v16, %v5715_v41  ;;  %v2693_v37 = vpop.f32.mrb[51].mxu0  ;;  %v2734_v58 = vpop.f32.mrb[51].mxu1  ;;  %v2738_v19 = vadd.f32 %v2730_v18, %v5744_v31 }
 0x3eb   : > { %v2737_v4 = vadd.f32 %v2691_v56, %v5721_v44  ;;  %v2739_v11 = vadd.f32 %v2732_v60, %v5734_v25 }
 0x3ec   : > { %v3918_v5 = vmul.f32 -1.442695, %v2736_v0 }
 0x3ed   : > { %v3919_v6 = vmul.f32 -1.442695, %v2737_v4  ;;  %v3920_v34 = vmul.f32 -1.442695, %v2739_v11 }
 0x3ee   : > { %4381 = vpow2.f32 %v3918_v5 }
 0x3ef   : > { %4383 = vpow2.f32 %v3919_v6 }
 0x3f0   : > { %4385 = vpow2.f32 %v3920_v34 }
 0x3f1   : > { %4387 = vtanh.f32 %v2738_v19  ;;  %v7563_v19 = vld [vmem:[#allocation57_spill] sm:$0xff] }
 0x3f8   : > { %v4382_v26 = vpop.eup %4381 }
 0x3f9   : > { %v4384_v30 = vpop.eup %4383  ;;  %v2935_v2 = vadd.f32 1.0, %v4382_v26  ;;  %v7564_v26 = vld [vmem:[#allocation58_spill] sm:$0xff] }
 0x3fa   : > { %v2941_v15 = vadd.f32 1.0, %v4384_v30  ;;  %v4386_v42 = vpop.eup %4385 }
 0x3fb   : > { %4389 = vrcp.f32 %v2935_v2  ;;  %v4388_v39 = vpop.eup %4387  ;;  %v2948_v35 = vadd.f32 1.0, %v4386_v42 }
 0x3fc   : > { %4391 = vrcp.f32 %v2941_v15 }
 0x3fd   : > { %4393 = vrcp.f32 %v2948_v35 }
 0x405   : > { %v4390_v43 = vpop.eup %4389 }
 0x406   : > { %v4392_v46 = vpop.eup %4391  ;;  %v2952_v14 = vmul.f32 %v4390_v43, %v4388_v39 }
 0x407   : > { %v2951_v16 = vmul.f32 %v4392_v46, %v6245_v1  ;;  %v2774_v18 = vpop.f32.mrb[52].mxu0  ;;  %v2815_v59 = vpop.f32.mrb[52].mxu1 }
 0x408   : > { %v2776_v55 = vpop.f32.mrb[53].mxu0  ;;  %v2817_v56 = vpop.f32.mrb[53].mxu1 }
 0x409   : > { %v2778_v60 = vpop.f32.mrb[54].mxu0  ;;  %v2819_v61 = vpop.f32.mrb[54].mxu1  ;;  %v2953_v63 = vadd.f32 %v2952_v14, %v2951_v16 }
 0x40a   : > { %v2779_v0 = vpop.f32.mrb[55].mxu0  ;;  %v2820_v37 = vpop.f32.mrb[55].mxu1  ;;  %v7573_v61 = vld [vmem:[#allocation15_spill] sm:$0xff] }
 0x40b   : > { %4395 = vtanh.f32 %v2953_v63  ;;  %v6764_v58 = vsel %vm2987_vm7, %v2953_v63, %v6245_v1  ;;  %v4394_v4 = vpop.eup %4393  ;;  %v7561_v1 = vld [vmem:[#allocation55_spill] sm:$0xff]  ;;  %v7575_v37 = vld [vmem:[#allocation68_spill] sm:$0xff] }
 0x40c   : > { %v7574_v0 = vld [vmem:[#allocation67_spill] sm:$0xff] }
 0x415   : > { %v4396_v5 = vpop.eup %4395 }
 0x416   : > { %v2955_v6 = vmul.f32 %v4396_v5, %v4394_v4  ;;  %v7578_v5 = vld [vmem:[#allocation71_spill] sm:$0xff] }
 0x418   : > { %v6767_v11 = vsel %vm2987_vm7, %v2955_v6, %v6248_v33  ;;  %v7562_v33 = vld [vmem:[#allocation56_spill] sm:$0xff] }
 0x419   : > { %v6771_v34 = vpack.c.bf16 %v6767_v11, %v6767_v11  ;;  %v7579_v6 = vld [vmem:[#allocation72_spill] sm:$0xff] }
 0x41b   : > { %3132 = vmatmul.mubr.bf16.vlgmr.msra.gmra.mrb[64].mxu0 %v6771_v34  ;;  %3173 = vmatmul.mubr.bf16.vlgmr.msra.gmra.mrb[64].mxu1 %v6771_v34 }
 0x41c   : > { %3182 = vmatpush1.bf16.msra.mxu0 %v6259_v23  ;;  %3223 = vmatpush1.bf16.msra.mxu1 %v6265_v53  ;;  %v7565_v23 = vld [vmem:[#allocation59_spill] sm:$0xff]  ;;  %v7566_v53 = vld [vmem:[#allocation60_spill] sm:$0xff] }
 0x41d   : > { %3183 = vmatprep.subr.bf16.mxu0 %v6271_v54  ;;  %3224 = vmatprep.subr.bf16.mxu1 %v6277_v52  ;;  %v7567_v54 = vld [vmem:[#allocation61_spill] sm:$0xff] }
 0x41e   : > { %3213 = vmatprep.mubr.bf16.mxu0 %v7228_v3  ;;  %3254 = vmatprep.mubr.bf16.mxu1 %v7228_v3 }
 0x420   : > { %3184 = vmatpush1.bf16.msra.mxu0 %v6285_v27  ;;  %3225 = vmatpush1.bf16.msra.mxu1 %v7561_v1  ;;  %v7568_v27 = vld [vmem:[#allocation62_spill] sm:$0xff]  ;;  %v7580_v1 = vld [vmem:[#allocation16_spill] sm:$0xff] }
 0x421   : > { %3185 = vmatprep.subr.bf16.mxu0 %v7562_v33  ;;  %3226 = vmatprep.subr.bf16.mxu1 %v7563_v19 }
 0x424   : > { %3186 = vmatpush1.bf16.msra.mxu0 %v7564_v26  ;;  %3227 = vmatpush1.bf16.msra.mxu1 %v7565_v23  ;;  %v7581_v26 = vld [vmem:[#allocation73_spill] sm:$0xff]  ;;  %v7582_v23 = vld [vmem:[#allocation74_spill] sm:$0xff] }
 0x425   : > { %3187 = vmatprep.subr.bf16.mxu0 %v7566_v53  ;;  %3228 = vmatprep.subr.bf16.mxu1 %v7567_v54 }
 0x427   : > { %v2856_v52 = vpop.f32.mrb[56].mxu0  ;;  %v2897_v30 = vpop.f32.mrb[56].mxu1 }
 0x428   : > { %v2857_v2 = vadd.f32 %v2856_v52, %v2774_v18  ;;  %v2898_v15 = vadd.f32 %v2897_v30, %v2815_v59  ;;  %3188 = vmatpush1.bf16.msra.mxu0 %v6333_v38  ;;  %3229 = vmatpush1.bf16.msra.mxu1 %v7568_v27  ;;  %v2858_v42 = vpop.f32.mrb[57].mxu0  ;;  %v2899_v39 = vpop.f32.mrb[57].mxu1  ;;  %v7583_v52 = vld [vmem:[#allocation75_spill] sm:$0xff]  ;;  %v7584_v30 = vld [vmem:[#allocation76_spill] sm:$0xff]  ;;  %v7586_v27 = vld [vmem:[#allocation78_spill] sm:$0xff] }
 0x429   : > { %v2859_v43 = vadd.f32 %v2858_v42, %v2776_v55  ;;  %v2900_v45 = vadd.f32 %v2899_v39, %v2817_v56  ;;  %v2860_v46 = vpop.f32.mrb[58].mxu0  ;;  %v2901_v14 = vpop.f32.mrb[58].mxu1  ;;  %3189 = vmatprep.subr.bf16.mxu0 %v6345_v62  ;;  %3230 = vmatprep.subr.bf16.mxu1 %v6351_v13  ;;  %v7569_v55 = vld [vmem:[#allocation63_spill] sm:$0xff]  ;;  %v7570_v56 = vld [vmem:[#allocation64_spill] sm:$0xff]  ;;  %v7571_v62 = vld [vmem:[#allocation65_spill] sm:$0xff] }
 0x42a   : > { %v2904_v35 = vadd.f32 %v2857_v2, %v5787_v9  ;;  %v2861_v16 = vpop.f32.mrb[59].mxu0  ;;  %v2902_v60 = vpop.f32.mrb[59].mxu1  ;;  %v7572_v13 = vld [vmem:[#allocation66_spill] sm:$0xff]  ;;  %v2906_v33 = vadd.f32 %v2898_v15, %v7580_v1  ;;  %v7585_v15 = vld [vmem:[#allocation77_spill] sm:$0xff]  ;;  %v7587_v42 = vld [vmem:[#allocation79_spill] sm:$0xff] }
 0x42b   : > { %v2905_v18 = vadd.f32 %v2859_v43, %v5791_v12  ;;  %v2907_v63 = vadd.f32 %v2900_v45, %v7573_v61  ;;  %v7588_v39 = vld [vmem:[#allocation80_spill] sm:$0xff]  ;;  %v7590_v43 = vld [vmem:[#allocation81_spill] sm:$0xff]  ;;  %v7592_v45 = vld [vmem:[#allocation83_spill] sm:$0xff] }
 0x42c   : > { %v3921_v59 = vmul.f32 -1.442695, %v2904_v35  ;;  %3190 = vmatpush1.bf16.msra.mxu0 %v6359_v29  ;;  %3231 = vmatpush1.bf16.msra.mxu1 %v6365_v40  ;;  %v7576_v29 = vld [vmem:[#allocation69_spill] sm:$0xff]  ;;  %v7577_v40 = vld [vmem:[#allocation70_spill] sm:$0xff]  ;;  %v7593_v46 = vld [vmem:[#allocation84_spill] sm:$0xff] }
 0x42d   : > { %v3922_v38 = vmul.f32 -1.442695, %v2905_v18  ;;  %3191 = vmatprep.subr.bf16.mxu0 %v7569_v55  ;;  %3232 = vmatprep.subr.bf16.mxu1 %v7570_v56  ;;  %v3923_v4 = vmul.f32 -1.442695, %v2907_v63  ;;  %v7594_v16 = vld [vmem:[#allocation85_spill] sm:$0xff]  ;;  %v7595_v60 = vld [vmem:[#allocation86_spill] sm:$0xff]  ;;  %v2991_v55 = vstv %s3925_s24 }
 0x42e   : > { %4397 = vpow2.f32 %v3921_v59  ;;  %v7596_v59 = vld [vmem:[#allocation87_spill] sm:$0xff]  ;;  %vm2992_vm8 = vcmp.eq.s32.totalorder %v2991_v55, 1  ;;  %v7626_v55 = vld [vmem:[#allocation117_spill] sm:$0xff] }
 0x42f   : > { %4399 = vpow2.f32 %v3922_v38  ;;  %v7597_v38 = vld [vmem:[#allocation88_spill] sm:$0xff] }
 0x430   : > { %3192 = vmatpush1.bf16.msra.mxu0 %v7571_v62  ;;  %3233 = vmatpush1.bf16.msra.mxu1 %v7572_v13  ;;  %4401 = vpow2.f32 %v3923_v4  ;;  %v7600_v4 = vld [vmem:[#allocation91_spill] sm:$0xff] }
 0x431   : > { %3193 = vmatprep.subr.bf16.mxu0 %v7574_v0  ;;  %3234 = vmatprep.subr.bf16.mxu1 %v7575_v37  ;;  %4403 = vtanh.f32 %v2906_v33  ;;  %v7598_v0 = vld [vmem:[#allocation89_spill] sm:$0xff]  ;;  %v7599_v37 = vld [vmem:[#allocation90_spill] sm:$0xff]  ;;  %v7605_v33 = vld [vmem:[#allocation96_spill] sm:$0xff] }
 0x434   : > { %3194 = vmatpush1.bf16.msra.mxu0 %v7576_v29  ;;  %3235 = vmatpush1.bf16.msra.mxu1 %v7577_v40 }
 0x435   : > { %3195 = vmatprep.subr.bf16.mxu0 %v7578_v5  ;;  %3236 = vmatprep.subr.bf16.mxu1 %v7579_v6  ;;  %v7601_v5 = vld [vmem:[#allocation92_spill] sm:$0xff]  ;;  %v7602_v6 = vld [vmem:[#allocation93_spill] sm:$0xff] }
 0x438   : > { %v4398_v19 = vpop.eup %4397  ;;  %3196 = vmatpush1.bf16.msra.mxu0 %v7581_v26  ;;  %3237 = vmatpush1.bf16.msra.mxu1 %v7582_v23  ;;  %v7607_v26 = vld [vmem:[#allocation98_spill] sm:$0xff] }
 0x439   : > { %v4400_v53 = vpop.eup %4399  ;;  %v2959_v54 = vadd.f32 1.0, %v4398_v19  ;;  %3267 = vmatprep.subr.bf16.mxu0 %v7583_v52  ;;  %3308 = vmatprep.subr.bf16.mxu1 %v7584_v30  ;;  %v7606_v19 = vld [vmem:[#allocation97_spill] sm:$0xff] }
 0x43a   : > { %v2965_v2 = vadd.f32 1.0, %v4400_v53  ;;  %v4402_v14 = vpop.eup %4401  ;;  %v7608_v53 = vld [vmem:[#allocation99_spill] sm:$0xff]  ;;  %v7610_v52 = vld [vmem:[#allocation101_spill] sm:$0xff] }
 0x43b   : > { %4405 = vrcp.f32 %v2959_v54  ;;  %3214 = vmatmul.mubr.bf16.vlgmr.msra.gmra.mrb[68].mxu0 %v6718_v10  ;;  %3255 = vmatmul.mubr.bf16.vlgmr.msra.gmra.mrb[68].mxu1 %v6718_v10  ;;  %v7591_v10 = vld [vmem:[#allocation82_spill] sm:$0xff]  ;;  %v4404_v35 = vpop.eup %4403  ;;  %v2972_v13 = vadd.f32 1.0, %v4402_v14 }
 0x43c   : > { %4407 = vrcp.f32 %v2965_v2  ;;  %3268 = vmatpush1.bf16.msra.mxu0 %v7585_v15  ;;  %3309 = vmatpush1.bf16.msra.mxu1 %v7586_v27  ;;  %v7611_v15 = vld [vmem:[#allocation102_spill] sm:$0xff] }
 0x43d   : > { %3269 = vmatprep.subr.bf16.mxu0 %v7587_v42  ;;  %3310 = vmatprep.subr.bf16.mxu1 %v7588_v39  ;;  %4409 = vrcp.f32 %v2972_v13  ;;  %v7615_v42 = vld [vmem:[#allocation106_spill] sm:$0xff]  ;;  %v7618_v39 = vld [vmem:[#allocation109_spill] sm:$0xff] }
 0x43e   : > { %3299 = vmatprep.mubr.bf16.mxu0 %v7228_v3  ;;  %3340 = vmatprep.mubr.bf16.mxu1 %v7228_v3  ;;  %v7623_v14 = vld [vmem:[#allocation114_spill] sm:$0xff] }
 0x440   : > { %3270 = vmatpush1.bf16.msra.mxu0 %v7590_v43  ;;  %3311 = vmatpush1.bf16.msra.mxu1 %v7591_v10  ;;  %v7619_v43 = vld [vmem:[#allocation110_spill] sm:$0xff]  ;;  %v7620_v10 = vld [vmem:[#allocation111_spill] sm:$0xff] }
 0x441   : > { %3271 = vmatprep.subr.bf16.mxu0 %v7592_v45  ;;  %3312 = vmatprep.subr.bf16.mxu1 %v7593_v46  ;;  %v7621_v45 = vld [vmem:[#allocation112_spill] sm:$0xff]  ;;  %v7622_v46 = vld [vmem:[#allocation113_spill] sm:$0xff] }
 0x444   : > { %3272 = vmatpush1.bf16.msra.mxu0 %v7594_v16  ;;  %3313 = vmatpush1.bf16.msra.mxu1 %v7595_v60  ;;  %v3927_v16 = vld [vmem:[%s4922_s16 + $0x68] sm:$0xff]  ;;  %v7624_v60 = vld [vmem:[#allocation115_spill] sm:$0xff] }
 0x445   : > { %v4406_v18 = vpop.eup %4405  ;;  %3273 = vmatprep.subr.bf16.mxu0 %v7596_v59  ;;  %3314 = vmatprep.subr.bf16.mxu1 %v7597_v38 }
 0x446   : > { %v4408_v56 = vpop.eup %4407  ;;  %v2976_v62 = vmul.f32 %v4406_v18, %v4404_v35  ;;  %v3926_v35 = vld [vmem:[%s4922_s16 + $0x60] sm:$0xff] }
 0x447   : > { %v2975_v63 = vmul.f32 %v4408_v56, %v6515_v49  ;;  %v4410_v23 = vpop.eup %4409  ;;  %v7627_v56 = vld [vmem:[#allocation118_spill] sm:$0xff] }
 0x448   : > { %3274 = vmatpush1.bf16.msra.mxu0 %v6501_v20  ;;  %3315 = vmatpush1.bf16.msra.mxu1 %v6504_v32  ;;  %v7603_v20 = vld [vmem:[#allocation94_spill] sm:$0xff]  ;;  %v7604_v32 = vld [vmem:[#allocation95_spill] sm:$0xff] }
 0x449   : > { %3275 = vmatprep.subr.bf16.mxu0 %v7598_v0  ;;  %3316 = vmatprep.subr.bf16.mxu1 %v7599_v37  ;;  %v2977_v29 = vadd.f32 %v2976_v62, %v2975_v63 }
 0x44b   : > { %4411 = vtanh.f32 %v2977_v29  ;;  %v6844_v40 = vsel %vm2992_vm8, %v2977_v29, %v6515_v49  ;;  %v7609_v49 = vld [vmem:[#allocation100_spill] sm:$0xff] }
 0x44c   : > { %3276 = vmatpush1.bf16.msra.mxu0 %v7600_v4  ;;  %3317 = vmatpush1.bf16.msra.mxu1 %v7601_v5 }
 0x44d   : > { %3277 = vmatprep.subr.bf16.mxu0 %v7602_v6  ;;  %3318 = vmatprep.subr.bf16.mxu1 %v7603_v20  ;;  %v7628_v20 = vld [vmem:[#allocation119_spill] sm:$0xff] }
 0x450   : > { %3278 = vmatpush1.bf16.msra.mxu0 %v7604_v32  ;;  %3319 = vmatpush1.bf16.msra.mxu1 %v7605_v33  ;;  %v7629_v32 = vld [vmem:[#allocation120_spill] sm:$0xff] }
 0x451   : > { %3279 = vmatprep.subr.bf16.mxu0 %v7606_v19  ;;  %3320 = vmatprep.subr.bf16.mxu1 %v7607_v26  ;;  %v3929_v33 = vld [vmem:[%s4922_s16 + $0x78] sm:$0xff]  ;;  %v7630_v19 = vld [vmem:[#allocation121_spill] sm:$0xff]  ;;  %v7631_v26 = vld [vmem:[#allocation122_spill] sm:$0xff] }
 0x454   : > { %3280 = vmatpush1.bf16.msra.mxu0 %v7608_v53  ;;  %3321 = vmatpush1.bf16.msra.mxu1 %v7609_v49  ;;  %v7632_v53 = vld [vmem:[#allocation123_spill] sm:$0xff]  ;;  %v7633_v49 = vld [vmem:[#allocation124_spill] sm:$0xff] }
 0x455   : > { %v4412_v54 = vpop.eup %4411  ;;  %3281 = vmatprep.subr.bf16.mxu0 %v7610_v52  ;;  %3322 = vmatprep.subr.bf16.mxu1 %v6550_v50  ;;  %v7612_v50 = vld [vmem:[#allocation103_spill] sm:$0xff]  ;;  %v7635_v52 = vld [vmem:[#allocation126_spill] sm:$0xff] }
 0x456   : > { %v2979_v30 = vmul.f32 %v4412_v54, %v4410_v23  ;;  %v7634_v54 = vld [vmem:[#allocation125_spill] sm:$0xff] }
 0x458   : > { %3282 = vmatpush1.bf16.msra.mxu0 %v6553_v48  ;;  %3323 = vmatpush1.bf16.msra.mxu1 %v6556_v7  ;;  %v6862_v2 = vsel %vm2992_vm8, %v2979_v30, %v6561_v24  ;;  %v7613_v48 = vld [vmem:[#allocation104_spill] sm:$0xff]  ;;  %v7614_v7 = vld [vmem:[#allocation105_spill] sm:$0xff]  ;;  %v3928_v30 = vld [vmem:[%s4922_s16 + $0x70] sm:$0xff]  ;;  %s6905_s16 = sadd.s32 3, %s4915_s20 }
 0x459   : > { %3349 = vmatprep.subr.bf16.mxu0 %v6563_v57  ;;  %3390 = vmatprep.subr.bf16.mxu1 %v7611_v15  ;;  %v3007_v27 = vpack.c.bf16 %v6862_v2, %v6862_v2  ;;  %v7616_v57 = vld [vmem:[#allocation107_spill] sm:$0xff]  ;;  %v7617_v24 = vld [vmem:[#allocation108_spill] sm:$0xff]  ;;  %p2996_p2 = scmp.lt.s32.totalorder %s6905_s16, 8  ;;  %p2997_p8 = scmp.ge.s32.totalorder %s6905_s16, 1 }
 0x45a   : > { %p2998_p3 = scmp.le.s32.totalorder %s6905_s16, 8  ;;  %p3001_p7 = scmp.ge.s32.totalorder %s6905_s16, 2 }
 0x45b   : > { %3300 = vmatmul.mubr.bf16.vlgmr.msra.gmra.mrb[72].mxu0 %v3007_v27  ;;  %3341 = vmatmul.mubr.bf16.vlgmr.msra.gmra.mrb[72].mxu1 %v3007_v27  ;;  %s3507_s25 = scalar_select %p2996_p2, 1, 0 }
 0x45c   : > { %3350 = vmatpush1.bf16.msra.mxu0 %v7612_v50  ;;  %3391 = vmatpush1.bf16.msra.mxu1 %v7613_v48  ;;  %p2999_p4 = pnand %p2998_p3, %p2997_p8  ;;  %p3002_p6 = scmp.le.s32.totalorder %s6905_s16, 9 }
 0x45d   : > { %3351 = vmatprep.subr.bf16.mxu0 %v7614_v7  ;;  %3392 = vmatprep.subr.bf16.mxu1 %v7615_v42  ;;  %v3508_v42 = vstv %s3507_s25 }
 0x45e   : > { %3381 = vmatprep.mubr.bf16.mxu0 %v7228_v3  ;;  %3422 = vmatprep.mubr.bf16.mxu1 %v7228_v3  ;;  %v7625_v3 = vld [vmem:[#allocation116_spill] sm:$0xff]  ;;  %vm3509_vm9 = vcmp.eq.s32.totalorder %v3508_v42, 1  ;;  %s3939_s20 = scalar_select %p2999_p4, 0, 1 }
 0x45f   : > { %p3003_p9 = pnand %p3002_p6, %p3001_p7 }
 0x460   : > { %3352 = vmatpush1.bf16.msra.mxu0 %v7616_v57  ;;  %3393 = vmatpush1.bf16.msra.mxu1 %v7617_v24 }
 0x461   : > { %3353 = vmatprep.subr.bf16.mxu0 %v7618_v39  ;;  %3394 = vmatprep.subr.bf16.mxu1 %v7619_v43  ;;  %s3940_s26 = scalar_select %p3003_p9, 0, 1 }
 0x464   : > { %3354 = vmatpush1.bf16.msra.mxu0 %v7620_v10  ;;  %3395 = vmatpush1.bf16.msra.mxu1 %v7621_v45 }
 0x465   : > { %3355 = vmatprep.subr.bf16.mxu0 %v7622_v46  ;;  %3396 = vmatprep.subr.bf16.mxu1 %v7623_v14 }
 0x468   : > { %3356 = vmatpush1.bf16.msra.mxu0 %v7624_v60  ;;  %3397 = vmatpush1.bf16.msra.mxu1 %v7625_v3  ;;  %v3047_v18 = vpop.f32.mrb[60].mxu0  ;;  %v3088_v59 = vpop.f32.mrb[60].mxu1 }
 0x469   : > { %v3095_v38 = vadd.f32 %v3926_v35, %v3047_v18  ;;  %3357 = vmatprep.subr.bf16.mxu0 %v7626_v55  ;;  %3398 = vmatprep.subr.bf16.mxu1 %v7627_v56  ;;  %v3049_v62 = vpop.f32.mrb[61].mxu0  ;;  %v3090_v13 = vpop.f32.mrb[61].mxu1  ;;  %v3097_v27 = vadd.f32 %v3928_v30, %v3088_v59 }
 0x46a   : > { %v3096_v63 = vadd.f32 %v3927_v16, %v3049_v62  ;;  %v3051_v0 = vpop.f32.mrb[62].mxu0  ;;  %v3092_v37 = vpop.f32.mrb[62].mxu1  ;;  %v3098_v23 = vadd.f32 %v3929_v33, %v3090_v13 }
 0x46b   : > { %v3930_v29 = vmul.f32 -1.442695, %v3095_v38  ;;  %v3052_v4 = vpop.f32.mrb[63].mxu0  ;;  %v3093_v5 = vpop.f32.mrb[63].mxu1 }
 0x46c   : > { %v3931_v6 = vmul.f32 -1.442695, %v3096_v63  ;;  %3358 = vmatpush1.bf16.msra.mxu0 %v7628_v20  ;;  %3399 = vmatpush1.bf16.msra.mxu1 %v7629_v32  ;;  %v3932_v15 = vmul.f32 -1.442695, %v3098_v23 }
 0x46d   : > { %4413 = vpow2.f32 %v3930_v29  ;;  %3359 = vmatprep.subr.bf16.mxu0 %v7630_v19  ;;  %3400 = vmatprep.subr.bf16.mxu1 %v7631_v26 }
 0x46e   : > { %4415 = vpow2.f32 %v3931_v6 }
 0x46f   : > { %4417 = vpow2.f32 %v3932_v15  ;;  %v3513_v15 = vstv %s3939_s20 }
 0x470   : > { %3360 = vmatpush1.bf16.msra.mxu0 %v7632_v53  ;;  %3401 = vmatpush1.bf16.msra.mxu1 %v7633_v49  ;;  %4419 = vtanh.f32 %v3097_v27  ;;  %vm3514_vm10 = vcmp.eq.s32.totalorder %v3513_v15, 1  ;;  %v4628_v15 = vld [vmem:[%s6973_s8 + $0x38] sm:$0xff] (!%p3941_p10)  }
 0x471   : > { %3361 = vmatprep.subr.bf16.mxu0 %v7634_v54  ;;  %3402 = vmatprep.subr.bf16.mxu1 %v7635_v52 }
 0x474   : > { %3362 = vmatpush1.bf16.msra.mxu0 %v6645_v22  ;;  %3403 = vmatpush1.bf16.msra.mxu1 %v6648_v47 }
 0x475   : > { %3363 = vmatprep.subr.bf16.mxu0 %v6651_v36  ;;  %3404 = vmatprep.subr.bf16.mxu1 %v6654_v21 }
 0x477   : > { %v4414_v50 = vpop.eup %4413 }
 0x478   : > { %v4416_v48 = vpop.eup %4415  ;;  %v3438_v7 = vadd.f32 1.0, %v4414_v50  ;;  %3364 = vmatpush1.bf16.msra.mxu0 %v6657_v17  ;;  %3405 = vmatpush1.bf16.msra.mxu1 %v6660_v51 }
 0x479   : > { %v3444_v22 = vadd.f32 1.0, %v4416_v48  ;;  %v4418_v21 = vpop.eup %4417 }
 0x47a   : > { %4421 = vrcp.f32 %v3438_v7  ;;  %v4420_v47 = vpop.eup %4419  ;;  %v3451_v51 = vadd.f32 1.0, %v4418_v21 }
 0x47b   : > { %4423 = vrcp.f32 %v3444_v22  ;;  %3382 = vmatmul.mubr.bf16.vlgmr.msra.gmra.mrb[76].mxu0 %v6771_v34  ;;  %3423 = vmatmul.mubr.bf16.vlgmr.msra.gmra.mrb[76].mxu1 %v6771_v34 }
 0x47c   : > { %4425 = vrcp.f32 %v3451_v51 }
 0x484   : > { %v4422_v36 = vpop.eup %4421 }
 0x485   : > { %v4424_v17 = vpop.eup %4423  ;;  %v3455_v57 = vmul.f32 %v4422_v36, %v4420_v47 }
 0x486   : > { %v3454_v24 = vmul.f32 %v4424_v17, %v6711_v28  ;;  %v4426_v10 = vpop.eup %4425 }
 0x488   : > { %v3456_v39 = vadd.f32 %v3455_v57, %v3454_v24 }
 0x48a   : > { %4427 = vtanh.f32 %v3456_v39  ;;  %v3511_v43 = vsel %vm3509_vm9, %v3456_v39, %v6711_v28 }
 0x48b   : > { %3523 = vst [vmem:[#allocation3] sm:$0xff] %v3511_v43 }
 0x494   : > { %v4428_v34 = vpop.eup %4427 }
 0x495   : > { %v3458_v45 = vmul.f32 %v4428_v34, %v4426_v10 }
 0x497   : > { %v3510_v46 = vsel %vm3509_vm9, %v3458_v45, %v6714_v8 }
 0x498   : > { %3522 = vst [vmem:[#allocation2] sm:$0xff] %v3510_v46 }
 0x4ee   : > { %v3133_v14 = vpop.f32.mrb[64].mxu0  ;;  %v3174_v35 = vpop.f32.mrb[64].mxu1 }
 0x4ef   : > { %v3135_v16 = vpop.f32.mrb[65].mxu0  ;;  %v3176_v60 = vpop.f32.mrb[65].mxu1 }
 0x4f0   : > { %v3137_v3 = vpop.f32.mrb[66].mxu0  ;;  %v3178_v18 = vpop.f32.mrb[66].mxu1 }
 0x4f1   : > { %v3138_v59 = vpop.f32.mrb[67].mxu0  ;;  %v3179_v38 = vpop.f32.mrb[67].mxu1 }
 0x50e   : > { %v3215_v55 = vpop.f32.mrb[68].mxu0  ;;  %v3256_v56 = vpop.f32.mrb[68].mxu1 }
 0x50f   : > { %v3216_v62 = vadd.f32 %v3215_v55, %v3133_v14  ;;  %v3257_v13 = vadd.f32 %v3256_v56, %v3174_v35  ;;  %v3217_v28 = vpop.f32.mrb[69].mxu0  ;;  %v3258_v63 = vpop.f32.mrb[69].mxu1 }
 0x510   : > { %v3218_v0 = vadd.f32 %v3217_v28, %v3135_v16  ;;  %v3259_v37 = vadd.f32 %v3258_v63, %v3176_v60  ;;  %v3219_v29 = vpop.f32.mrb[70].mxu0  ;;  %v3260_v8 = vpop.f32.mrb[70].mxu1 }
 0x511   : > { %v3263_v4 = vadd.f32 %v3216_v62, %v5715_v41  ;;  %v3220_v5 = vpop.f32.mrb[71].mxu0  ;;  %v3261_v6 = vpop.f32.mrb[71].mxu1  ;;  %v3265_v23 = vadd.f32 %v3257_v13, %v5744_v31 }
 0x512   : > { %v3264_v20 = vadd.f32 %v3218_v0, %v5721_v44  ;;  %v3266_v19 = vadd.f32 %v3259_v37, %v5734_v25  ;;  %v3518_v5 = vstv %s3940_s26 }
 0x513   : > { %v3933_v32 = vmul.f32 -1.442695, %v3263_v4  ;;  %vm3519_vm11 = vcmp.eq.s32.totalorder %v3518_v5, 1 }
 0x514   : > { %v3934_v33 = vmul.f32 -1.442695, %v3264_v20  ;;  %v3935_v26 = vmul.f32 -1.442695, %v3266_v19 }
 0x515   : > { %4429 = vpow2.f32 %v3933_v32 }
 0x516   : > { %4431 = vpow2.f32 %v3934_v33 }
 0x517   : > { %4433 = vpow2.f32 %v3935_v26 }
 0x518   : > { %4435 = vtanh.f32 %v3265_v23 }
 0x51f   : > { %v4430_v53 = vpop.eup %4429 }
 0x520   : > { %v4432_v49 = vpop.eup %4431  ;;  %v3462_v54 = vadd.f32 1.0, %v4430_v53 }
 0x521   : > { %v3468_v41 = vadd.f32 1.0, %v4432_v49  ;;  %v4434_v44 = vpop.eup %4433  ;;  %v4621_v49 = vld [vmem:[%s6973_s8] sm:$0xff] (!%p3941_p10)  }
 0x522   : > { %4437 = vrcp.f32 %v3462_v54  ;;  %v4436_v52 = vpop.eup %4435  ;;  %v3475_v50 = vadd.f32 1.0, %v4434_v44  ;;  %v4740_v54 = vmov (!%p3941_p10), 0.0   ;;  %v4625_v44 = vld [vmem:[%s6973_s8 + $0x20] sm:$0xff] (!%p3941_p10)  }
 0x523   : > { %4439 = vrcp.f32 %v3468_v41  ;;  %3964 = vmatprep.subr.bf16.mxu0 (!%p3941_p10), %v4740_v54  ;;  %3980 = vmatprep.mubr.msk.bf16.mxu0 (!%p3941_p10), %vm4741_vm12, %v4740_v54  ;;  %v4624_v41 = vld [vmem:[%s6973_s8 + $0x18] sm:$0xff] (!%p3941_p10)  }
 0x524   : > { %4441 = vrcp.f32 %v3475_v50  ;;  %3965 = vmatpush3.bf16.msra.mxu0 (!%p3941_p10), %v4621_v49 }
 0x525   : > { %3966 = vmatprep.subr.bf16.mxu0 (!%p3941_p10), %v4740_v54 }
 0x52c   : > { %v4438_v30 = vpop.eup %4437 }
 0x52d   : > { %v4440_v25 = vpop.eup %4439  ;;  %v3479_v27 = vmul.f32 %v4438_v30, %v4436_v52  ;;  %v4626_v52 = vld [vmem:[%s6973_s8 + $0x28] sm:$0xff] (!%p3941_p10)   ;;  %v4627_v30 = vld [vmem:[%s6973_s8 + $0x30] sm:$0xff] (!%p3941_p10)  }
 0x52e   : > { %v3478_v31 = vmul.f32 %v4440_v25, %v6764_v58  ;;  %v3301_v48 = vpop.f32.mrb[72].mxu0  ;;  %v3342_v7 = vpop.f32.mrb[72].mxu1 }
 0x52f   : > { %v3303_v22 = vpop.f32.mrb[73].mxu0  ;;  %v3344_v21 = vpop.f32.mrb[73].mxu1 }
 0x530   : > { %v3480_v47 = vadd.f32 %v3479_v27, %v3478_v31  ;;  %v3305_v36 = vpop.f32.mrb[74].mxu0  ;;  %v3346_v42 = vpop.f32.mrb[74].mxu1  ;;  %v3942_v27 = vld [vmem:[%s6974_s9] ss:$0 sm:$0xff] (!%p3941_p10) }
 0x531   : > { %v3306_v17 = vpop.f32.mrb[75].mxu0  ;;  %v3347_v57 = vpop.f32.mrb[75].mxu1 }
 0x532   : > { %4443 = vtanh.f32 %v3480_v47  ;;  %v3516_v51 = vsel %vm3514_vm10, %v3480_v47, %v6764_v58  ;;  %v4442_v24 = vpop.eup %4441 }
 0x533   : > { %3525 = vst [vmem:[#allocation5] sm:$0xff] %v3516_v51 }
 0x53c   : > { %v4444_v39 = vpop.eup %4443 }
 0x53d   : > { %v3482_v43 = vmul.f32 %v4444_v39, %v4442_v24 }
 0x53f   : > { %v3515_v10 = vsel %vm3514_vm10, %v3482_v43, %v6767_v11 }
 0x540   : > { %3524 = vst [vmem:[#allocation4] sm:$0xff] %v3515_v10 }
 0x54e   : > { %v3383_v34 = vpop.f32.mrb[76].mxu0  ;;  %v3424_v45 = vpop.f32.mrb[76].mxu1 }
 0x54f   : > { %v3384_v46 = vadd.f32 %v3383_v34, %v3301_v48  ;;  %v3425_v14 = vadd.f32 %v3424_v45, %v3342_v7  ;;  %v3385_v35 = vpop.f32.mrb[77].mxu0  ;;  %v3426_v16 = vpop.f32.mrb[77].mxu1 }
 0x550   : > { %v3386_v60 = vadd.f32 %v3385_v35, %v3303_v22  ;;  %v3427_v3 = vadd.f32 %v3426_v16, %v3344_v21  ;;  %v3387_v18 = vpop.f32.mrb[78].mxu0  ;;  %v3428_v59 = vpop.f32.mrb[78].mxu1 }
 0x551   : > { %v3431_v58 = vadd.f32 %v3384_v46, %v5787_v9  ;;  %v3388_v38 = vpop.f32.mrb[79].mxu0  ;;  %v3429_v55 = vpop.f32.mrb[79].mxu1  ;;  %v3433_v63 = vadd.f32 %v3425_v14, %v7580_v1 }
 0x552   : > { %v3432_v56 = vadd.f32 %v3386_v60, %v5791_v12  ;;  %v3434_v13 = vadd.f32 %v3427_v3, %v7573_v61 }
 0x553   : > { %v3936_v11 = vmul.f32 -1.442695, %v3431_v58 }
 0x554   : > { %v3937_v62 = vmul.f32 -1.442695, %v3432_v56  ;;  %v3938_v28 = vmul.f32 -1.442695, %v3434_v13 }
 0x555   : > { %4445 = vpow2.f32 %v3936_v11 }
 0x556   : > { %4447 = vpow2.f32 %v3937_v62 }
 0x557   : > { %4449 = vpow2.f32 %v3938_v28 }
 0x558   : > { %4451 = vtanh.f32 %v3433_v63 }
 0x55f   : > { %v4446_v0 = vpop.eup %4445 }
 0x560   : > { %v4448_v37 = vpop.eup %4447  ;;  %v3486_v29 = vadd.f32 1.0, %v4446_v0 }
 0x561   : > { %v3492_v9 = vadd.f32 1.0, %v4448_v37  ;;  %v4450_v12 = vpop.eup %4449 }
 0x562   : > { %4453 = vrcp.f32 %v3486_v29  ;;  %v4452_v8 = vpop.eup %4451  ;;  %v3499_v20 = vadd.f32 1.0, %v4450_v12 }
 0x563   : > { %4455 = vrcp.f32 %v3492_v9 }
 0x564   : > { %4457 = vrcp.f32 %v3499_v20 }
 0x56c   : > { %v4454_v4 = vpop.eup %4453 }
 0x56d   : > { %v4456_v61 = vpop.eup %4455  ;;  %v3503_v6 = vmul.f32 %v4454_v4, %v4452_v8 }
 0x56e   : > { %v3502_v1 = vmul.f32 %v4456_v61, %v6844_v40  ;;  %v4458_v19 = vpop.eup %4457 }
 0x570   : > { %v3504_v32 = vadd.f32 %v3503_v6, %v3502_v1 }
 0x572   : > { %4459 = vtanh.f32 %v3504_v32  ;;  %v3521_v33 = vsel %vm3519_vm11, %v3504_v32, %v6844_v40  ;;  %v4622_v40 = vld [vmem:[%s6973_s8 + $0x8] sm:$0xff] (!%p3941_p10)  }
 0x573   : > { %3527 = vst [vmem:[#allocation7] sm:$0xff] %v3521_v33  ;;  %3967 = vmatpush3.bf16.msra.mxu0 (!%p3941_p10), %v4622_v40 }
 0x574   : > { %3968 = vmatprep.subr.bf16.mxu0 (!%p3941_p10), %v4740_v54 }
 0x57a   : > { %3531 = sbr.rel (%p3941_p10) target bundleno = 1672 (0x688), region = 80 }
 0x57c   : > { %v4460_v26 = vpop.eup %4459 }
 0x57d   : > { %v3506_v23 = vmul.f32 %v4460_v26, %v4458_v19 }
 0x57f   : > { %v3520_v53 = vsel %vm3519_vm11, %v3506_v23, %v6862_v2  ;;  %v4623_v2 = vld [vmem:[%s6973_s8 + $0x10] sm:$0xff] (!%p3941_p10)  }
 0x580   : > { %3526 = vst [vmem:[#allocation6] sm:$0xff] %v3520_v53  ;;  %3969 = vmatpush3.bf16.msra.mxu0 (!%p3941_p10), %v4623_v2  ;;  %v3532_v25 = vpack.c.bf16 (!%p3941_p10), %v3520_v53, %v3520_v53 }
 0x581   : > { %3970 = vmatprep.subr.bf16.mxu0 %v4740_v54 }
 0x584   : > { %3971 = vmatpush3.bf16.msra.mxu0 %v4624_v41 }
 0x585   : > { %3972 = vmatprep.subr.bf16.mxu0 %v4740_v54 }
 0x588   : > { %3973 = vmatpush3.bf16.msra.mxu0 %v4625_v44 }
 0x589   : > { %3974 = vmatprep.subr.bf16.mxu0 %v4740_v54 }
 0x58c   : > { %3975 = vmatpush3.bf16.msra.mxu0 %v4626_v52 }
 0x58d   : > { %3976 = vmatprep.subr.bf16.mxu0 %v4740_v54 }
 0x590   : > { %3977 = vmatpush3.bf16.msra.mxu0 %v4627_v30 }
 0x591   : > { %3978 = vmatprep.subr.bf16.mxu0 %v4740_v54 }
 0x594   : > { %3979 = vmatpush3.bf16.msra.mxu0 %v4628_v15 }
 0x597   : > { %3981 = vmatmul.mubr.bf16.vlgmr.msra.gmra.mrb[0].mxu0 %v3532_v25 }
 0x66a   : > { %v3638_v50 = vpop.f32.mrb[0].mxu0 }
 0x66b   : > { %v3639_v31 = vadd.f32 %v3942_v27, %v3638_v50  ;;  %v3982_v48 = vpop.f32.mrb[1].mxu0 }
 0x66c   : > { %v3641_v7 = vpop.f32.mrb[2].mxu0 }
 0x66d   : > { %v3951_v22 = vmul.f32 -1.442695, %v3639_v31  ;;  %v3983_v21 = vpop.f32.mrb[3].mxu0 }
 0x66f   : > { %4629 = vpow2.f32 %v3951_v22 }
 0x679   : > { %v4630_v47 = vpop.eup %4629 }
 0x67a   : > { %v3647_v36 = vadd.f32 1.0, %v4630_v47 }
 0x67c   : > { %4631 = vrcp.f32 %v3647_v36 }
 0x686   : > { %v4632_v42 = vpop.eup %4631 }
 0x687   : > { %3650 = vst [vmem:[%s6975_s10] sm:$0xff] %v4632_v42 }
 0x688 PF: > { %s22_s13 = sadd.s32 1, %s4731_s13  }
 0x689   : > { %p19_p11 = scmp.ge.s32.totalorder %s22_s13, 5  }
 0x68b   :  { %21 = sbr.rel (!%p19_p11) target bundleno = 2 (0x2), region = 110 }
 0x692   :  { %3662 = vsyncpa [#allocation9], 1 }
 0x693   :  { %3664 = vsyncpa [#allocation9 + $0x1], 1 }
 0x694   :  { %3665 = vsyncpa [#allocation11], 1 }

</bundles_post_ra>
